<compile_context>
chip_gen: v6e
topology: v6e:2x2x1
jax: 0.10.0
libtpu: 0.0.40
codegen_flags: <defaults>
</compile_context>

<pallas_src>
import functools

import jax
import jax.numpy as jnp
from jax import lax
from jax.experimental import pallas as pl
from jax.experimental.pallas import tpu as pltpu

NEG_SLOPE = 0.2
_LANE = 128


def _round_up(x, m):
    return (x + m - 1) // m * m


@functools.lru_cache(maxsize=1)
def _vmem_limit_bytes():
    """Generation-aware scoped-VMEM limit: 64 MiB on 128 MiB parts, 32 MiB on v7x."""
    try:
        cap = pltpu.get_tpu_info().vmem_capacity_bytes
    except Exception:
        cap = 64 * 1024 * 1024
    return int(min(cap // 2, 64 * 1024 * 1024))


def _choose_tile_h(batch, ho, ws, wo, kp, npad, out_bytes):
    """Largest output-row tile that divides Ho, fits VMEM, and keeps >=2 grid steps."""
    budget = (_vmem_limit_bytes() * 3) // 4
    # Conservative double-buffered accounting (weights / bias / halo counted 2x
    # even though their index maps are constant or tiny).
    fixed = 2 * (4 * kp * npad * 2 + ws * kp * 2 + npad * 4)
    per_row = 2 * (ws * kp * 2 + wo * npad * out_bytes)
    th_cap = (budget - fixed) // per_row if budget > fixed else 1
    th_cap = max(1, int(th_cap))
    if batch == 1 and ho >= 2:
        th_cap = min(th_cap, ho // 2)      # >=2 parallel steps for v7x's two TCs
    th_cap = min(th_cap, ho)
    for cand in range(th_cap, 0, -1):
        if ho % cand == 0:
            return cand
    return 1


# ----------------------------- Pallas kernel ---------------------------------
def _conv4x4_tap_kernel(xa_ref, xb_ref, w_ref, b_ref, o_ref, *, apply_lrelu):
    """One (batch, row-tile) grid step of a 4x4/stride-2 conv on s2d input.

    xa_ref: (1, th, Ws, Kp)  bf16  space-to-depth rows [r0, r0+th)
    xb_ref: (1, 1,  Ws, Kp)  bf16  halo row r0+th
    w_ref : (4, Kp, Npad)    bf16  per-tap weights, tap index = 2*dh + dw
    b_ref : (1, Npad)        f32
    o_ref : (1, th, Wo, Npad)      output rows [r0, r0+th)
    """
    th = o_ref.shape[1]
    wo = o_ref.shape[2]
    bias = b_ref[...]

    def one_row(top_r, bot_ref, bot_r):
        # 4 accumulating MXU matmuls: (Wo, Kp) @ (Kp, Npad) -> f32.
        acc = jnp.dot(xa_ref[0, top_r, pl.ds(0, wo), :], w_ref[0],
                      preferred_element_type=jnp.float32)
        acc = acc + jnp.dot(xa_ref[0, top_r, pl.ds(1, wo), :], w_ref[1],
                            preferred_element_type=jnp.float32)
        acc = acc + jnp.dot(bot_ref[0, bot_r, pl.ds(0, wo), :], w_ref[2],
                            preferred_element_type=jnp.float32)
        acc = acc + jnp.dot(bot_ref[0, bot_r, pl.ds(1, wo), :], w_ref[3],
                            preferred_element_type=jnp.float32)
        acc = acc + bias                          # f32 bias
        if apply_lrelu:                           # f32 LeakyReLU (free VPU slots)
            acc = jnp.where(acc >= 0.0, acc, NEG_SLOPE * acc)
        return acc.astype(o_ref.dtype)

    def body(r, carry):
        o_ref[0, r] = one_row(r, xa_ref, r + 1)   # bottom row comes from this tile
        return carry

    lax.fori_loop(0, th - 1, body, 0)
    # Last output row of the tile uses the halo row as its bottom s2d row.
    o_ref[0, th - 1] = one_row(th - 1, xb_ref, 0)


# ------------------------------ layer wrapper ---------------------------------
def conv4x4_s2_p1(x_nhwc, w_oihw, b, *, apply_lrelu, out_dtype):
    B, H, W, Cin = x_nhwc.shape
    assert H % 2 == 0 and W % 2 == 0, "stride-2 conv stack expects even spatial dims"
    Cout = w_oihw.shape[0]
    Ho, Wo = H // 2, W // 2
    Hs, Ws = Ho + 1, Wo + 1
    cin_pad = _round_up(Cin, 32)            # => Kp = 4*cin_pad is a multiple of 128
    kp = 4 * cin_pad
    npad = _round_up(Cout, _LANE)           # lane-dense MXU tiles / stores

    # ---- input: bf16, channel pad, spatial pad(1), space-to-depth by 2 -------
    x = x_nhwc.astype(jnp.bfloat16)
    if cin_pad != Cin:
        x = jnp.pad(x, ((0, 0), (0, 0), (0, 0), (0, cin_pad - Cin)))
    xp = jnp.pad(x, ((0, 0), (1, 1), (1, 1), (0, 0)))            # (B, H+2, W+2, Cp)
    xs = xp.reshape(B, Hs, 2, Ws, 2, cin_pad)
    xs = xs.transpose(0, 1, 3, 2, 4, 5).reshape(B, Hs, Ws, kp)   # (B, Hs, Ws, 4*Cp)

    # ---- weights: (Cout,Cin,4,4) -> per-tap (4, Kp, Npad); tap = 2*dh + dw ----
    w_t = jnp.transpose(w_oihw, (2, 3, 1, 0)).astype(jnp.bfloat16)   # (4,4,Cin,Cout)
    w_t = jnp.pad(w_t, ((0, 0), (0, 0), (0, cin_pad - Cin), (0, npad - Cout)))
    w_taps = w_t.reshape(2, 2, 2, 2, cin_pad, npad)                  # (dh,p,dw,q,c,co)
    w_taps = w_taps.transpose(0, 2, 1, 3, 4, 5).reshape(4, kp, npad)

    bias_row = jnp.pad(b.astype(jnp.float32), (0, npad - Cout)).reshape(1, npad)

    out_bytes = jnp.dtype(out_dtype).itemsize
    th = _choose_tile_h(B, Ho, Ws, Wo, kp, npad, out_bytes)
    n_h = Ho // th

    kernel = functools.partial(_conv4x4_tap_kernel, apply_lrelu=apply_lrelu)
    y = pl.pallas_call(
        kernel,
        out_shape=jax.ShapeDtypeStruct((B, Ho, Wo, npad), out_dtype),
        grid=(B, n_h),
        in_specs=[
            # main row band [i*th, (i+1)*th)
            pl.BlockSpec((1, th, Ws, kp), lambda bi, i: (bi, i, 0, 0)),
            # 1-row halo at row (i+1)*th (block size 1 => block index == row index)
            pl.BlockSpec((1, 1, Ws, kp), lambda bi, i, _th=th: (bi, (i + 1) * _th, 0, 0)),
            # resident per-tap weights + bias
            pl.BlockSpec((4, kp, npad), lambda bi, i: (0, 0, 0)),
            pl.BlockSpec((1, npad), lambda bi, i: (0, 0)),
        ],
        out_specs=pl.BlockSpec((1, th, Wo, npad), lambda bi, i: (bi, i, 0, 0)),
        compiler_params=pltpu.CompilerParams(
            dimension_semantics=("parallel", "parallel"),
            vmem_limit_bytes=_vmem_limit_bytes(),
        ),
    )(xs, xs, w_taps, bias_row)

    return y[..., :Cout]


_LAYERS = ("conv1", "conv2", "conv3", "conv4", "classifier")


def fc_discriminator_forward(x_nchw, params):
    x = jnp.transpose(x_nchw, (0, 2, 3, 1))          # NCHW -> NHWC
    n = len(_LAYERS)
    for i, name in enumerate(_LAYERS):
        w, b = params[name]
        last = i == n - 1
        x = conv4x4_s2_p1(x, w, b, apply_lrelu=not last,
                          out_dtype=jnp.float32 if last else jnp.bfloat16)
    return jnp.transpose(x, (0, 3, 1, 2))            # NHWC -> NCHW


# ----------------------- deterministic parameter init -------------------------
def init_params(key, num_classes, ndf):
    dims = [
        (ndf, num_classes),
        (ndf * 2, ndf),
        (ndf * 4, ndf * 2),
        (ndf * 8, ndf * 4),
        (1, ndf * 8),
    ]
    params = {}
    for name, (cout, cin) in zip(_LAYERS, dims):
        key, kw, kb = jax.random.split(key, 3)
        fan_in = cin * 4 * 4
        scale = 1.0 / jnp.sqrt(jnp.float32(fan_in))
        w = jax.random.normal(kw, (cout, cin, 4, 4), jnp.float32) * scale
        b = jax.random.normal(kb, (cout,), jnp.float32) * 0.01
        params[name] = (w, b)
    return params


# ------------------------------ reference --------------------------------------
def _ref_forward(x_nchw, params, compute_dtype=jnp.float32):
    """XLA reference. compute_dtype=bfloat16 mirrors the kernel's operand dtype."""
    x = x_nchw
    for i, name in enumerate(_LAYERS):
        w, b = params[name]
        y = lax.conv_general_dilated(
            x.astype(compute_dtype), w.astype(compute_dtype),
            window_strides=(2, 2), padding=[(1, 1), (1, 1)],
            dimension_numbers=("NCHW", "OIHW", "NCHW"),
            preferred_element_type=jnp.float32)
        y = y + b[None, :, None, None].astype(jnp.float32)
        if i < 4:
            y = jnp.where(y >= 0.0, y, NEG_SLOPE * y)
        x = y
    return x


if __name__ == "__main__":
    # Spatial 32 is the smallest size that survives five stride-2 convs (32 -> 1).
    B, num_classes, ndf, H, W = 2, 4, 16, 32, 32

    key = jax.random.PRNGKey(0)
    key, kx = jax.random.split(key)
    x = jax.random.normal(kx, (B, num_classes, H, W), jnp.float32)
    params = init_params(key, num_classes, ndf)

    out = jax.block_until_ready(jax.jit(fc_discriminator_forward)(x, params))
    assert out.shape == (B, 1, 1, 1), out.shape

    # Matched-precision reference (bf16 operands / intermediates, f32 accumulation).
    ref_bf16 = jax.block_until_ready(_ref_forward(x, params, jnp.bfloat16))
    assert jnp.allclose(out, ref_bf16, atol=1e-2, rtol=1e-2), \
        float(jnp.max(jnp.abs(out - ref_bf16)))

    # Full-f32 reference -> semantics preserved up to bf16 rounding.
    ref_f32 = jax.block_until_ready(_ref_forward(x, params, jnp.float32))
    assert jnp.allclose(out, ref_f32, atol=6e-2, rtol=6e-2), \
        float(jnp.max(jnp.abs(out - ref_f32)))

    print("KERNEL_OK")
</pallas_src>

<mosaic_0001>
module attributes {stable_mosaic.version = 11 : i64} {
  func.func @_conv4x4_tap_kernel(%arg0: i32, %arg1: i32, %arg2: memref<1x16x17x128xbf16, #tpu.memory_space<vmem>>, %arg3: memref<1x1x17x128xbf16, #tpu.memory_space<vmem>>, %arg4: memref<4x128x128xbf16, #tpu.memory_space<vmem>>, %arg5: memref<1x128xf32, #tpu.memory_space<vmem>>, %arg6: memref<1x16x16x128xbf16, #tpu.memory_space<vmem>>) attributes {dimension_semantics = [#tpu.dimension_semantics<parallel>, #tpu.dimension_semantics<parallel>], iteration_bounds = array<i64: 2, 1>, scalar_prefetch = 0 : i64, scratch_operands = 0 : i64, tpu.core_type = #tpu.core_type<tc>, window_params = [{transform_indices = @transform_0, window_bounds = array<i64: 1, 16, 17, 128>}, {transform_indices = @transform_1, window_bounds = array<i64: 1, 1, 17, 128>}, {pipeline_mode = #tpu.pipeline_mode<synchronous>, transform_indices = @transform_2, window_bounds = array<i64: 4, 128, 128>}, {pipeline_mode = #tpu.pipeline_mode<synchronous>, transform_indices = @transform_3, window_bounds = array<i64: 1, 128>}, {transform_indices = @transform_4, window_bounds = array<i64: 1, 16, 16, 128>}]} {
    %c0 = arith.constant 0 : index
    %c0_0 = arith.constant 0 : index
    %0 = vector.load %arg5[%c0, %c0_0] : memref<1x128xf32, #tpu.memory_space<vmem>>, vector<1x128xf32>
    %c0_i32 = arith.constant 0 : i32
    %c15_i32 = arith.constant 15 : i32
    %1 = arith.addi %c0_i32, %c15_i32 : i32
    %c1_i32 = arith.constant 1 : i32
    scf.for %arg7 = %c0_i32 to %1 step %c1_i32  : i32 {
      %c1_i32_35 = arith.constant 1 : i32
      %36 = arith.addi %arg7, %c1_i32_35 : i32
      %c0_36 = arith.constant 0 : index
      %37 = arith.index_cast %arg7 : i32 to index
      %c0_37 = arith.constant 0 : index
      %c0_38 = arith.constant 0 : index
      %38 = vector.load %arg2[%c0_36, %37, %c0_37, %c0_38] : memref<1x16x17x128xbf16, #tpu.memory_space<vmem>>, vector<1x1x16x128xbf16>
      %39 = vector.shape_cast %38 : vector<1x1x16x128xbf16> to vector<16x128xbf16>
      %c0_39 = arith.constant 0 : index
      %c0_40 = arith.constant 0 : index
      %c0_41 = arith.constant 0 : index
      %40 = vector.load %arg4[%c0_39, %c0_40, %c0_41] : memref<4x128x128xbf16, #tpu.memory_space<vmem>>, vector<1x128x128xbf16>
      %41 = vector.shape_cast %40 : vector<1x128x128xbf16> to vector<128x128xbf16>
      %cst_42 = arith.constant dense<0.000000e+00> : vector<16x128xf32>
      %42 = tpu.matmul %39, %41, %cst_42 {dimension_numbers = #tpu.dot_dimension_numbers<[1], [0], [0], [1], [0, 0, 1, 1], [], []>} : vector<16x128xbf16>, vector<128x128xbf16>, vector<16x128xf32> -> vector<16x128xf32>
      %c0_43 = arith.constant 0 : index
      %43 = arith.index_cast %arg7 : i32 to index
      %c1_44 = arith.constant 1 : index
      %c0_45 = arith.constant 0 : index
      %44 = vector.load %arg2[%c0_43, %43, %c1_44, %c0_45] : memref<1x16x17x128xbf16, #tpu.memory_space<vmem>>, vector<1x1x16x128xbf16>
      %45 = vector.shape_cast %44 : vector<1x1x16x128xbf16> to vector<16x128xbf16>
      %c1_46 = arith.constant 1 : index
      %c0_47 = arith.constant 0 : index
      %c0_48 = arith.constant 0 : index
      %46 = vector.load %arg4[%c1_46, %c0_47, %c0_48] : memref<4x128x128xbf16, #tpu.memory_space<vmem>>, vector<1x128x128xbf16>
      %47 = vector.shape_cast %46 : vector<1x128x128xbf16> to vector<128x128xbf16>
      %cst_49 = arith.constant dense<0.000000e+00> : vector<16x128xf32>
      %48 = tpu.matmul %45, %47, %cst_49 {dimension_numbers = #tpu.dot_dimension_numbers<[1], [0], [0], [1], [0, 0, 1, 1], [], []>} : vector<16x128xbf16>, vector<128x128xbf16>, vector<16x128xf32> -> vector<16x128xf32>
      %49 = arith.addf %42, %48 : vector<16x128xf32>
      %c0_50 = arith.constant 0 : index
      %50 = arith.index_cast %36 : i32 to index
      %c0_51 = arith.constant 0 : index
      %c0_52 = arith.constant 0 : index
      %51 = vector.load %arg2[%c0_50, %50, %c0_51, %c0_52] : memref<1x16x17x128xbf16, #tpu.memory_space<vmem>>, vector<1x1x16x128xbf16>
      %52 = vector.shape_cast %51 : vector<1x1x16x128xbf16> to vector<16x128xbf16>
      %c2_53 = arith.constant 2 : index
      %c0_54 = arith.constant 0 : index
      %c0_55 = arith.constant 0 : index
      %53 = vector.load %arg4[%c2_53, %c0_54, %c0_55] : memref<4x128x128xbf16, #tpu.memory_space<vmem>>, vector<1x128x128xbf16>
      %54 = vector.shape_cast %53 : vector<1x128x128xbf16> to vector<128x128xbf16>
      %cst_56 = arith.constant dense<0.000000e+00> : vector<16x128xf32>
      %55 = tpu.matmul %52, %54, %cst_56 {dimension_numbers = #tpu.dot_dimension_numbers<[1], [0], [0], [1], [0, 0, 1, 1], [], []>} : vector<16x128xbf16>, vector<128x128xbf16>, vector<16x128xf32> -> vector<16x128xf32>
      %56 = arith.addf %49, %55 : vector<16x128xf32>
      %c0_57 = arith.constant 0 : index
      %57 = arith.index_cast %36 : i32 to index
      %c1_58 = arith.constant 1 : index
      %c0_59 = arith.constant 0 : index
      %58 = vector.load %arg2[%c0_57, %57, %c1_58, %c0_59] : memref<1x16x17x128xbf16, #tpu.memory_space<vmem>>, vector<1x1x16x128xbf16>
      %59 = vector.shape_cast %58 : vector<1x1x16x128xbf16> to vector<16x128xbf16>
      %c3_60 = arith.constant 3 : index
      %c0_61 = arith.constant 0 : index
      %c0_62 = arith.constant 0 : index
      %60 = vector.load %arg4[%c3_60, %c0_61, %c0_62] : memref<4x128x128xbf16, #tpu.memory_space<vmem>>, vector<1x128x128xbf16>
      %61 = vector.shape_cast %60 : vector<1x128x128xbf16> to vector<128x128xbf16>
      %cst_63 = arith.constant dense<0.000000e+00> : vector<16x128xf32>
      %62 = tpu.matmul %59, %61, %cst_63 {dimension_numbers = #tpu.dot_dimension_numbers<[1], [0], [0], [1], [0, 0, 1, 1], [], []>} : vector<16x128xbf16>, vector<128x128xbf16>, vector<16x128xf32> -> vector<16x128xf32>
      %63 = arith.addf %56, %62 : vector<16x128xf32>
      %64 = vector.broadcast %0 : vector<1x128xf32> to vector<16x128xf32>
      %65 = arith.addf %63, %64 : vector<16x128xf32>
      %cst_64 = arith.constant 0.000000e+00 : f32
      %66 = vector.broadcast %cst_64 : f32 to vector<16x128xf32>
      %67 = arith.cmpf oge, %65, %66 : vector<16x128xf32>
      %cst_65 = arith.constant 2.000000e-01 : f32
      %68 = vector.broadcast %cst_65 : f32 to vector<16x128xf32>
      %69 = arith.mulf %68, %65 : vector<16x128xf32>
      %70 = arith.select %67, %65, %69 : vector<16x128xi1>, vector<16x128xf32>
      %71 = arith.truncf %70 : vector<16x128xf32> to vector<16x128xbf16>
      %c0_66 = arith.constant 0 : index
      %72 = arith.index_cast %arg7 : i32 to index
      %c0_67 = arith.constant 0 : index
      %c0_68 = arith.constant 0 : index
      %73 = vector.load %arg6[%c0_66, %72, %c0_67, %c0_68] : memref<1x16x16x128xbf16, #tpu.memory_space<vmem>>, vector<1x1x16x128xbf16>
      %74 = vector.shape_cast %73 : vector<1x1x16x128xbf16> to vector<16x128xbf16>
      %75 = vector.shape_cast %71 : vector<16x128xbf16> to vector<1x1x16x128xbf16>
      tpu.vector_store %arg6[%c0_66, %72, %c0_67, %c0_68], %75 {strides = array<i32>} : memref<1x16x16x128xbf16, #tpu.memory_space<vmem>>, vector<1x1x16x128xbf16>,
    }
    %c15_i32_1 = arith.constant 15 : i32
    %c0_2 = arith.constant 0 : index
    %c15 = arith.constant 15 : index
    %c0_3 = arith.constant 0 : index
    %c0_4 = arith.constant 0 : index
    %2 = vector.load %arg2[%c0_2, %c15, %c0_3, %c0_4] : memref<1x16x17x128xbf16, #tpu.memory_space<vmem>>, vector<1x1x16x128xbf16>
    %3 = vector.shape_cast %2 : vector<1x1x16x128xbf16> to vector<16x128xbf16>
    %c0_5 = arith.constant 0 : index
    %c0_6 = arith.constant 0 : index
    %c0_7 = arith.constant 0 : index
    %4 = vector.load %arg4[%c0_5, %c0_6, %c0_7] : memref<4x128x128xbf16, #tpu.memory_space<vmem>>, vector<1x128x128xbf16>
    %5 = vector.shape_cast %4 : vector<1x128x128xbf16> to vector<128x128xbf16>
    %cst = arith.constant dense<0.000000e+00> : vector<16x128xf32>
    %6 = tpu.matmul %3, %5, %cst {dimension_numbers = #tpu.dot_dimension_numbers<[1], [0], [0], [1], [0, 0, 1, 1], [], []>} : vector<16x128xbf16>, vector<128x128xbf16>, vector<16x128xf32> -> vector<16x128xf32>
    %c0_8 = arith.constant 0 : index
    %c15_9 = arith.constant 15 : index
    %c1 = arith.constant 1 : index
    %c0_10 = arith.constant 0 : index
    %7 = vector.load %arg2[%c0_8, %c15_9, %c1, %c0_10] : memref<1x16x17x128xbf16, #tpu.memory_space<vmem>>, vector<1x1x16x128xbf16>
    %8 = vector.shape_cast %7 : vector<1x1x16x128xbf16> to vector<16x128xbf16>
    %c1_11 = arith.constant 1 : index
    %c0_12 = arith.constant 0 : index
    %c0_13 = arith.constant 0 : index
    %9 = vector.load %arg4[%c1_11, %c0_12, %c0_13] : memref<4x128x128xbf16, #tpu.memory_space<vmem>>, vector<1x128x128xbf16>
    %10 = vector.shape_cast %9 : vector<1x128x128xbf16> to vector<128x128xbf16>
    %cst_14 = arith.constant dense<0.000000e+00> : vector<16x128xf32>
    %11 = tpu.matmul %8, %10, %cst_14 {dimension_numbers = #tpu.dot_dimension_numbers<[1], [0], [0], [1], [0, 0, 1, 1], [], []>} : vector<16x128xbf16>, vector<128x128xbf16>, vector<16x128xf32> -> vector<16x128xf32>
    %12 = arith.addf %6, %11 : vector<16x128xf32>
    %c0_15 = arith.constant 0 : index
    %c0_16 = arith.constant 0 : index
    %c0_17 = arith.constant 0 : index
    %c0_18 = arith.constant 0 : index
    %13 = vector.load %arg3[%c0_15, %c0_16, %c0_17, %c0_18] : memref<1x1x17x128xbf16, #tpu.memory_space<vmem>>, vector<1x1x16x128xbf16>
    %14 = vector.shape_cast %13 : vector<1x1x16x128xbf16> to vector<16x128xbf16>
    %c2 = arith.constant 2 : index
    %c0_19 = arith.constant 0 : index
    %c0_20 = arith.constant 0 : index
    %15 = vector.load %arg4[%c2, %c0_19, %c0_20] : memref<4x128x128xbf16, #tpu.memory_space<vmem>>, vector<1x128x128xbf16>
    %16 = vector.shape_cast %15 : vector<1x128x128xbf16> to vector<128x128xbf16>
    %cst_21 = arith.constant dense<0.000000e+00> : vector<16x128xf32>
    %17 = tpu.matmul %14, %16, %cst_21 {dimension_numbers = #tpu.dot_dimension_numbers<[1], [0], [0], [1], [0, 0, 1, 1], [], []>} : vector<16x128xbf16>, vector<128x128xbf16>, vector<16x128xf32> -> vector<16x128xf32>
    %18 = arith.addf %12, %17 : vector<16x128xf32>
    %c0_22 = arith.constant 0 : index
    %c0_23 = arith.constant 0 : index
    %c1_24 = arith.constant 1 : index
    %c0_25 = arith.constant 0 : index
    %19 = vector.load %arg3[%c0_22, %c0_23, %c1_24, %c0_25] : memref<1x1x17x128xbf16, #tpu.memory_space<vmem>>, vector<1x1x16x128xbf16>
    %20 = vector.shape_cast %19 : vector<1x1x16x128xbf16> to vector<16x128xbf16>
    %c3 = arith.constant 3 : index
    %c0_26 = arith.constant 0 : index
    %c0_27 = arith.constant 0 : index
    %21 = vector.load %arg4[%c3, %c0_26, %c0_27] : memref<4x128x128xbf16, #tpu.memory_space<vmem>>, vector<1x128x128xbf16>
    %22 = vector.shape_cast %21 : vector<1x128x128xbf16> to vector<128x128xbf16>
    %cst_28 = arith.constant dense<0.000000e+00> : vector<16x128xf32>
    %23 = tpu.matmul %20, %22, %cst_28 {dimension_numbers = #tpu.dot_dimension_numbers<[1], [0], [0], [1], [0, 0, 1, 1], [], []>} : vector<16x128xbf16>, vector<128x128xbf16>, vector<16x128xf32> -> vector<16x128xf32>
    %24 = arith.addf %18, %23 : vector<16x128xf32>
    %25 = vector.broadcast %0 : vector<1x128xf32> to vector<16x128xf32>
    %26 = arith.addf %24, %25 : vector<16x128xf32>
    %cst_29 = arith.constant 0.000000e+00 : f32
    %27 = vector.broadcast %cst_29 : f32 to vector<16x128xf32>
    %28 = arith.cmpf oge, %26, %27 : vector<16x128xf32>
    %cst_30 = arith.constant 2.000000e-01 : f32
    %29 = vector.broadcast %cst_30 : f32 to vector<16x128xf32>
    %30 = arith.mulf %29, %26 : vector<16x128xf32>
    %31 = arith.select %28, %26, %30 : vector<16x128xi1>, vector<16x128xf32>
    %32 = arith.truncf %31 : vector<16x128xf32> to vector<16x128xbf16>
    %c0_31 = arith.constant 0 : index
    %c15_32 = arith.constant 15 : index
    %c0_33 = arith.constant 0 : index
    %c0_34 = arith.constant 0 : index
    %33 = vector.load %arg6[%c0_31, %c15_32, %c0_33, %c0_34] : memref<1x16x16x128xbf16, #tpu.memory_space<vmem>>, vector<1x1x16x128xbf16>
    %34 = vector.shape_cast %33 : vector<1x1x16x128xbf16> to vector<16x128xbf16>
    %35 = vector.shape_cast %32 : vector<16x128xbf16> to vector<1x1x16x128xbf16>
    tpu.vector_store %arg6[%c0_31, %c15_32, %c0_33, %c0_34], %35 {strides = array<i32>} : memref<1x16x16x128xbf16, #tpu.memory_space<vmem>>, vector<1x1x16x128xbf16>,
    return
  }
  func.func @transform_0(%arg0: i32, %arg1: i32) -> (i32, i32, i32, i32) {
    %c0_i32 = arith.constant 0 : i32
    %c0_i32_0 = arith.constant 0 : i32
    %c0_i32_1 = arith.constant 0 : i32
    return %arg0, %arg1, %c0_i32, %c0_i32_0 : i32, i32, i32, i32
  }
  func.func @transform_1(%arg0: i32, %arg1: i32) -> (i32, i32, i32, i32) {
    %c1_i32 = arith.constant 1 : i32
    %0 = arith.addi %arg1, %c1_i32 : i32
    %c16_i32 = arith.constant 16 : i32
    %1 = arith.muli %0, %c16_i32 : i32
    %c0_i32 = arith.constant 0 : i32
    %c0_i32_0 = arith.constant 0 : i32
    %c0_i32_1 = arith.constant 0 : i32
    return %arg0, %1, %c0_i32, %c0_i32_0 : i32, i32, i32, i32
  }
  func.func @transform_2(%arg0: i32, %arg1: i32) -> (i32, i32, i32) {
    %c0_i32 = arith.constant 0 : i32
    %c0_i32_0 = arith.constant 0 : i32
    %c0_i32_1 = arith.constant 0 : i32
    %c0_i32_2 = arith.constant 0 : i32
    return %c0_i32, %c0_i32_0, %c0_i32_1 : i32, i32, i32
  }
  func.func @transform_3(%arg0: i32, %arg1: i32) -> (i32, i32) {
    %c0_i32 = arith.constant 0 : i32
    %c0_i32_0 = arith.constant 0 : i32
    %c0_i32_1 = arith.constant 0 : i32
    return %c0_i32, %c0_i32_0 : i32, i32
  }
  func.func @transform_4(%arg0: i32, %arg1: i32) -> (i32, i32, i32, i32) {
    %c0_i32 = arith.constant 0 : i32
    %c0_i32_0 = arith.constant 0 : i32
    %c0_i32_1 = arith.constant 0 : i32
    return %arg0, %arg1, %c0_i32, %c0_i32_0 : i32, i32, i32, i32
  }
}

module attributes {stable_mosaic.version = 11 : i64} {
  func.func @_conv4x4_tap_kernel(%arg0: i32, %arg1: i32, %arg2: memref<1x8x9x128xbf16, #tpu.memory_space<vmem>>, %arg3: memref<1x1x9x128xbf16, #tpu.memory_space<vmem>>, %arg4: memref<4x128x128xbf16, #tpu.memory_space<vmem>>, %arg5: memref<1x128xf32, #tpu.memory_space<vmem>>, %arg6: memref<1x8x8x128xbf16, #tpu.memory_space<vmem>>) attributes {dimension_semantics = [#tpu.dimension_semantics<parallel>, #tpu.dimension_semantics<parallel>], iteration_bounds = array<i64: 2, 1>, scalar_prefetch = 0 : i64, scratch_operands = 0 : i64, tpu.core_type = #tpu.core_type<tc>, window_params = [{transform_indices = @transform_0, window_bounds = array<i64: 1, 8, 9, 128>}, {transform_indices = @transform_1, window_bounds = array<i64: 1, 1, 9, 128>}, {pipeline_mode = #tpu.pipeline_mode<synchronous>, transform_indices = @transform_2, window_bounds = array<i64: 4, 128, 128>}, {pipeline_mode = #tpu.pipeline_mode<synchronous>, transform_indices = @transform_3, window_bounds = array<i64: 1, 128>}, {transform_indices = @transform_4, window_bounds = array<i64: 1, 8, 8, 128>}]} {
    %c0 = arith.constant 0 : index
    %c0_0 = arith.constant 0 : index
    %0 = vector.load %arg5[%c0, %c0_0] : memref<1x128xf32, #tpu.memory_space<vmem>>, vector<1x128xf32>
    %c0_i32 = arith.constant 0 : i32
    %c7_i32 = arith.constant 7 : i32
    %1 = arith.addi %c0_i32, %c7_i32 : i32
    %c1_i32 = arith.constant 1 : i32
    scf.for %arg7 = %c0_i32 to %1 step %c1_i32  : i32 {
      %c1_i32_35 = arith.constant 1 : i32
      %36 = arith.addi %arg7, %c1_i32_35 : i32
      %c0_36 = arith.constant 0 : index
      %37 = arith.index_cast %arg7 : i32 to index
      %c0_37 = arith.constant 0 : index
      %c0_38 = arith.constant 0 : index
      %38 = vector.load %arg2[%c0_36, %37, %c0_37, %c0_38] : memref<1x8x9x128xbf16, #tpu.memory_space<vmem>>, vector<1x1x8x128xbf16>
      %39 = vector.shape_cast %38 : vector<1x1x8x128xbf16> to vector<8x128xbf16>
      %c0_39 = arith.constant 0 : index
      %c0_40 = arith.constant 0 : index
      %c0_41 = arith.constant 0 : index
      %40 = vector.load %arg4[%c0_39, %c0_40, %c0_41] : memref<4x128x128xbf16, #tpu.memory_space<vmem>>, vector<1x128x128xbf16>
      %41 = vector.shape_cast %40 : vector<1x128x128xbf16> to vector<128x128xbf16>
      %cst_42 = arith.constant dense<0.000000e+00> : vector<8x128xf32>
      %42 = tpu.matmul %39, %41, %cst_42 {dimension_numbers = #tpu.dot_dimension_numbers<[1], [0], [0], [1], [0, 0, 1, 1], [], []>} : vector<8x128xbf16>, vector<128x128xbf16>, vector<8x128xf32> -> vector<8x128xf32>
      %c0_43 = arith.constant 0 : index
      %43 = arith.index_cast %arg7 : i32 to index
      %c1_44 = arith.constant 1 : index
      %c0_45 = arith.constant 0 : index
      %44 = vector.load %arg2[%c0_43, %43, %c1_44, %c0_45] : memref<1x8x9x128xbf16, #tpu.memory_space<vmem>>, vector<1x1x8x128xbf16>
      %45 = vector.shape_cast %44 : vector<1x1x8x128xbf16> to vector<8x128xbf16>
      %c1_46 = arith.constant 1 : index
      %c0_47 = arith.constant 0 : index
      %c0_48 = arith.constant 0 : index
      %46 = vector.load %arg4[%c1_46, %c0_47, %c0_48] : memref<4x128x128xbf16, #tpu.memory_space<vmem>>, vector<1x128x128xbf16>
      %47 = vector.shape_cast %46 : vector<1x128x128xbf16> to vector<128x128xbf16>
      %cst_49 = arith.constant dense<0.000000e+00> : vector<8x128xf32>
      %48 = tpu.matmul %45, %47, %cst_49 {dimension_numbers = #tpu.dot_dimension_numbers<[1], [0], [0], [1], [0, 0, 1, 1], [], []>} : vector<8x128xbf16>, vector<128x128xbf16>, vector<8x128xf32> -> vector<8x128xf32>
      %49 = arith.addf %42, %48 : vector<8x128xf32>
      %c0_50 = arith.constant 0 : index
      %50 = arith.index_cast %36 : i32 to index
      %c0_51 = arith.constant 0 : index
      %c0_52 = arith.constant 0 : index
      %51 = vector.load %arg2[%c0_50, %50, %c0_51, %c0_52] : memref<1x8x9x128xbf16, #tpu.memory_space<vmem>>, vector<1x1x8x128xbf16>
      %52 = vector.shape_cast %51 : vector<1x1x8x128xbf16> to vector<8x128xbf16>
      %c2_53 = arith.constant 2 : index
      %c0_54 = arith.constant 0 : index
      %c0_55 = arith.constant 0 : index
      %53 = vector.load %arg4[%c2_53, %c0_54, %c0_55] : memref<4x128x128xbf16, #tpu.memory_space<vmem>>, vector<1x128x128xbf16>
      %54 = vector.shape_cast %53 : vector<1x128x128xbf16> to vector<128x128xbf16>
      %cst_56 = arith.constant dense<0.000000e+00> : vector<8x128xf32>
      %55 = tpu.matmul %52, %54, %cst_56 {dimension_numbers = #tpu.dot_dimension_numbers<[1], [0], [0], [1], [0, 0, 1, 1], [], []>} : vector<8x128xbf16>, vector<128x128xbf16>, vector<8x128xf32> -> vector<8x128xf32>
      %56 = arith.addf %49, %55 : vector<8x128xf32>
      %c0_57 = arith.constant 0 : index
      %57 = arith.index_cast %36 : i32 to index
      %c1_58 = arith.constant 1 : index
      %c0_59 = arith.constant 0 : index
      %58 = vector.load %arg2[%c0_57, %57, %c1_58, %c0_59] : memref<1x8x9x128xbf16, #tpu.memory_space<vmem>>, vector<1x1x8x128xbf16>
      %59 = vector.shape_cast %58 : vector<1x1x8x128xbf16> to vector<8x128xbf16>
      %c3_60 = arith.constant 3 : index
      %c0_61 = arith.constant 0 : index
      %c0_62 = arith.constant 0 : index
      %60 = vector.load %arg4[%c3_60, %c0_61, %c0_62] : memref<4x128x128xbf16, #tpu.memory_space<vmem>>, vector<1x128x128xbf16>
      %61 = vector.shape_cast %60 : vector<1x128x128xbf16> to vector<128x128xbf16>
      %cst_63 = arith.constant dense<0.000000e+00> : vector<8x128xf32>
      %62 = tpu.matmul %59, %61, %cst_63 {dimension_numbers = #tpu.dot_dimension_numbers<[1], [0], [0], [1], [0, 0, 1, 1], [], []>} : vector<8x128xbf16>, vector<128x128xbf16>, vector<8x128xf32> -> vector<8x128xf32>
      %63 = arith.addf %56, %62 : vector<8x128xf32>
      %64 = vector.broadcast %0 : vector<1x128xf32> to vector<8x128xf32>
      %65 = arith.addf %63, %64 : vector<8x128xf32>
      %cst_64 = arith.constant 0.000000e+00 : f32
      %66 = vector.broadcast %cst_64 : f32 to vector<8x128xf32>
      %67 = arith.cmpf oge, %65, %66 : vector<8x128xf32>
      %cst_65 = arith.constant 2.000000e-01 : f32
      %68 = vector.broadcast %cst_65 : f32 to vector<8x128xf32>
      %69 = arith.mulf %68, %65 : vector<8x128xf32>
      %70 = arith.select %67, %65, %69 : vector<8x128xi1>, vector<8x128xf32>
      %71 = arith.truncf %70 : vector<8x128xf32> to vector<8x128xbf16>
      %c0_66 = arith.constant 0 : index
      %72 = arith.index_cast %arg7 : i32 to index
      %c0_67 = arith.constant 0 : index
      %c0_68 = arith.constant 0 : index
      %73 = vector.load %arg6[%c0_66, %72, %c0_67, %c0_68] : memref<1x8x8x128xbf16, #tpu.memory_space<vmem>>, vector<1x1x8x128xbf16>
      %74 = vector.shape_cast %73 : vector<1x1x8x128xbf16> to vector<8x128xbf16>
      %75 = vector.shape_cast %71 : vector<8x128xbf16> to vector<1x1x8x128xbf16>
      tpu.vector_store %arg6[%c0_66, %72, %c0_67, %c0_68], %75 {strides = array<i32>} : memref<1x8x8x128xbf16, #tpu.memory_space<vmem>>, vector<1x1x8x128xbf16>,
    }
    %c7_i32_1 = arith.constant 7 : i32
    %c0_2 = arith.constant 0 : index
    %c7 = arith.constant 7 : index
    %c0_3 = arith.constant 0 : index
    %c0_4 = arith.constant 0 : index
    %2 = vector.load %arg2[%c0_2, %c7, %c0_3, %c0_4] : memref<1x8x9x128xbf16, #tpu.memory_space<vmem>>, vector<1x1x8x128xbf16>
    %3 = vector.shape_cast %2 : vector<1x1x8x128xbf16> to vector<8x128xbf16>
    %c0_5 = arith.constant 0 : index
    %c0_6 = arith.constant 0 : index
    %c0_7 = arith.constant 0 : index
    %4 = vector.load %arg4[%c0_5, %c0_6, %c0_7] : memref<4x128x128xbf16, #tpu.memory_space<vmem>>, vector<1x128x128xbf16>
    %5 = vector.shape_cast %4 : vector<1x128x128xbf16> to vector<128x128xbf16>
    %cst = arith.constant dense<0.000000e+00> : vector<8x128xf32>
    %6 = tpu.matmul %3, %5, %cst {dimension_numbers = #tpu.dot_dimension_numbers<[1], [0], [0], [1], [0, 0, 1, 1], [], []>} : vector<8x128xbf16>, vector<128x128xbf16>, vector<8x128xf32> -> vector<8x128xf32>
    %c0_8 = arith.constant 0 : index
    %c7_9 = arith.constant 7 : index
    %c1 = arith.constant 1 : index
    %c0_10 = arith.constant 0 : index
    %7 = vector.load %arg2[%c0_8, %c7_9, %c1, %c0_10] : memref<1x8x9x128xbf16, #tpu.memory_space<vmem>>, vector<1x1x8x128xbf16>
    %8 = vector.shape_cast %7 : vector<1x1x8x128xbf16> to vector<8x128xbf16>
    %c1_11 = arith.constant 1 : index
    %c0_12 = arith.constant 0 : index
    %c0_13 = arith.constant 0 : index
    %9 = vector.load %arg4[%c1_11, %c0_12, %c0_13] : memref<4x128x128xbf16, #tpu.memory_space<vmem>>, vector<1x128x128xbf16>
    %10 = vector.shape_cast %9 : vector<1x128x128xbf16> to vector<128x128xbf16>
    %cst_14 = arith.constant dense<0.000000e+00> : vector<8x128xf32>
    %11 = tpu.matmul %8, %10, %cst_14 {dimension_numbers = #tpu.dot_dimension_numbers<[1], [0], [0], [1], [0, 0, 1, 1], [], []>} : vector<8x128xbf16>, vector<128x128xbf16>, vector<8x128xf32> -> vector<8x128xf32>
    %12 = arith.addf %6, %11 : vector<8x128xf32>
    %c0_15 = arith.constant 0 : index
    %c0_16 = arith.constant 0 : index
    %c0_17 = arith.constant 0 : index
    %c0_18 = arith.constant 0 : index
    %13 = vector.load %arg3[%c0_15, %c0_16, %c0_17, %c0_18] : memref<1x1x9x128xbf16, #tpu.memory_space<vmem>>, vector<1x1x8x128xbf16>
    %14 = vector.shape_cast %13 : vector<1x1x8x128xbf16> to vector<8x128xbf16>
    %c2 = arith.constant 2 : index
    %c0_19 = arith.constant 0 : index
    %c0_20 = arith.constant 0 : index
    %15 = vector.load %arg4[%c2, %c0_19, %c0_20] : memref<4x128x128xbf16, #tpu.memory_space<vmem>>, vector<1x128x128xbf16>
    %16 = vector.shape_cast %15 : vector<1x128x128xbf16> to vector<128x128xbf16>
    %cst_21 = arith.constant dense<0.000000e+00> : vector<8x128xf32>
    %17 = tpu.matmul %14, %16, %cst_21 {dimension_numbers = #tpu.dot_dimension_numbers<[1], [0], [0], [1], [0, 0, 1, 1], [], []>} : vector<8x128xbf16>, vector<128x128xbf16>, vector<8x128xf32> -> vector<8x128xf32>
    %18 = arith.addf %12, %17 : vector<8x128xf32>
    %c0_22 = arith.constant 0 : index
    %c0_23 = arith.constant 0 : index
    %c1_24 = arith.constant 1 : index
    %c0_25 = arith.constant 0 : index
    %19 = vector.load %arg3[%c0_22, %c0_23, %c1_24, %c0_25] : memref<1x1x9x128xbf16, #tpu.memory_space<vmem>>, vector<1x1x8x128xbf16>
    %20 = vector.shape_cast %19 : vector<1x1x8x128xbf16> to vector<8x128xbf16>
    %c3 = arith.constant 3 : index
    %c0_26 = arith.constant 0 : index
    %c0_27 = arith.constant 0 : index
    %21 = vector.load %arg4[%c3, %c0_26, %c0_27] : memref<4x128x128xbf16, #tpu.memory_space<vmem>>, vector<1x128x128xbf16>
    %22 = vector.shape_cast %21 : vector<1x128x128xbf16> to vector<128x128xbf16>
    %cst_28 = arith.constant dense<0.000000e+00> : vector<8x128xf32>
    %23 = tpu.matmul %20, %22, %cst_28 {dimension_numbers = #tpu.dot_dimension_numbers<[1], [0], [0], [1], [0, 0, 1, 1], [], []>} : vector<8x128xbf16>, vector<128x128xbf16>, vector<8x128xf32> -> vector<8x128xf32>
    %24 = arith.addf %18, %23 : vector<8x128xf32>
    %25 = vector.broadcast %0 : vector<1x128xf32> to vector<8x128xf32>
    %26 = arith.addf %24, %25 : vector<8x128xf32>
    %cst_29 = arith.constant 0.000000e+00 : f32
    %27 = vector.broadcast %cst_29 : f32 to vector<8x128xf32>
    %28 = arith.cmpf oge, %26, %27 : vector<8x128xf32>
    %cst_30 = arith.constant 2.000000e-01 : f32
    %29 = vector.broadcast %cst_30 : f32 to vector<8x128xf32>
    %30 = arith.mulf %29, %26 : vector<8x128xf32>
    %31 = arith.select %28, %26, %30 : vector<8x128xi1>, vector<8x128xf32>
    %32 = arith.truncf %31 : vector<8x128xf32> to vector<8x128xbf16>
    %c0_31 = arith.constant 0 : index
    %c7_32 = arith.constant 7 : index
    %c0_33 = arith.constant 0 : index
    %c0_34 = arith.constant 0 : index
    %33 = vector.load %arg6[%c0_31, %c7_32, %c0_33, %c0_34] : memref<1x8x8x128xbf16, #tpu.memory_space<vmem>>, vector<1x1x8x128xbf16>
    %34 = vector.shape_cast %33 : vector<1x1x8x128xbf16> to vector<8x128xbf16>
    %35 = vector.shape_cast %32 : vector<8x128xbf16> to vector<1x1x8x128xbf16>
    tpu.vector_store %arg6[%c0_31, %c7_32, %c0_33, %c0_34], %35 {strides = array<i32>} : memref<1x8x8x128xbf16, #tpu.memory_space<vmem>>, vector<1x1x8x128xbf16>,
    return
  }
  func.func @transform_0(%arg0: i32, %arg1: i32) -> (i32, i32, i32, i32) {
    %c0_i32 = arith.constant 0 : i32
    %c0_i32_0 = arith.constant 0 : i32
    %c0_i32_1 = arith.constant 0 : i32
    return %arg0, %arg1, %c0_i32, %c0_i32_0 : i32, i32, i32, i32
  }
  func.func @transform_1(%arg0: i32, %arg1: i32) -> (i32, i32, i32, i32) {
    %c1_i32 = arith.constant 1 : i32
    %0 = arith.addi %arg1, %c1_i32 : i32
    %c8_i32 = arith.constant 8 : i32
    %1 = arith.muli %0, %c8_i32 : i32
    %c0_i32 = arith.constant 0 : i32
    %c0_i32_0 = arith.constant 0 : i32
    %c0_i32_1 = arith.constant 0 : i32
    return %arg0, %1, %c0_i32, %c0_i32_0 : i32, i32, i32, i32
  }
  func.func @transform_2(%arg0: i32, %arg1: i32) -> (i32, i32, i32) {
    %c0_i32 = arith.constant 0 : i32
    %c0_i32_0 = arith.constant 0 : i32
    %c0_i32_1 = arith.constant 0 : i32
    %c0_i32_2 = arith.constant 0 : i32
    return %c0_i32, %c0_i32_0, %c0_i32_1 : i32, i32, i32
  }
  func.func @transform_3(%arg0: i32, %arg1: i32) -> (i32, i32) {
    %c0_i32 = arith.constant 0 : i32
    %c0_i32_0 = arith.constant 0 : i32
    %c0_i32_1 = arith.constant 0 : i32
    return %c0_i32, %c0_i32_0 : i32, i32
  }
  func.func @transform_4(%arg0: i32, %arg1: i32) -> (i32, i32, i32, i32) {
    %c0_i32 = arith.constant 0 : i32
    %c0_i32_0 = arith.constant 0 : i32
    %c0_i32_1 = arith.constant 0 : i32
    return %arg0, %arg1, %c0_i32, %c0_i32_0 : i32, i32, i32, i32
  }
}

module attributes {stable_mosaic.version = 11 : i64} {
  func.func @_conv4x4_tap_kernel(%arg0: i32, %arg1: i32, %arg2: memref<1x4x5x128xbf16, #tpu.memory_space<vmem>>, %arg3: memref<1x1x5x128xbf16, #tpu.memory_space<vmem>>, %arg4: memref<4x128x128xbf16, #tpu.memory_space<vmem>>, %arg5: memref<1x128xf32, #tpu.memory_space<vmem>>, %arg6: memref<1x4x4x128xbf16, #tpu.memory_space<vmem>>) attributes {dimension_semantics = [#tpu.dimension_semantics<parallel>, #tpu.dimension_semantics<parallel>], iteration_bounds = array<i64: 2, 1>, scalar_prefetch = 0 : i64, scratch_operands = 0 : i64, tpu.core_type = #tpu.core_type<tc>, window_params = [{transform_indices = @transform_0, window_bounds = array<i64: 1, 4, 5, 128>}, {transform_indices = @transform_1, window_bounds = array<i64: 1, 1, 5, 128>}, {pipeline_mode = #tpu.pipeline_mode<synchronous>, transform_indices = @transform_2, window_bounds = array<i64: 4, 128, 128>}, {pipeline_mode = #tpu.pipeline_mode<synchronous>, transform_indices = @transform_3, window_bounds = array<i64: 1, 128>}, {transform_indices = @transform_4, window_bounds = array<i64: 1, 4, 4, 128>}]} {
    %c0 = arith.constant 0 : index
    %c0_0 = arith.constant 0 : index
    %0 = vector.load %arg5[%c0, %c0_0] : memref<1x128xf32, #tpu.memory_space<vmem>>, vector<1x128xf32>
    %c0_i32 = arith.constant 0 : i32
    %c3_i32 = arith.constant 3 : i32
    %1 = arith.addi %c0_i32, %c3_i32 : i32
    %c1_i32 = arith.constant 1 : i32
    scf.for %arg7 = %c0_i32 to %1 step %c1_i32  : i32 {
      %c1_i32_36 = arith.constant 1 : i32
      %36 = arith.addi %arg7, %c1_i32_36 : i32
      %c0_37 = arith.constant 0 : index
      %37 = arith.index_cast %arg7 : i32 to index
      %c0_38 = arith.constant 0 : index
      %c0_39 = arith.constant 0 : index
      %38 = vector.load %arg2[%c0_37, %37, %c0_38, %c0_39] : memref<1x4x5x128xbf16, #tpu.memory_space<vmem>>, vector<1x1x4x128xbf16>
      %39 = vector.shape_cast %38 : vector<1x1x4x128xbf16> to vector<4x128xbf16>
      %c0_40 = arith.constant 0 : index
      %c0_41 = arith.constant 0 : index
      %c0_42 = arith.constant 0 : index
      %40 = vector.load %arg4[%c0_40, %c0_41, %c0_42] : memref<4x128x128xbf16, #tpu.memory_space<vmem>>, vector<1x128x128xbf16>
      %41 = vector.shape_cast %40 : vector<1x128x128xbf16> to vector<128x128xbf16>
      %cst_43 = arith.constant dense<0.000000e+00> : vector<4x128xf32>
      %42 = tpu.matmul %39, %41, %cst_43 {dimension_numbers = #tpu.dot_dimension_numbers<[1], [0], [0], [1], [0, 0, 1, 1], [], []>} : vector<4x128xbf16>, vector<128x128xbf16>, vector<4x128xf32> -> vector<4x128xf32>
      %c0_44 = arith.constant 0 : index
      %43 = arith.index_cast %arg7 : i32 to index
      %c1_45 = arith.constant 1 : index
      %c0_46 = arith.constant 0 : index
      %44 = vector.load %arg2[%c0_44, %43, %c1_45, %c0_46] : memref<1x4x5x128xbf16, #tpu.memory_space<vmem>>, vector<1x1x4x128xbf16>
      %45 = vector.shape_cast %44 : vector<1x1x4x128xbf16> to vector<4x128xbf16>
      %c1_47 = arith.constant 1 : index
      %c0_48 = arith.constant 0 : index
      %c0_49 = arith.constant 0 : index
      %46 = vector.load %arg4[%c1_47, %c0_48, %c0_49] : memref<4x128x128xbf16, #tpu.memory_space<vmem>>, vector<1x128x128xbf16>
      %47 = vector.shape_cast %46 : vector<1x128x128xbf16> to vector<128x128xbf16>
      %cst_50 = arith.constant dense<0.000000e+00> : vector<4x128xf32>
      %48 = tpu.matmul %45, %47, %cst_50 {dimension_numbers = #tpu.dot_dimension_numbers<[1], [0], [0], [1], [0, 0, 1, 1], [], []>} : vector<4x128xbf16>, vector<128x128xbf16>, vector<4x128xf32> -> vector<4x128xf32>
      %49 = arith.addf %42, %48 : vector<4x128xf32>
      %c0_51 = arith.constant 0 : index
      %50 = arith.index_cast %36 : i32 to index
      %c0_52 = arith.constant 0 : index
      %c0_53 = arith.constant 0 : index
      %51 = vector.load %arg2[%c0_51, %50, %c0_52, %c0_53] : memref<1x4x5x128xbf16, #tpu.memory_space<vmem>>, vector<1x1x4x128xbf16>
      %52 = vector.shape_cast %51 : vector<1x1x4x128xbf16> to vector<4x128xbf16>
      %c2_54 = arith.constant 2 : index
      %c0_55 = arith.constant 0 : index
      %c0_56 = arith.constant 0 : index
      %53 = vector.load %arg4[%c2_54, %c0_55, %c0_56] : memref<4x128x128xbf16, #tpu.memory_space<vmem>>, vector<1x128x128xbf16>
      %54 = vector.shape_cast %53 : vector<1x128x128xbf16> to vector<128x128xbf16>
      %cst_57 = arith.constant dense<0.000000e+00> : vector<4x128xf32>
      %55 = tpu.matmul %52, %54, %cst_57 {dimension_numbers = #tpu.dot_dimension_numbers<[1], [0], [0], [1], [0, 0, 1, 1], [], []>} : vector<4x128xbf16>, vector<128x128xbf16>, vector<4x128xf32> -> vector<4x128xf32>
      %56 = arith.addf %49, %55 : vector<4x128xf32>
      %c0_58 = arith.constant 0 : index
      %57 = arith.index_cast %36 : i32 to index
      %c1_59 = arith.constant 1 : index
      %c0_60 = arith.constant 0 : index
      %58 = vector.load %arg2[%c0_58, %57, %c1_59, %c0_60] : memref<1x4x5x128xbf16, #tpu.memory_space<vmem>>, vector<1x1x4x128xbf16>
      %59 = vector.shape_cast %58 : vector<1x1x4x128xbf16> to vector<4x128xbf16>
      %c3_61 = arith.constant 3 : index
      %c0_62 = arith.constant 0 : index
      %c0_63 = arith.constant 0 : index
      %60 = vector.load %arg4[%c3_61, %c0_62, %c0_63] : memref<4x128x128xbf16, #tpu.memory_space<vmem>>, vector<1x128x128xbf16>
      %61 = vector.shape_cast %60 : vector<1x128x128xbf16> to vector<128x128xbf16>
      %cst_64 = arith.constant dense<0.000000e+00> : vector<4x128xf32>
      %62 = tpu.matmul %59, %61, %cst_64 {dimension_numbers = #tpu.dot_dimension_numbers<[1], [0], [0], [1], [0, 0, 1, 1], [], []>} : vector<4x128xbf16>, vector<128x128xbf16>, vector<4x128xf32> -> vector<4x128xf32>
      %63 = arith.addf %56, %62 : vector<4x128xf32>
      %64 = vector.broadcast %0 : vector<1x128xf32> to vector<4x128xf32>
      %65 = arith.addf %63, %64 : vector<4x128xf32>
      %cst_65 = arith.constant 0.000000e+00 : f32
      %66 = vector.broadcast %cst_65 : f32 to vector<4x128xf32>
      %67 = arith.cmpf oge, %65, %66 : vector<4x128xf32>
      %cst_66 = arith.constant 2.000000e-01 : f32
      %68 = vector.broadcast %cst_66 : f32 to vector<4x128xf32>
      %69 = arith.mulf %68, %65 : vector<4x128xf32>
      %70 = arith.select %67, %65, %69 : vector<4x128xi1>, vector<4x128xf32>
      %71 = arith.truncf %70 : vector<4x128xf32> to vector<4x128xbf16>
      %c0_67 = arith.constant 0 : index
      %72 = arith.index_cast %arg7 : i32 to index
      %c0_68 = arith.constant 0 : index
      %c0_69 = arith.constant 0 : index
      %73 = vector.load %arg6[%c0_67, %72, %c0_68, %c0_69] : memref<1x4x4x128xbf16, #tpu.memory_space<vmem>>, vector<1x1x4x128xbf16>
      %74 = vector.shape_cast %73 : vector<1x1x4x128xbf16> to vector<4x128xbf16>
      %75 = vector.shape_cast %71 : vector<4x128xbf16> to vector<1x1x4x128xbf16>
      tpu.vector_store %arg6[%c0_67, %72, %c0_68, %c0_69], %75 {strides = array<i32>} : memref<1x4x4x128xbf16, #tpu.memory_space<vmem>>, vector<1x1x4x128xbf16>,
    }
    %c3_i32_1 = arith.constant 3 : i32
    %c0_2 = arith.constant 0 : index
    %c3 = arith.constant 3 : index
    %c0_3 = arith.constant 0 : index
    %c0_4 = arith.constant 0 : index
    %2 = vector.load %arg2[%c0_2, %c3, %c0_3, %c0_4] : memref<1x4x5x128xbf16, #tpu.memory_space<vmem>>, vector<1x1x4x128xbf16>
    %3 = vector.shape_cast %2 : vector<1x1x4x128xbf16> to vector<4x128xbf16>
    %c0_5 = arith.constant 0 : index
    %c0_6 = arith.constant 0 : index
    %c0_7 = arith.constant 0 : index
    %4 = vector.load %arg4[%c0_5, %c0_6, %c0_7] : memref<4x128x128xbf16, #tpu.memory_space<vmem>>, vector<1x128x128xbf16>
    %5 = vector.shape_cast %4 : vector<1x128x128xbf16> to vector<128x128xbf16>
    %cst = arith.constant dense<0.000000e+00> : vector<4x128xf32>
    %6 = tpu.matmul %3, %5, %cst {dimension_numbers = #tpu.dot_dimension_numbers<[1], [0], [0], [1], [0, 0, 1, 1], [], []>} : vector<4x128xbf16>, vector<128x128xbf16>, vector<4x128xf32> -> vector<4x128xf32>
    %c0_8 = arith.constant 0 : index
    %c3_9 = arith.constant 3 : index
    %c1 = arith.constant 1 : index
    %c0_10 = arith.constant 0 : index
    %7 = vector.load %arg2[%c0_8, %c3_9, %c1, %c0_10] : memref<1x4x5x128xbf16, #tpu.memory_space<vmem>>, vector<1x1x4x128xbf16>
    %8 = vector.shape_cast %7 : vector<1x1x4x128xbf16> to vector<4x128xbf16>
    %c1_11 = arith.constant 1 : index
    %c0_12 = arith.constant 0 : index
    %c0_13 = arith.constant 0 : index
    %9 = vector.load %arg4[%c1_11, %c0_12, %c0_13] : memref<4x128x128xbf16, #tpu.memory_space<vmem>>, vector<1x128x128xbf16>
    %10 = vector.shape_cast %9 : vector<1x128x128xbf16> to vector<128x128xbf16>
    %cst_14 = arith.constant dense<0.000000e+00> : vector<4x128xf32>
    %11 = tpu.matmul %8, %10, %cst_14 {dimension_numbers = #tpu.dot_dimension_numbers<[1], [0], [0], [1], [0, 0, 1, 1], [], []>} : vector<4x128xbf16>, vector<128x128xbf16>, vector<4x128xf32> -> vector<4x128xf32>
    %12 = arith.addf %6, %11 : vector<4x128xf32>
    %c0_15 = arith.constant 0 : index
    %c0_16 = arith.constant 0 : index
    %c0_17 = arith.constant 0 : index
    %c0_18 = arith.constant 0 : index
    %13 = vector.load %arg3[%c0_15, %c0_16, %c0_17, %c0_18] : memref<1x1x5x128xbf16, #tpu.memory_space<vmem>>, vector<1x1x4x128xbf16>
    %14 = vector.shape_cast %13 : vector<1x1x4x128xbf16> to vector<4x128xbf16>
    %c2 = arith.constant 2 : index
    %c0_19 = arith.constant 0 : index
    %c0_20 = arith.constant 0 : index
    %15 = vector.load %arg4[%c2, %c0_19, %c0_20] : memref<4x128x128xbf16, #tpu.memory_space<vmem>>, vector<1x128x128xbf16>
    %16 = vector.shape_cast %15 : vector<1x128x128xbf16> to vector<128x128xbf16>
    %cst_21 = arith.constant dense<0.000000e+00> : vector<4x128xf32>
    %17 = tpu.matmul %14, %16, %cst_21 {dimension_numbers = #tpu.dot_dimension_numbers<[1], [0], [0], [1], [0, 0, 1, 1], [], []>} : vector<4x128xbf16>, vector<128x128xbf16>, vector<4x128xf32> -> vector<4x128xf32>
    %18 = arith.addf %12, %17 : vector<4x128xf32>
    %c0_22 = arith.constant 0 : index
    %c0_23 = arith.constant 0 : index
    %c1_24 = arith.constant 1 : index
    %c0_25 = arith.constant 0 : index
    %19 = vector.load %arg3[%c0_22, %c0_23, %c1_24, %c0_25] : memref<1x1x5x128xbf16, #tpu.memory_space<vmem>>, vector<1x1x4x128xbf16>
    %20 = vector.shape_cast %19 : vector<1x1x4x128xbf16> to vector<4x128xbf16>
    %c3_26 = arith.constant 3 : index
    %c0_27 = arith.constant 0 : index
    %c0_28 = arith.constant 0 : index
    %21 = vector.load %arg4[%c3_26, %c0_27, %c0_28] : memref<4x128x128xbf16, #tpu.memory_space<vmem>>, vector<1x128x128xbf16>
    %22 = vector.shape_cast %21 : vector<1x128x128xbf16> to vector<128x128xbf16>
    %cst_29 = arith.constant dense<0.000000e+00> : vector<4x128xf32>
    %23 = tpu.matmul %20, %22, %cst_29 {dimension_numbers = #tpu.dot_dimension_numbers<[1], [0], [0], [1], [0, 0, 1, 1], [], []>} : vector<4x128xbf16>, vector<128x128xbf16>, vector<4x128xf32> -> vector<4x128xf32>
    %24 = arith.addf %18, %23 : vector<4x128xf32>
    %25 = vector.broadcast %0 : vector<1x128xf32> to vector<4x128xf32>
    %26 = arith.addf %24, %25 : vector<4x128xf32>
    %cst_30 = arith.constant 0.000000e+00 : f32
    %27 = vector.broadcast %cst_30 : f32 to vector<4x128xf32>
    %28 = arith.cmpf oge, %26, %27 : vector<4x128xf32>
    %cst_31 = arith.constant 2.000000e-01 : f32
    %29 = vector.broadcast %cst_31 : f32 to vector<4x128xf32>
    %30 = arith.mulf %29, %26 : vector<4x128xf32>
    %31 = arith.select %28, %26, %30 : vector<4x128xi1>, vector<4x128xf32>
    %32 = arith.truncf %31 : vector<4x128xf32> to vector<4x128xbf16>
    %c0_32 = arith.constant 0 : index
    %c3_33 = arith.constant 3 : index
    %c0_34 = arith.constant 0 : index
    %c0_35 = arith.constant 0 : index
    %33 = vector.load %arg6[%c0_32, %c3_33, %c0_34, %c0_35] : memref<1x4x4x128xbf16, #tpu.memory_space<vmem>>, vector<1x1x4x128xbf16>
    %34 = vector.shape_cast %33 : vector<1x1x4x128xbf16> to vector<4x128xbf16>
    %35 = vector.shape_cast %32 : vector<4x128xbf16> to vector<1x1x4x128xbf16>
    tpu.vector_store %arg6[%c0_32, %c3_33, %c0_34, %c0_35], %35 {strides = array<i32>} : memref<1x4x4x128xbf16, #tpu.memory_space<vmem>>, vector<1x1x4x128xbf16>,
    return
  }
  func.func @transform_0(%arg0: i32, %arg1: i32) -> (i32, i32, i32, i32) {
    %c0_i32 = arith.constant 0 : i32
    %c0_i32_0 = arith.constant 0 : i32
    %c0_i32_1 = arith.constant 0 : i32
    return %arg0, %arg1, %c0_i32, %c0_i32_0 : i32, i32, i32, i32
  }
  func.func @transform_1(%arg0: i32, %arg1: i32) -> (i32, i32, i32, i32) {
    %c1_i32 = arith.constant 1 : i32
    %0 = arith.addi %arg1, %c1_i32 : i32
    %c4_i32 = arith.constant 4 : i32
    %1 = arith.muli %0, %c4_i32 : i32
    %c0_i32 = arith.constant 0 : i32
    %c0_i32_0 = arith.constant 0 : i32
    %c0_i32_1 = arith.constant 0 : i32
    return %arg0, %1, %c0_i32, %c0_i32_0 : i32, i32, i32, i32
  }
  func.func @transform_2(%arg0: i32, %arg1: i32) -> (i32, i32, i32) {
    %c0_i32 = arith.constant 0 : i32
    %c0_i32_0 = arith.constant 0 : i32
    %c0_i32_1 = arith.constant 0 : i32
    %c0_i32_2 = arith.constant 0 : i32
    return %c0_i32, %c0_i32_0, %c0_i32_1 : i32, i32, i32
  }
  func.func @transform_3(%arg0: i32, %arg1: i32) -> (i32, i32) {
    %c0_i32 = arith.constant 0 : i32
    %c0_i32_0 = arith.constant 0 : i32
    %c0_i32_1 = arith.constant 0 : i32
    return %c0_i32, %c0_i32_0 : i32, i32
  }
  func.func @transform_4(%arg0: i32, %arg1: i32) -> (i32, i32, i32, i32) {
    %c0_i32 = arith.constant 0 : i32
    %c0_i32_0 = arith.constant 0 : i32
    %c0_i32_1 = arith.constant 0 : i32
    return %arg0, %arg1, %c0_i32, %c0_i32_0 : i32, i32, i32, i32
  }
}

module attributes {stable_mosaic.version = 11 : i64} {
  func.func @_conv4x4_tap_kernel(%arg0: i32, %arg1: i32, %arg2: memref<1x2x3x256xbf16, #tpu.memory_space<vmem>>, %arg3: memref<1x1x3x256xbf16, #tpu.memory_space<vmem>>, %arg4: memref<4x256x128xbf16, #tpu.memory_space<vmem>>, %arg5: memref<1x128xf32, #tpu.memory_space<vmem>>, %arg6: memref<1x2x2x128xbf16, #tpu.memory_space<vmem>>) attributes {dimension_semantics = [#tpu.dimension_semantics<parallel>, #tpu.dimension_semantics<parallel>], iteration_bounds = array<i64: 2, 1>, scalar_prefetch = 0 : i64, scratch_operands = 0 : i64, tpu.core_type = #tpu.core_type<tc>, window_params = [{transform_indices = @transform_0, window_bounds = array<i64: 1, 2, 3, 256>}, {transform_indices = @transform_1, window_bounds = array<i64: 1, 1, 3, 256>}, {pipeline_mode = #tpu.pipeline_mode<synchronous>, transform_indices = @transform_2, window_bounds = array<i64: 4, 256, 128>}, {pipeline_mode = #tpu.pipeline_mode<synchronous>, transform_indices = @transform_3, window_bounds = array<i64: 1, 128>}, {transform_indices = @transform_4, window_bounds = array<i64: 1, 2, 2, 128>}]} {
    %c0 = arith.constant 0 : index
    %c0_0 = arith.constant 0 : index
    %0 = vector.load %arg5[%c0, %c0_0] : memref<1x128xf32, #tpu.memory_space<vmem>>, vector<1x128xf32>
    %c0_i32 = arith.constant 0 : i32
    %c1_i32 = arith.constant 1 : i32
    %1 = arith.addi %c0_i32, %c1_i32 : i32
    %c0_1 = arith.constant 0 : index
    %2 = arith.index_cast %c0_i32 : i32 to index
    %c0_2 = arith.constant 0 : index
    %c0_3 = arith.constant 0 : index
    %3 = vector.load %arg2[%c0_1, %2, %c0_2, %c0_3] : memref<1x2x3x256xbf16, #tpu.memory_space<vmem>>, vector<1x1x2x256xbf16>
    %4 = vector.shape_cast %3 : vector<1x1x2x256xbf16> to vector<2x256xbf16>
    %c0_4 = arith.constant 0 : index
    %c0_5 = arith.constant 0 : index
    %c0_6 = arith.constant 0 : index
    %5 = vector.load %arg4[%c0_4, %c0_5, %c0_6] : memref<4x256x128xbf16, #tpu.memory_space<vmem>>, vector<1x256x128xbf16>
    %6 = vector.shape_cast %5 : vector<1x256x128xbf16> to vector<256x128xbf16>
    %cst = arith.constant dense<0.000000e+00> : vector<2x128xf32>
    %7 = tpu.matmul %4, %6, %cst {dimension_numbers = #tpu.dot_dimension_numbers<[1], [0], [0], [1], [0, 0, 1, 1], [], []>} : vector<2x256xbf16>, vector<256x128xbf16>, vector<2x128xf32> -> vector<2x128xf32>
    %c0_7 = arith.constant 0 : index
    %8 = arith.index_cast %c0_i32 : i32 to index
    %c1 = arith.constant 1 : index
    %c0_8 = arith.constant 0 : index
    %9 = vector.load %arg2[%c0_7, %8, %c1, %c0_8] : memref<1x2x3x256xbf16, #tpu.memory_space<vmem>>, vector<1x1x2x256xbf16>
    %10 = vector.shape_cast %9 : vector<1x1x2x256xbf16> to vector<2x256xbf16>
    %c1_9 = arith.constant 1 : index
    %c0_10 = arith.constant 0 : index
    %c0_11 = arith.constant 0 : index
    %11 = vector.load %arg4[%c1_9, %c0_10, %c0_11] : memref<4x256x128xbf16, #tpu.memory_space<vmem>>, vector<1x256x128xbf16>
    %12 = vector.shape_cast %11 : vector<1x256x128xbf16> to vector<256x128xbf16>
    %cst_12 = arith.constant dense<0.000000e+00> : vector<2x128xf32>
    %13 = tpu.matmul %10, %12, %cst_12 {dimension_numbers = #tpu.dot_dimension_numbers<[1], [0], [0], [1], [0, 0, 1, 1], [], []>} : vector<2x256xbf16>, vector<256x128xbf16>, vector<2x128xf32> -> vector<2x128xf32>
    %14 = arith.addf %7, %13 : vector<2x128xf32>
    %c0_13 = arith.constant 0 : index
    %15 = arith.index_cast %1 : i32 to index
    %c0_14 = arith.constant 0 : index
    %c0_15 = arith.constant 0 : index
    %16 = vector.load %arg2[%c0_13, %15, %c0_14, %c0_15] : memref<1x2x3x256xbf16, #tpu.memory_space<vmem>>, vector<1x1x2x256xbf16>
    %17 = vector.shape_cast %16 : vector<1x1x2x256xbf16> to vector<2x256xbf16>
    %c2 = arith.constant 2 : index
    %c0_16 = arith.constant 0 : index
    %c0_17 = arith.constant 0 : index
    %18 = vector.load %arg4[%c2, %c0_16, %c0_17] : memref<4x256x128xbf16, #tpu.memory_space<vmem>>, vector<1x256x128xbf16>
    %19 = vector.shape_cast %18 : vector<1x256x128xbf16> to vector<256x128xbf16>
    %cst_18 = arith.constant dense<0.000000e+00> : vector<2x128xf32>
    %20 = tpu.matmul %17, %19, %cst_18 {dimension_numbers = #tpu.dot_dimension_numbers<[1], [0], [0], [1], [0, 0, 1, 1], [], []>} : vector<2x256xbf16>, vector<256x128xbf16>, vector<2x128xf32> -> vector<2x128xf32>
    %21 = arith.addf %14, %20 : vector<2x128xf32>
    %c0_19 = arith.constant 0 : index
    %22 = arith.index_cast %1 : i32 to index
    %c1_20 = arith.constant 1 : index
    %c0_21 = arith.constant 0 : index
    %23 = vector.load %arg2[%c0_19, %22, %c1_20, %c0_21] : memref<1x2x3x256xbf16, #tpu.memory_space<vmem>>, vector<1x1x2x256xbf16>
    %24 = vector.shape_cast %23 : vector<1x1x2x256xbf16> to vector<2x256xbf16>
    %c3 = arith.constant 3 : index
    %c0_22 = arith.constant 0 : index
    %c0_23 = arith.constant 0 : index
    %25 = vector.load %arg4[%c3, %c0_22, %c0_23] : memref<4x256x128xbf16, #tpu.memory_space<vmem>>, vector<1x256x128xbf16>
    %26 = vector.shape_cast %25 : vector<1x256x128xbf16> to vector<256x128xbf16>
    %cst_24 = arith.constant dense<0.000000e+00> : vector<2x128xf32>
    %27 = tpu.matmul %24, %26, %cst_24 {dimension_numbers = #tpu.dot_dimension_numbers<[1], [0], [0], [1], [0, 0, 1, 1], [], []>} : vector<2x256xbf16>, vector<256x128xbf16>, vector<2x128xf32> -> vector<2x128xf32>
    %28 = arith.addf %21, %27 : vector<2x128xf32>
    %29 = vector.broadcast %0 : vector<1x128xf32> to vector<2x128xf32>
    %30 = arith.addf %28, %29 : vector<2x128xf32>
    %cst_25 = arith.constant 0.000000e+00 : f32
    %31 = vector.broadcast %cst_25 : f32 to vector<2x128xf32>
    %32 = arith.cmpf oge, %30, %31 : vector<2x128xf32>
    %cst_26 = arith.constant 2.000000e-01 : f32
    %33 = vector.broadcast %cst_26 : f32 to vector<2x128xf32>
    %34 = arith.mulf %33, %30 : vector<2x128xf32>
    %35 = arith.select %32, %30, %34 : vector<2x128xi1>, vector<2x128xf32>
    %36 = arith.truncf %35 : vector<2x128xf32> to vector<2x128xbf16>
    %c0_27 = arith.constant 0 : index
    %37 = arith.index_cast %c0_i32 : i32 to index
    %c0_28 = arith.constant 0 : index
    %c0_29 = arith.constant 0 : index
    %38 = vector.load %arg6[%c0_27, %37, %c0_28, %c0_29] : memref<1x2x2x128xbf16, #tpu.memory_space<vmem>>, vector<1x1x2x128xbf16>
    %39 = vector.shape_cast %38 : vector<1x1x2x128xbf16> to vector<2x128xbf16>
    %40 = vector.shape_cast %36 : vector<2x128xbf16> to vector<1x1x2x128xbf16>
    tpu.vector_store %arg6[%c0_27, %37, %c0_28, %c0_29], %40 {strides = array<i32>} : memref<1x2x2x128xbf16, #tpu.memory_space<vmem>>, vector<1x1x2x128xbf16>,
    %c1_i32_30 = arith.constant 1 : i32
    %c0_31 = arith.constant 0 : index
    %c1_32 = arith.constant 1 : index
    %c0_33 = arith.constant 0 : index
    %c0_34 = arith.constant 0 : index
    %41 = vector.load %arg2[%c0_31, %c1_32, %c0_33, %c0_34] : memref<1x2x3x256xbf16, #tpu.memory_space<vmem>>, vector<1x1x2x256xbf16>
    %42 = vector.shape_cast %41 : vector<1x1x2x256xbf16> to vector<2x256xbf16>
    %c0_35 = arith.constant 0 : index
    %c0_36 = arith.constant 0 : index
    %c0_37 = arith.constant 0 : index
    %43 = vector.load %arg4[%c0_35, %c0_36, %c0_37] : memref<4x256x128xbf16, #tpu.memory_space<vmem>>, vector<1x256x128xbf16>
    %44 = vector.shape_cast %43 : vector<1x256x128xbf16> to vector<256x128xbf16>
    %cst_38 = arith.constant dense<0.000000e+00> : vector<2x128xf32>
    %45 = tpu.matmul %42, %44, %cst_38 {dimension_numbers = #tpu.dot_dimension_numbers<[1], [0], [0], [1], [0, 0, 1, 1], [], []>} : vector<2x256xbf16>, vector<256x128xbf16>, vector<2x128xf32> -> vector<2x128xf32>
    %c0_39 = arith.constant 0 : index
    %c1_40 = arith.constant 1 : index
    %c1_41 = arith.constant 1 : index
    %c0_42 = arith.constant 0 : index
    %46 = vector.load %arg2[%c0_39, %c1_40, %c1_41, %c0_42] : memref<1x2x3x256xbf16, #tpu.memory_space<vmem>>, vector<1x1x2x256xbf16>
    %47 = vector.shape_cast %46 : vector<1x1x2x256xbf16> to vector<2x256xbf16>
    %c1_43 = arith.constant 1 : index
    %c0_44 = arith.constant 0 : index
    %c0_45 = arith.constant 0 : index
    %48 = vector.load %arg4[%c1_43, %c0_44, %c0_45] : memref<4x256x128xbf16, #tpu.memory_space<vmem>>, vector<1x256x128xbf16>
    %49 = vector.shape_cast %48 : vector<1x256x128xbf16> to vector<256x128xbf16>
    %cst_46 = arith.constant dense<0.000000e+00> : vector<2x128xf32>
    %50 = tpu.matmul %47, %49, %cst_46 {dimension_numbers = #tpu.dot_dimension_numbers<[1], [0], [0], [1], [0, 0, 1, 1], [], []>} : vector<2x256xbf16>, vector<256x128xbf16>, vector<2x128xf32> -> vector<2x128xf32>
    %51 = arith.addf %45, %50 : vector<2x128xf32>
    %c0_47 = arith.constant 0 : index
    %c0_48 = arith.constant 0 : index
    %c0_49 = arith.constant 0 : index
    %c0_50 = arith.constant 0 : index
    %52 = vector.load %arg3[%c0_47, %c0_48, %c0_49, %c0_50] : memref<1x1x3x256xbf16, #tpu.memory_space<vmem>>, vector<1x1x2x256xbf16>
    %53 = vector.shape_cast %52 : vector<1x1x2x256xbf16> to vector<2x256xbf16>
    %c2_51 = arith.constant 2 : index
    %c0_52 = arith.constant 0 : index
    %c0_53 = arith.constant 0 : index
    %54 = vector.load %arg4[%c2_51, %c0_52, %c0_53] : memref<4x256x128xbf16, #tpu.memory_space<vmem>>, vector<1x256x128xbf16>
    %55 = vector.shape_cast %54 : vector<1x256x128xbf16> to vector<256x128xbf16>
    %cst_54 = arith.constant dense<0.000000e+00> : vector<2x128xf32>
    %56 = tpu.matmul %53, %55, %cst_54 {dimension_numbers = #tpu.dot_dimension_numbers<[1], [0], [0], [1], [0, 0, 1, 1], [], []>} : vector<2x256xbf16>, vector<256x128xbf16>, vector<2x128xf32> -> vector<2x128xf32>
    %57 = arith.addf %51, %56 : vector<2x128xf32>
    %c0_55 = arith.constant 0 : index
    %c0_56 = arith.constant 0 : index
    %c1_57 = arith.constant 1 : index
    %c0_58 = arith.constant 0 : index
    %58 = vector.load %arg3[%c0_55, %c0_56, %c1_57, %c0_58] : memref<1x1x3x256xbf16, #tpu.memory_space<vmem>>, vector<1x1x2x256xbf16>
    %59 = vector.shape_cast %58 : vector<1x1x2x256xbf16> to vector<2x256xbf16>
    %c3_59 = arith.constant 3 : index
    %c0_60 = arith.constant 0 : index
    %c0_61 = arith.constant 0 : index
    %60 = vector.load %arg4[%c3_59, %c0_60, %c0_61] : memref<4x256x128xbf16, #tpu.memory_space<vmem>>, vector<1x256x128xbf16>
    %61 = vector.shape_cast %60 : vector<1x256x128xbf16> to vector<256x128xbf16>
    %cst_62 = arith.constant dense<0.000000e+00> : vector<2x128xf32>
    %62 = tpu.matmul %59, %61, %cst_62 {dimension_numbers = #tpu.dot_dimension_numbers<[1], [0], [0], [1], [0, 0, 1, 1], [], []>} : vector<2x256xbf16>, vector<256x128xbf16>, vector<2x128xf32> -> vector<2x128xf32>
    %63 = arith.addf %57, %62 : vector<2x128xf32>
    %64 = vector.broadcast %0 : vector<1x128xf32> to vector<2x128xf32>
    %65 = arith.addf %63, %64 : vector<2x128xf32>
    %cst_63 = arith.constant 0.000000e+00 : f32
    %66 = vector.broadcast %cst_63 : f32 to vector<2x128xf32>
    %67 = arith.cmpf oge, %65, %66 : vector<2x128xf32>
    %cst_64 = arith.constant 2.000000e-01 : f32
    %68 = vector.broadcast %cst_64 : f32 to vector<2x128xf32>
    %69 = arith.mulf %68, %65 : vector<2x128xf32>
    %70 = arith.select %67, %65, %69 : vector<2x128xi1>, vector<2x128xf32>
    %71 = arith.truncf %70 : vector<2x128xf32> to vector<2x128xbf16>
    %c0_65 = arith.constant 0 : index
    %c1_66 = arith.constant 1 : index
    %c0_67 = arith.constant 0 : index
    %c0_68 = arith.constant 0 : index
    %72 = vector.load %arg6[%c0_65, %c1_66, %c0_67, %c0_68] : memref<1x2x2x128xbf16, #tpu.memory_space<vmem>>, vector<1x1x2x128xbf16>
    %73 = vector.shape_cast %72 : vector<1x1x2x128xbf16> to vector<2x128xbf16>
    %74 = vector.shape_cast %71 : vector<2x128xbf16> to vector<1x1x2x128xbf16>
    tpu.vector_store %arg6[%c0_65, %c1_66, %c0_67, %c0_68], %74 {strides = array<i32>} : memref<1x2x2x128xbf16, #tpu.memory_space<vmem>>, vector<1x1x2x128xbf16>,
    return
  }
  func.func @transform_0(%arg0: i32, %arg1: i32) -> (i32, i32, i32, i32) {
    %c0_i32 = arith.constant 0 : i32
    %c0_i32_0 = arith.constant 0 : i32
    %c0_i32_1 = arith.constant 0 : i32
    return %arg0, %arg1, %c0_i32, %c0_i32_0 : i32, i32, i32, i32
  }
  func.func @transform_1(%arg0: i32, %arg1: i32) -> (i32, i32, i32, i32) {
    %c1_i32 = arith.constant 1 : i32
    %0 = arith.addi %arg1, %c1_i32 : i32
    %c2_i32 = arith.constant 2 : i32
    %1 = arith.muli %0, %c2_i32 : i32
    %c0_i32 = arith.constant 0 : i32
    %c0_i32_0 = arith.constant 0 : i32
    %c0_i32_1 = arith.constant 0 : i32
    return %arg0, %1, %c0_i32, %c0_i32_0 : i32, i32, i32, i32
  }
  func.func @transform_2(%arg0: i32, %arg1: i32) -> (i32, i32, i32) {
    %c0_i32 = arith.constant 0 : i32
    %c0_i32_0 = arith.constant 0 : i32
    %c0_i32_1 = arith.constant 0 : i32
    %c0_i32_2 = arith.constant 0 : i32
    return %c0_i32, %c0_i32_0, %c0_i32_1 : i32, i32, i32
  }
  func.func @transform_3(%arg0: i32, %arg1: i32) -> (i32, i32) {
    %c0_i32 = arith.constant 0 : i32
    %c0_i32_0 = arith.constant 0 : i32
    %c0_i32_1 = arith.constant 0 : i32
    return %c0_i32, %c0_i32_0 : i32, i32
  }
  func.func @transform_4(%arg0: i32, %arg1: i32) -> (i32, i32, i32, i32) {
    %c0_i32 = arith.constant 0 : i32
    %c0_i32_0 = arith.constant 0 : i32
    %c0_i32_1 = arith.constant 0 : i32
    return %arg0, %arg1, %c0_i32, %c0_i32_0 : i32, i32, i32, i32
  }
}

module attributes {stable_mosaic.version = 11 : i64} {
  func.func @_conv4x4_tap_kernel(%arg0: i32, %arg1: i32, %arg2: memref<1x1x2x512xbf16, #tpu.memory_space<vmem>>, %arg3: memref<1x1x2x512xbf16, #tpu.memory_space<vmem>>, %arg4: memref<4x512x128xbf16, #tpu.memory_space<vmem>>, %arg5: memref<1x128xf32, #tpu.memory_space<vmem>>, %arg6: memref<1x1x1x128xf32, #tpu.memory_space<vmem>>) attributes {dimension_semantics = [#tpu.dimension_semantics<parallel>, #tpu.dimension_semantics<parallel>], iteration_bounds = array<i64: 2, 1>, scalar_prefetch = 0 : i64, scratch_operands = 0 : i64, tpu.core_type = #tpu.core_type<tc>, window_params = [{transform_indices = @transform_0, window_bounds = array<i64: 1, 1, 2, 512>}, {transform_indices = @transform_1, window_bounds = array<i64: 1, 1, 2, 512>}, {pipeline_mode = #tpu.pipeline_mode<synchronous>, transform_indices = @transform_2, window_bounds = array<i64: 4, 512, 128>}, {pipeline_mode = #tpu.pipeline_mode<synchronous>, transform_indices = @transform_3, window_bounds = array<i64: 1, 128>}, {transform_indices = @transform_4, window_bounds = array<i64: 1, 1, 1, 128>}]} {
    %c0 = arith.constant 0 : index
    %c0_0 = arith.constant 0 : index
    %0 = vector.load %arg5[%c0, %c0_0] : memref<1x128xf32, #tpu.memory_space<vmem>>, vector<1x128xf32>
    %c0_i32 = arith.constant 0 : i32
    %c0_i32_1 = arith.constant 0 : i32
    %1 = arith.addi %c0_i32, %c0_i32_1 : i32
    %c1_i32 = arith.constant 1 : i32
    scf.for %arg7 = %c0_i32 to %1 step %c1_i32  : i32 {
      %c1_i32_35 = arith.constant 1 : i32
      %29 = arith.addi %arg7, %c1_i32_35 : i32
      %c0_36 = arith.constant 0 : index
      %30 = arith.index_cast %arg7 : i32 to index
      %c0_37 = arith.constant 0 : index
      %c0_38 = arith.constant 0 : index
      %31 = vector.load %arg2[%c0_36, %30, %c0_37, %c0_38] : memref<1x1x2x512xbf16, #tpu.memory_space<vmem>>, vector<1x1x1x512xbf16>
      %32 = vector.shape_cast %31 : vector<1x1x1x512xbf16> to vector<1x512xbf16>
      %c0_39 = arith.constant 0 : index
      %c0_40 = arith.constant 0 : index
      %c0_41 = arith.constant 0 : index
      %33 = vector.load %arg4[%c0_39, %c0_40, %c0_41] : memref<4x512x128xbf16, #tpu.memory_space<vmem>>, vector<1x512x128xbf16>
      %34 = vector.shape_cast %33 : vector<1x512x128xbf16> to vector<512x128xbf16>
      %cst_42 = arith.constant dense<0.000000e+00> : vector<1x128xf32>
      %35 = tpu.matmul %32, %34, %cst_42 {dimension_numbers = #tpu.dot_dimension_numbers<[1], [0], [0], [1], [0, 0, 1, 1], [], []>} : vector<1x512xbf16>, vector<512x128xbf16>, vector<1x128xf32> -> vector<1x128xf32>
      %c0_43 = arith.constant 0 : index
      %36 = arith.index_cast %arg7 : i32 to index
      %c1_44 = arith.constant 1 : index
      %c0_45 = arith.constant 0 : index
      %37 = vector.load %arg2[%c0_43, %36, %c1_44, %c0_45] : memref<1x1x2x512xbf16, #tpu.memory_space<vmem>>, vector<1x1x1x512xbf16>
      %38 = vector.shape_cast %37 : vector<1x1x1x512xbf16> to vector<1x512xbf16>
      %c1_46 = arith.constant 1 : index
      %c0_47 = arith.constant 0 : index
      %c0_48 = arith.constant 0 : index
      %39 = vector.load %arg4[%c1_46, %c0_47, %c0_48] : memref<4x512x128xbf16, #tpu.memory_space<vmem>>, vector<1x512x128xbf16>
      %40 = vector.shape_cast %39 : vector<1x512x128xbf16> to vector<512x128xbf16>
      %cst_49 = arith.constant dense<0.000000e+00> : vector<1x128xf32>
      %41 = tpu.matmul %38, %40, %cst_49 {dimension_numbers = #tpu.dot_dimension_numbers<[1], [0], [0], [1], [0, 0, 1, 1], [], []>} : vector<1x512xbf16>, vector<512x128xbf16>, vector<1x128xf32> -> vector<1x128xf32>
      %42 = arith.addf %35, %41 : vector<1x128xf32>
      %c0_50 = arith.constant 0 : index
      %43 = arith.index_cast %29 : i32 to index
      %c0_51 = arith.constant 0 : index
      %c0_52 = arith.constant 0 : index
      %44 = vector.load %arg2[%c0_50, %43, %c0_51, %c0_52] : memref<1x1x2x512xbf16, #tpu.memory_space<vmem>>, vector<1x1x1x512xbf16>
      %45 = vector.shape_cast %44 : vector<1x1x1x512xbf16> to vector<1x512xbf16>
      %c2_53 = arith.constant 2 : index
      %c0_54 = arith.constant 0 : index
      %c0_55 = arith.constant 0 : index
      %46 = vector.load %arg4[%c2_53, %c0_54, %c0_55] : memref<4x512x128xbf16, #tpu.memory_space<vmem>>, vector<1x512x128xbf16>
      %47 = vector.shape_cast %46 : vector<1x512x128xbf16> to vector<512x128xbf16>
      %cst_56 = arith.constant dense<0.000000e+00> : vector<1x128xf32>
      %48 = tpu.matmul %45, %47, %cst_56 {dimension_numbers = #tpu.dot_dimension_numbers<[1], [0], [0], [1], [0, 0, 1, 1], [], []>} : vector<1x512xbf16>, vector<512x128xbf16>, vector<1x128xf32> -> vector<1x128xf32>
      %49 = arith.addf %42, %48 : vector<1x128xf32>
      %c0_57 = arith.constant 0 : index
      %50 = arith.index_cast %29 : i32 to index
      %c1_58 = arith.constant 1 : index
      %c0_59 = arith.constant 0 : index
      %51 = vector.load %arg2[%c0_57, %50, %c1_58, %c0_59] : memref<1x1x2x512xbf16, #tpu.memory_space<vmem>>, vector<1x1x1x512xbf16>
      %52 = vector.shape_cast %51 : vector<1x1x1x512xbf16> to vector<1x512xbf16>
      %c3_60 = arith.constant 3 : index
      %c0_61 = arith.constant 0 : index
      %c0_62 = arith.constant 0 : index
      %53 = vector.load %arg4[%c3_60, %c0_61, %c0_62] : memref<4x512x128xbf16, #tpu.memory_space<vmem>>, vector<1x512x128xbf16>
      %54 = vector.shape_cast %53 : vector<1x512x128xbf16> to vector<512x128xbf16>
      %cst_63 = arith.constant dense<0.000000e+00> : vector<1x128xf32>
      %55 = tpu.matmul %52, %54, %cst_63 {dimension_numbers = #tpu.dot_dimension_numbers<[1], [0], [0], [1], [0, 0, 1, 1], [], []>} : vector<1x512xbf16>, vector<512x128xbf16>, vector<1x128xf32> -> vector<1x128xf32>
      %56 = arith.addf %49, %55 : vector<1x128xf32>
      %57 = arith.addf %56, %0 : vector<1x128xf32>
      %c0_64 = arith.constant 0 : index
      %58 = arith.index_cast %arg7 : i32 to index
      %c0_65 = arith.constant 0 : index
      %c0_66 = arith.constant 0 : index
      %59 = vector.load %arg6[%c0_64, %58, %c0_65, %c0_66] : memref<1x1x1x128xf32, #tpu.memory_space<vmem>>, vector<1x1x1x128xf32>
      %60 = vector.shape_cast %59 : vector<1x1x1x128xf32> to vector<1x128xf32>
      %61 = vector.shape_cast %57 : vector<1x128xf32> to vector<1x1x1x128xf32>
      tpu.vector_store %arg6[%c0_64, %58, %c0_65, %c0_66], %61 {strides = array<i32>} : memref<1x1x1x128xf32, #tpu.memory_space<vmem>>, vector<1x1x1x128xf32>,
    }
    %c0_i32_2 = arith.constant 0 : i32
    %c0_3 = arith.constant 0 : index
    %c0_4 = arith.constant 0 : index
    %c0_5 = arith.constant 0 : index
    %c0_6 = arith.constant 0 : index
    %2 = vector.load %arg2[%c0_3, %c0_4, %c0_5, %c0_6] : memref<1x1x2x512xbf16, #tpu.memory_space<vmem>>, vector<1x1x1x512xbf16>
    %3 = vector.shape_cast %2 : vector<1x1x1x512xbf16> to vector<1x512xbf16>
    %c0_7 = arith.constant 0 : index
    %c0_8 = arith.constant 0 : index
    %c0_9 = arith.constant 0 : index
    %4 = vector.load %arg4[%c0_7, %c0_8, %c0_9] : memref<4x512x128xbf16, #tpu.memory_space<vmem>>, vector<1x512x128xbf16>
    %5 = vector.shape_cast %4 : vector<1x512x128xbf16> to vector<512x128xbf16>
    %cst = arith.constant dense<0.000000e+00> : vector<1x128xf32>
    %6 = tpu.matmul %3, %5, %cst {dimension_numbers = #tpu.dot_dimension_numbers<[1], [0], [0], [1], [0, 0, 1, 1], [], []>} : vector<1x512xbf16>, vector<512x128xbf16>, vector<1x128xf32> -> vector<1x128xf32>
    %c0_10 = arith.constant 0 : index
    %c0_11 = arith.constant 0 : index
    %c1 = arith.constant 1 : index
    %c0_12 = arith.constant 0 : index
    %7 = vector.load %arg2[%c0_10, %c0_11, %c1, %c0_12] : memref<1x1x2x512xbf16, #tpu.memory_space<vmem>>, vector<1x1x1x512xbf16>
    %8 = vector.shape_cast %7 : vector<1x1x1x512xbf16> to vector<1x512xbf16>
    %c1_13 = arith.constant 1 : index
    %c0_14 = arith.constant 0 : index
    %c0_15 = arith.constant 0 : index
    %9 = vector.load %arg4[%c1_13, %c0_14, %c0_15] : memref<4x512x128xbf16, #tpu.memory_space<vmem>>, vector<1x512x128xbf16>
    %10 = vector.shape_cast %9 : vector<1x512x128xbf16> to vector<512x128xbf16>
    %cst_16 = arith.constant dense<0.000000e+00> : vector<1x128xf32>
    %11 = tpu.matmul %8, %10, %cst_16 {dimension_numbers = #tpu.dot_dimension_numbers<[1], [0], [0], [1], [0, 0, 1, 1], [], []>} : vector<1x512xbf16>, vector<512x128xbf16>, vector<1x128xf32> -> vector<1x128xf32>
    %12 = arith.addf %6, %11 : vector<1x128xf32>
    %c0_17 = arith.constant 0 : index
    %c0_18 = arith.constant 0 : index
    %c0_19 = arith.constant 0 : index
    %c0_20 = arith.constant 0 : index
    %13 = vector.load %arg3[%c0_17, %c0_18, %c0_19, %c0_20] : memref<1x1x2x512xbf16, #tpu.memory_space<vmem>>, vector<1x1x1x512xbf16>
    %14 = vector.shape_cast %13 : vector<1x1x1x512xbf16> to vector<1x512xbf16>
    %c2 = arith.constant 2 : index
    %c0_21 = arith.constant 0 : index
    %c0_22 = arith.constant 0 : index
    %15 = vector.load %arg4[%c2, %c0_21, %c0_22] : memref<4x512x128xbf16, #tpu.memory_space<vmem>>, vector<1x512x128xbf16>
    %16 = vector.shape_cast %15 : vector<1x512x128xbf16> to vector<512x128xbf16>
    %cst_23 = arith.constant dense<0.000000e+00> : vector<1x128xf32>
    %17 = tpu.matmul %14, %16, %cst_23 {dimension_numbers = #tpu.dot_dimension_numbers<[1], [0], [0], [1], [0, 0, 1, 1], [], []>} : vector<1x512xbf16>, vector<512x128xbf16>, vector<1x128xf32> -> vector<1x128xf32>
    %18 = arith.addf %12, %17 : vector<1x128xf32>
    %c0_24 = arith.constant 0 : index
    %c0_25 = arith.constant 0 : index
    %c1_26 = arith.constant 1 : index
    %c0_27 = arith.constant 0 : index
    %19 = vector.load %arg3[%c0_24, %c0_25, %c1_26, %c0_27] : memref<1x1x2x512xbf16, #tpu.memory_space<vmem>>, vector<1x1x1x512xbf16>
    %20 = vector.shape_cast %19 : vector<1x1x1x512xbf16> to vector<1x512xbf16>
    %c3 = arith.constant 3 : index
    %c0_28 = arith.constant 0 : index
    %c0_29 = arith.constant 0 : index
    %21 = vector.load %arg4[%c3, %c0_28, %c0_29] : memref<4x512x128xbf16, #tpu.memory_space<vmem>>, vector<1x512x128xbf16>
    %22 = vector.shape_cast %21 : vector<1x512x128xbf16> to vector<512x128xbf16>
    %cst_30 = arith.constant dense<0.000000e+00> : vector<1x128xf32>
    %23 = tpu.matmul %20, %22, %cst_30 {dimension_numbers = #tpu.dot_dimension_numbers<[1], [0], [0], [1], [0, 0, 1, 1], [], []>} : vector<1x512xbf16>, vector<512x128xbf16>, vector<1x128xf32> -> vector<1x128xf32>
    %24 = arith.addf %18, %23 : vector<1x128xf32>
    %25 = arith.addf %24, %0 : vector<1x128xf32>
    %c0_31 = arith.constant 0 : index
    %c0_32 = arith.constant 0 : index
    %c0_33 = arith.constant 0 : index
    %c0_34 = arith.constant 0 : index
    %26 = vector.load %arg6[%c0_31, %c0_32, %c0_33, %c0_34] : memref<1x1x1x128xf32, #tpu.memory_space<vmem>>, vector<1x1x1x128xf32>
    %27 = vector.shape_cast %26 : vector<1x1x1x128xf32> to vector<1x128xf32>
    %28 = vector.shape_cast %25 : vector<1x128xf32> to vector<1x1x1x128xf32>
    tpu.vector_store %arg6[%c0_31, %c0_32, %c0_33, %c0_34], %28 {strides = array<i32>} : memref<1x1x1x128xf32, #tpu.memory_space<vmem>>, vector<1x1x1x128xf32>,
    return
  }
  func.func @transform_0(%arg0: i32, %arg1: i32) -> (i32, i32, i32, i32) {
    %c0_i32 = arith.constant 0 : i32
    %c0_i32_0 = arith.constant 0 : i32
    %c0_i32_1 = arith.constant 0 : i32
    return %arg0, %arg1, %c0_i32, %c0_i32_0 : i32, i32, i32, i32
  }
  func.func @transform_1(%arg0: i32, %arg1: i32) -> (i32, i32, i32, i32) {
    %c1_i32 = arith.constant 1 : i32
    %0 = arith.addi %arg1, %c1_i32 : i32
    %c1_i32_0 = arith.constant 1 : i32
    %1 = arith.muli %0, %c1_i32_0 : i32
    %c0_i32 = arith.constant 0 : i32
    %c0_i32_1 = arith.constant 0 : i32
    %c0_i32_2 = arith.constant 0 : i32
    return %arg0, %1, %c0_i32, %c0_i32_1 : i32, i32, i32, i32
  }
  func.func @transform_2(%arg0: i32, %arg1: i32) -> (i32, i32, i32) {
    %c0_i32 = arith.constant 0 : i32
    %c0_i32_0 = arith.constant 0 : i32
    %c0_i32_1 = arith.constant 0 : i32
    %c0_i32_2 = arith.constant 0 : i32
    return %c0_i32, %c0_i32_0, %c0_i32_1 : i32, i32, i32
  }
  func.func @transform_3(%arg0: i32, %arg1: i32) -> (i32, i32) {
    %c0_i32 = arith.constant 0 : i32
    %c0_i32_0 = arith.constant 0 : i32
    %c0_i32_1 = arith.constant 0 : i32
    return %c0_i32, %c0_i32_0 : i32, i32
  }
  func.func @transform_4(%arg0: i32, %arg1: i32) -> (i32, i32, i32, i32) {
    %c0_i32 = arith.constant 0 : i32
    %c0_i32_0 = arith.constant 0 : i32
    %c0_i32_1 = arith.constant 0 : i32
    return %arg0, %arg1, %c0_i32, %c0_i32_0 : i32, i32, i32, i32
  }
}

</mosaic_0001>

<bundles_post_ra>
// kernel: fc_discriminator_forward.5
= control target key start
LH: loop header
LB: loop body
LE: loop exit
PB: predicated region body
PF: predicated region fallthrough
CT: control target
= control target key end

     0   :  { %s2107_s15 = smov 0   ;;  %s2109_s16 = smov 0   ;;  %s2459_s0 = inlined_call_operand.vmem [shape: bf16[2,17,17,128], index: 0, kind: input, shape index: {}, may-alias: {0,1}]   ;;  %s2460_s1 = inlined_call_operand.vmem [shape: bf16[2,17,17,128], index: 1, kind: input, shape index: {}, may-alias: {0,1}]   ;;  %s2461_s2 = inlined_call_operand.vmem [shape: bf16[4,128,128], index: 2, kind: input, shape index: {}]   ;;  %s2462_s3 = inlined_call_operand.vmem [shape: f32[1,128], index: 3, kind: input, shape index: {}]   ;;  %s2463_s4 = inlined_call_operand.vmem [shape: bf16[2,16,16,128], index: 4, kind: output, shape index: {}]  }
   0x1   :  { %s2111_s17 = smov 0  }
   0x2 LB: > { %s26_s18 = sadd.s32 1, %s2068_s16  ;;  %p1486_p0 = scmp.ge.s32.totalorder %s2072_s17, 1  ;;  %s2072_s17 = sphi %s2111_s17, %s14_s17   ;;  %s2068_s16 = sphi %s2109_s16, %s2465_s16   ;;  %s2064_s15 = sphi %s2107_s15, %s2464_s15  }
   0x3   : > { %p28_p1 = scmp.ge.s32.totalorder %s26_s18, 2  ;;  %p218_p2 = scmp.lt.s32.totalorder %s2072_s17, 3 }
   0x5   : > { %s2467_s18 = smov (%p28_p1, %s26_s18), 0  ;;  %p219_p3 = pnand %p1486_p0, %p218_p2 }
   0x6   : > { %p276_p4 = scmp.lt.s32.totalorder (!%p219_p3), %s2064_s15, 1  ;;  %s2145_s7 = smov (!%p219_p3), 0  }
   0x7   : > { %222 = sbr.rel (%p219_p3) target bundleno = 491 (0x1eb), region = 36 }
   0xc   : > { %v2128_v0 = vld [vmem:[%s2462_s3] ss:$0 sm:$0xff]  ;;  %s2469_s15 = smov (!%p276_p4, %s2064_s15), 1 }
   0xd   : > { %s1933_s21 = smul.u32 204, %s2469_s15  ;;  %s1682_s22 = sshll.u32 %s2469_s15, 7 }
   0xe   : > { %s2133_s25 = scalar_lea.vmem %s2463_s4, %s1682_s22 }
   0xf   : > { %s2138_s28 = scalar_lea.vmem %s2459_s0, %s1933_s21  ;;  %s1681_s29 = sadd.s32 192, %s1933_s21 }
  0x10   : > { %s2143_s6 = scalar_lea.vmem %s2460_s1, %s1681_s29 }
  0x11 LB: >> { %v1972_v1 = vld [vmem:[%s2461_s2 + $0x78] sm:$0xff]   ;;  %v2078_v2 = vmov 0.0   ;;  %v1974_v4 = vld [vmem:[%s2461_s2 + $0x70] sm:$0xff]   ;;  %vm2079_vm0 = vmmov 0   ;;  %v1976_v6 = vld [vmem:[%s2461_s2 + $0x68] sm:$0xff]   ;;  %s1683_s26 = smul.u32 12, %s2076_s7  ;;  %s2076_s7 = sphi %s2145_s7, %s322_s7  }
  0x12   : >> { %1773 = vmatprep.subr.bf16.mxu0 %v2078_v2  ;;  %1793 = vmatprep.subr.bf16.mxu1 %v2078_v2  ;;  %v1973_v3 = vld [vmem:[%s2461_s2 + $0x38] sm:$0xff]   ;;  %v1975_v5 = vld [vmem:[%s2461_s2 + $0x30] sm:$0xff]   ;;  %v1977_v7 = vld [vmem:[%s2461_s2 + $0x28] sm:$0xff]   ;;  %vm371_vm1 = vsmask.f32 7424 }
  0x13   : >> { %1774 = vmatpush3.bf16.msra.mxu0 %v1972_v1  ;;  %1789 = vmatprep.mubr.msk.bf16.mxu0 %vm2079_vm0, %v2078_v2  ;;  %v1978_v8 = vld [vmem:[%s2461_s2 + $0x60] sm:$0xff]   ;;  %v1980_v10 = vld [vmem:[%s2461_s2 + $0x58] sm:$0xff]   ;;  %s2191_s8 = scalar_lea.vmem %s2138_s28, %s1683_s26  ;;  %v1982_v14 = vld [vmem:[%s2461_s2 + $0x50] sm:$0xff]  }
  0x14   : >> { %1794 = vmatpush3.bf16.msra.mxu1 %v1973_v3  ;;  %1775 = vmatprep.subr.bf16.mxu0 %v2078_v2  ;;  %v1979_v9 = vld [vmem:[%s2461_s2 + $0x20] sm:$0xff]   ;;  %v1981_v11 = vld [vmem:[%s2461_s2 + $0x18] sm:$0xff]   ;;  %v1989_v13 = vld [vmem:[%s2191_s8 + $0x8] ss:$0 sps:$4 sm:$0x11]  }
  0x15   : >> { %1795 = vmatprep.subr.bf16.mxu1 %v2078_v2  ;;  %1809 = vmatprep.mubr.msk.bf16.mxu1 %vm2079_vm0, %v2078_v2  ;;  %v1988_v12 = vld [vmem:[%s2191_s8] sm:$0xff]   ;;  %v1983_v15 = vld [vmem:[%s2461_s2 + $0x10] sm:$0xff]   ;;  %v1984_v17 = vld [vmem:[%s2461_s2 + $0x48] sm:$0xff]   ;;  %v380_v20 = vshll.u32 %v1989_v13, 16 }
  0x16   : >> { %v375_v16 = vshll.u32 %v1988_v12, 16  ;;  %v373_v18 = vshrl.u32 %v1988_v12, 16  ;;  %v1985_v21 = vld [vmem:[%s2461_s2 + $0x8] sm:$0xff]   ;;  %v1986_v22 = vld [vmem:[%s2461_s2 + $0x40] sm:$0xff]   ;;  %v1990_v27 = vld [vmem:[%s2461_s2 + $0xb8] sm:$0xff]  }
  0x17   : >> { %1776 = vmatpush3.bf16.msra.mxu0 %v1974_v4  ;;  %v1987_v23 = vld [vmem:[%s2461_s2] sm:$0xff]   ;;  %v382_v25 = vrot.slane %v380_v20, 1  ;;  %v1991_v28 = vld [vmem:[%s2461_s2 + $0xf8] sm:$0xff]   ;;  %v1992_v29 = vld [vmem:[%s2461_s2 + $0xb0] sm:$0xff]  }
  0x18   : >> { %1796 = vmatpush3.bf16.msra.mxu1 %v1975_v5  ;;  %1777 = vmatprep.subr.bf16.mxu0 %v2078_v2  ;;  %v377_v19 = vrot.slane %v375_v16, 1  ;;  %v1993_v30 = vld [vmem:[%s2461_s2 + $0xf0] sm:$0xff]   ;;  %v1994_v31 = vld [vmem:[%s2461_s2 + $0xa8] sm:$0xff]   ;;  %v1996_v33 = vld [vmem:[%s2461_s2 + $0xa0] sm:$0xff]  }
  0x19   : >> { %1797 = vmatprep.subr.bf16.mxu1 %v2078_v2  ;;  %v1995_v32 = vld [vmem:[%s2461_s2 + $0xe8] sm:$0xff]   ;;  %v1997_v34 = vld [vmem:[%s2461_s2 + $0xe0] sm:$0xff]   ;;  %v1998_v35 = vld [vmem:[%s2461_s2 + $0x98] sm:$0xff]  }
  0x1a   : >> { %v378_v24 = vor.u32 %v377_v19, %v373_v18  ;;  %v1999_v36 = vld [vmem:[%s2461_s2 + $0xd8] sm:$0xff]   ;;  %v2007_v37 = vld [vmem:[%s2191_s8 + $0xc] sm:$0xff]   ;;  %v2008_v40 = vld [vmem:[%s2191_s8 + $0x14] ss:$0 sps:$4 sm:$0x11]  }
  0x1b   : >> { %1778 = vmatpush3.bf16.msra.mxu0 %v1976_v6  ;;  %v2000_v38 = vld [vmem:[%s2461_s2 + $0x90] sm:$0xff]   ;;  %v714_v41 = vshll.u32 %v2007_v37, 16  ;;  %v2002_v42 = vld [vmem:[%s2461_s2 + $0x88] sm:$0xff]   ;;  %v712_v44 = vshrl.u32 %v2007_v37, 16  ;;  %v719_v46 = vshll.u32 %v2008_v40, 16  ;;  %v2004_v47 = vld [vmem:[%s2461_s2 + $0x80] sm:$0xff]  }
  0x1c   : >> { %1798 = vmatpush3.bf16.msra.mxu1 %v1977_v7  ;;  %1779 = vmatprep.subr.bf16.mxu0 %v2078_v2  ;;  %v383_v26 = vsel %vm371_vm1, %v378_v24, %v382_v25  ;;  %v2001_v39 = vld [vmem:[%s2461_s2 + $0xd0] sm:$0xff]   ;;  %v2003_v43 = vld [vmem:[%s2461_s2 + $0xc8] sm:$0xff]   ;;  %v2005_v48 = vld [vmem:[%s2461_s2 + $0xc0] sm:$0xff]  }
  0x1d   : >> { %1799 = vmatprep.subr.bf16.mxu1 %v2078_v2  ;;  %v716_v45 = vrot.slane %v714_v41, 1  ;;  %v721_v50 = vrot.slane %v719_v46, 1  ;;  %v2006_v51 = vld [vmem:[%s2191_s8 + $0xc] sm:$0xff]   ;;  %s1686_s8 = sshll.u32 %s2076_s7, 3  ;;  %s322_s7 = sadd.s32 1, %s2076_s7  }
  0x1e   : >> { %s839_s22 = scalar_lea.vmem %s2133_s25, %s1686_s8  ;;  %p319_p5 = scmp.ge.s32.totalorder %s322_s7, 15  }
  0x1f   : >> { %1780 = vmatpush3.bf16.msra.mxu0 %v1978_v8  ;;  %v717_v49 = vor.u32 %v716_v45, %v712_v44  ;;  %v2009_v19 = vld [vmem:[%s2461_s2 + $0x78] sm:$0xff] (%p319_p5)   ;;  %v2080_v20 = vmov (%p319_p5), 0.0   ;;  %vm2081_vm4 = vmmov (%p319_p5), 0   ;;  %v2013_v24 = vld [vmem:[%s2461_s2 + $0x68] sm:$0xff] (%p319_p5)   ;;  %v2023_v40 = vld [vmem:[%s2461_s2 + $0x40] sm:$0xff] (%p319_p5)  }
  0x20   : >> { %1800 = vmatpush3.bf16.msra.mxu1 %v1979_v9  ;;  %1781 = vmatprep.subr.bf16.mxu0 %v2078_v2  ;;  %v2014_v25 = vld [vmem:[%s2461_s2 + $0x28] sm:$0xff] (%p319_p5)   ;;  %v2027_v45 = vld [vmem:[%s2461_s2 + $0xb8] sm:$0xff] (%p319_p5)  }
  0x21   : >> { %1801 = vmatprep.subr.bf16.mxu1 %v2078_v2  ;;  %v722_v52 = vsel %vm371_vm1, %v717_v49, %v721_v50  ;;  %v2028_v46 = vld [vmem:[%s2461_s2 + $0xf8] sm:$0xff] (%p319_p5)   ;;  %v2031_v49 = vld [vmem:[%s2461_s2 + $0xa8] sm:$0xff] (%p319_p5)  }
  0x22   : > { %v2032_v50 = vld [vmem:[%s2461_s2 + $0xe8] sm:$0xff] (%p319_p5)  }
  0x23   : >> { %1782 = vmatpush3.bf16.msra.mxu0 %v1980_v10 }
  0x24   : >> { %1802 = vmatpush3.bf16.msra.mxu1 %v1981_v11  ;;  %1783 = vmatprep.subr.bf16.mxu0 %v2078_v2 }
  0x25   : >> { %1803 = vmatprep.subr.bf16.mxu1 %v2078_v2 }
  0x27   : >> { %1784 = vmatpush3.bf16.msra.mxu0 %v1982_v14 }
  0x28   : >> { %1804 = vmatpush3.bf16.msra.mxu1 %v1983_v15  ;;  %1785 = vmatprep.subr.bf16.mxu0 %v2078_v2 }
  0x29   : >> { %1805 = vmatprep.subr.bf16.mxu1 %v2078_v2 }
  0x2b   : >> { %1786 = vmatpush3.bf16.msra.mxu0 %v1984_v17 }
  0x2c   : >> { %1806 = vmatpush3.bf16.msra.mxu1 %v1985_v21  ;;  %1787 = vmatprep.subr.bf16.mxu0 %v2078_v2  ;;  %v2010_v21 = vld [vmem:[%s2461_s2 + $0x38] sm:$0xff] (%p319_p5)  }
  0x2d   : >> { %1807 = vmatprep.subr.bf16.mxu1 %v2078_v2 }
  0x2f   : >> { %1788 = vmatpush3.bf16.msra.mxu0 %v1986_v22  ;;  %v2011_v22 = vld [vmem:[%s2461_s2 + $0x70] sm:$0xff] (%p319_p5)  }
  0x30   : >> { %1808 = vmatpush3.bf16.msra.mxu1 %v1987_v23  ;;  %1813 = vmatprep.subr.bf16.mxu0 %v2078_v2  ;;  %v2012_v23 = vld [vmem:[%s2461_s2 + $0x30] sm:$0xff] (%p319_p5)  }
  0x31   : >> { %1833 = vmatprep.subr.bf16.mxu1 %v2078_v2 }
  0x32   : >> { %1790 = vmatmul.mubr.bf16.vlgmr.msra.gmra.mxu0 %v383_v26  ;;  %v2015_v26 = vld [vmem:[%s2461_s2 + $0x60] sm:$0xff] (%p319_p5)  }
  0x33   : >> { %1810 = vmatmul.mubr.bf16.vlgmr.msra.gmra.mxu1 %v1988_v12  ;;  %1814 = vmatpush3.bf16.msra.mxu0 %v1990_v27  ;;  %v2016_v27 = vld [vmem:[%s2461_s2 + $0x20] sm:$0xff] (%p319_p5)  }
  0x34   : >> { %1834 = vmatpush3.bf16.msra.mxu1 %v1991_v28  ;;  %1815 = vmatprep.subr.bf16.mxu0 %v2078_v2  ;;  %v2017_v28 = vld [vmem:[%s2461_s2 + $0x58] sm:$0xff] (%p319_p5)  }
  0x35   : >> { %1835 = vmatprep.subr.bf16.mxu1 %v2078_v2  ;;  %1829 = vmatprep.mubr.msk.bf16.mxu0 %vm2079_vm0, %v2078_v2 }
  0x36   : >> { %1849 = vmatprep.mubr.msk.bf16.mxu1 %vm2079_vm0, %v2078_v2 }
  0x37   : >> { %1816 = vmatpush3.bf16.msra.mxu0 %v1992_v29  ;;  %v2018_v29 = vld [vmem:[%s2461_s2 + $0x18] sm:$0xff] (%p319_p5)  }
  0x38   : >> { %1836 = vmatpush3.bf16.msra.mxu1 %v1993_v30  ;;  %1817 = vmatprep.subr.bf16.mxu0 %v2078_v2  ;;  %v2025_v30 = vld [vmem:[%s2138_s28 + $0xb4] sm:$0xff] (%p319_p5)  }
  0x39   : >> { %1837 = vmatprep.subr.bf16.mxu1 %v2078_v2 }
  0x3b   : >> { %1818 = vmatpush3.bf16.msra.mxu0 %v1994_v31  ;;  %v2026_v31 = vld [vmem:[%s2138_s28 + $0xbc] ss:$0 sps:$4 sm:$0x11] (%p319_p5)  }
  0x3c   : >> { %1838 = vmatpush3.bf16.msra.mxu1 %v1995_v32  ;;  %1819 = vmatprep.subr.bf16.mxu0 %v2078_v2  ;;  %v2019_v32 = vld [vmem:[%s2461_s2 + $0x50] sm:$0xff] (%p319_p5)  }
  0x3d   : >> { %1839 = vmatprep.subr.bf16.mxu1 %v2078_v2 }
  0x3f   : >> { %1820 = vmatpush3.bf16.msra.mxu0 %v1996_v33  ;;  %v2020_v33 = vld [vmem:[%s2461_s2 + $0x10] sm:$0xff] (%p319_p5)  }
  0x40   : >> { %1840 = vmatpush3.bf16.msra.mxu1 %v1997_v34  ;;  %1821 = vmatprep.subr.bf16.mxu0 %v2078_v2  ;;  %v891_v34 = vshll.u32 (%p319_p5), %v2025_v30, 16 }
  0x41   : >> { %1841 = vmatprep.subr.bf16.mxu1 %v2078_v2 }
  0x42   : > { %v893_v37 = vrot.slane (%p319_p5), %v891_v34, 1 }
  0x43   : >> { %1822 = vmatpush3.bf16.msra.mxu0 %v1998_v35  ;;  %v2021_v35 = vld [vmem:[%s2461_s2 + $0x48] sm:$0xff] (%p319_p5)  }
  0x44   : >> { %1842 = vmatpush3.bf16.msra.mxu1 %v1999_v36  ;;  %1823 = vmatprep.subr.bf16.mxu0 %v2078_v2  ;;  %v889_v36 = vshrl.u32 (%p319_p5), %v2025_v30, 16 }
  0x45   : >> { %1843 = vmatprep.subr.bf16.mxu1 %v2078_v2 }
  0x46   : > { %v894_v41 = vor.u32 (%p319_p5), %v893_v37, %v889_v36 }
  0x47   : >> { %1824 = vmatpush3.bf16.msra.mxu0 %v2000_v38  ;;  %v896_v38 = vshll.u32 (%p319_p5), %v2026_v31, 16 }
  0x48   : >> { %1844 = vmatpush3.bf16.msra.mxu1 %v2001_v39  ;;  %1825 = vmatprep.subr.bf16.mxu0 %v2078_v2  ;;  %v2022_v39 = vld [vmem:[%s2461_s2 + $0x8] sm:$0xff] (%p319_p5)  }
  0x49   : >> { %1845 = vmatprep.subr.bf16.mxu1 %v2078_v2 }
  0x4b   : >> { %1826 = vmatpush3.bf16.msra.mxu0 %v2002_v42  ;;  %v898_v42 = vrot.slane (%p319_p5), %v896_v38, 1 }
  0x4c   : >> { %1846 = vmatpush3.bf16.msra.mxu1 %v2003_v43  ;;  %1827 = vmatprep.subr.bf16.mxu0 %v2078_v2  ;;  %v2024_v43 = vld [vmem:[%s2461_s2] sm:$0xff] (%p319_p5)  }
  0x4d   : >> { %1847 = vmatprep.subr.bf16.mxu1 %v2078_v2  ;;  %v899_v44 = vsel (%p319_p5), %vm371_vm1, %v894_v41, %v898_v42 }
  0x4f   : >> { %1828 = vmatpush3.bf16.msra.mxu0 %v2004_v47  ;;  %v2029_v47 = vld [vmem:[%s2461_s2 + $0xb0] sm:$0xff] (%p319_p5)  }
  0x50   : >> { %1848 = vmatpush3.bf16.msra.mxu1 %v2005_v48  ;;  %1853 = vmatprep.subr.bf16.mxu0 (%p319_p5), %v2080_v20  ;;  %v2030_v48 = vld [vmem:[%s2461_s2 + $0xf0] sm:$0xff] (%p319_p5)  }
  0x51   : > { %1873 = vmatprep.subr.bf16.mxu1 (%p319_p5), %v2080_v20 }
  0x52   : >> { %1830 = vmatmul.mubr.bf16.vlgmr.msra.gmra.mxu0 %v2006_v51  ;;  %v2033_v51 = vld [vmem:[%s2461_s2 + $0xa0] sm:$0xff] (%p319_p5)  }
  0x53   : >> { %1850 = vmatmul.mubr.bf16.vlgmr.msra.gmra.mxu1 %v722_v52  ;;  %1854 = vmatpush3.bf16.msra.mxu0 (%p319_p5), %v2009_v19  ;;  %v2034_v52 = vld [vmem:[%s2461_s2 + $0xe0] sm:$0xff] (%p319_p5)  }
  0x54   : > { %1869 = vmatprep.mubr.msk.bf16.mxu0 (%p319_p5), %vm2081_vm4, %v2080_v20  ;;  %1874 = vmatpush3.bf16.msra.mxu1 (%p319_p5), %v2010_v21 }
  0x55   : > { %1855 = vmatprep.subr.bf16.mxu0 (%p319_p5), %v2080_v20  ;;  %1875 = vmatprep.subr.bf16.mxu1 (%p319_p5), %v2080_v20 }
  0x56   : > { %1889 = vmatprep.mubr.msk.bf16.mxu1 (%p319_p5), %vm2081_vm4, %v2080_v20 }
  0x57   : > { %1856 = vmatpush3.bf16.msra.mxu0 (%p319_p5), %v2011_v22 }
  0x58   : > { %1876 = vmatpush3.bf16.msra.mxu1 (%p319_p5), %v2012_v23  ;;  %1857 = vmatprep.subr.bf16.mxu0 (%p319_p5), %v2080_v20 }
  0x59   : > { %1877 = vmatprep.subr.bf16.mxu1 (%p319_p5), %v2080_v20 }
  0x5b   : > { %1858 = vmatpush3.bf16.msra.mxu0 (%p319_p5), %v2013_v24 }
  0x5c   : > { %1878 = vmatpush3.bf16.msra.mxu1 (%p319_p5), %v2014_v25  ;;  %1859 = vmatprep.subr.bf16.mxu0 (%p319_p5), %v2080_v20 }
  0x5d   : > { %1879 = vmatprep.subr.bf16.mxu1 (%p319_p5), %v2080_v20 }
  0x5f   : > { %1860 = vmatpush3.bf16.msra.mxu0 (%p319_p5), %v2015_v26 }
  0x60   : > { %1880 = vmatpush3.bf16.msra.mxu1 (%p319_p5), %v2016_v27  ;;  %1861 = vmatprep.subr.bf16.mxu0 (%p319_p5), %v2080_v20 }
  0x61   : > { %1881 = vmatprep.subr.bf16.mxu1 (%p319_p5), %v2080_v20 }
  0x63   : > { %1862 = vmatpush3.bf16.msra.mxu0 (%p319_p5), %v2017_v28 }
  0x64   : > { %1882 = vmatpush3.bf16.msra.mxu1 (%p319_p5), %v2018_v29  ;;  %1863 = vmatprep.subr.bf16.mxu0 (%p319_p5), %v2080_v20 }
  0x65   : > { %1883 = vmatprep.subr.bf16.mxu1 (%p319_p5), %v2080_v20 }
  0x67   : > { %1864 = vmatpush3.bf16.msra.mxu0 (%p319_p5), %v2019_v32 }
  0x68   : > { %1884 = vmatpush3.bf16.msra.mxu1 (%p319_p5), %v2020_v33  ;;  %1865 = vmatprep.subr.bf16.mxu0 (%p319_p5), %v2080_v20 }
  0x69   : > { %1885 = vmatprep.subr.bf16.mxu1 (%p319_p5), %v2080_v20 }
  0x6b   : > { %1866 = vmatpush3.bf16.msra.mxu0 (%p319_p5), %v2021_v35 }
  0x6c   : > { %1886 = vmatpush3.bf16.msra.mxu1 (%p319_p5), %v2022_v39  ;;  %1867 = vmatprep.subr.bf16.mxu0 (%p319_p5), %v2080_v20 }
  0x6d   : > { %1887 = vmatprep.subr.bf16.mxu1 (%p319_p5), %v2080_v20 }
  0x6f   : > { %1868 = vmatpush3.bf16.msra.mxu0 (%p319_p5), %v2023_v40 }
  0x70   : > { %1888 = vmatpush3.bf16.msra.mxu1 (%p319_p5), %v2024_v43  ;;  %1893 = vmatprep.subr.bf16.mxu0 (%p319_p5), %v2080_v20 }
  0x71   : > { %1913 = vmatprep.subr.bf16.mxu1 (%p319_p5), %v2080_v20 }
  0x72   : > { %1870 = vmatmul.mubr.bf16.vlgmr.msra.gmra.mxu0 (%p319_p5), %v899_v44 }
  0x73   : > { %1890 = vmatmul.mubr.bf16.vlgmr.msra.gmra.mxu1 (%p319_p5), %v2025_v30  ;;  %1894 = vmatpush3.bf16.msra.mxu0 (%p319_p5), %v2027_v45 }
  0x74   : > { %1914 = vmatpush3.bf16.msra.mxu1 (%p319_p5), %v2028_v46  ;;  %1895 = vmatprep.subr.bf16.mxu0 (%p319_p5), %v2080_v20 }
  0x75   : > { %1915 = vmatprep.subr.bf16.mxu1 (%p319_p5), %v2080_v20  ;;  %1909 = vmatprep.mubr.msk.bf16.mxu0 (%p319_p5), %vm2081_vm4, %v2080_v20 }
  0x76   : > { %1929 = vmatprep.mubr.msk.bf16.mxu1 (%p319_p5), %vm2081_vm4, %v2080_v20 }
  0x77   : > { %1896 = vmatpush3.bf16.msra.mxu0 (%p319_p5), %v2029_v47 }
  0x78   : > { %1916 = vmatpush3.bf16.msra.mxu1 (%p319_p5), %v2030_v48  ;;  %1897 = vmatprep.subr.bf16.mxu0 (%p319_p5), %v2080_v20 }
  0x79   : > { %1917 = vmatprep.subr.bf16.mxu1 (%p319_p5), %v2080_v20 }
  0x7b   : > { %1898 = vmatpush3.bf16.msra.mxu0 (%p319_p5), %v2031_v49 }
  0x7c   : > { %1918 = vmatpush3.bf16.msra.mxu1 (%p319_p5), %v2032_v50  ;;  %1899 = vmatprep.subr.bf16.mxu0 (%p319_p5), %v2080_v20 }
  0x7d   : > { %1919 = vmatprep.subr.bf16.mxu1 (%p319_p5), %v2080_v20 }
  0x7f   : > { %1900 = vmatpush3.bf16.msra.mxu0 (%p319_p5), %v2033_v51 }
  0x80   : > { %1920 = vmatpush3.bf16.msra.mxu1 (%p319_p5), %v2034_v52  ;;  %1901 = vmatprep.subr.bf16.mxu0 (%p319_p5), %v2080_v20 }
  0x81   : > { %1921 = vmatprep.subr.bf16.mxu1 (%p319_p5), %v2080_v20 }
  0xf2   : >> { %v467_v53 = vpop.f32.mrf.mxu0 }
  0xf3   : >> { %v557_v54 = vpop.f32.mrf.mxu1 }
  0xf4   : >> { %v1791_v55 = vpop.f32.mrf.mxu0  ;;  %v558_v61 = vadd.f32 %v557_v54, %v467_v53  ;;  %v2035_v53 = vld [vmem:[%s2461_s2 + $0x98] sm:$0xff] (%p319_p5)  }
  0xf5   : >> { %v1811_v56 = vpop.f32.mrf.mxu1  ;;  %v2036_v54 = vld [vmem:[%s2461_s2 + $0xd8] sm:$0xff] (%p319_p5)   ;;  %v2044_v55 = vld [vmem:[%s2143_s6] sm:$0xff] (%p319_p5)   ;;  %1902 = vmatpush3.bf16.msra.mxu0 (%p319_p5), %v2035_v53 }
  0xf6   : >> { %v470_v57 = vpop.f32.mrf.mxu0  ;;  %v2037_v56 = vld [vmem:[%s2461_s2 + $0x90] sm:$0xff] (%p319_p5)   ;;  %1922 = vmatpush3.bf16.msra.mxu1 (%p319_p5), %v2036_v54  ;;  %1903 = vmatprep.subr.bf16.mxu0 (%p319_p5), %v2080_v20 }
  0xf7   : >> { %v560_v58 = vpop.f32.mrf.mxu1  ;;  %1923 = vmatprep.subr.bf16.mxu1 (%p319_p5), %v2080_v20 }
  0xf8   : >> { %v1792_v59 = vpop.f32.mrf.mxu0  ;;  %v561_v3 = vadd.f32 %v560_v58, %v470_v57  ;;  %v2038_v57 = vld [vmem:[%s2461_s2 + $0xd0] sm:$0xff] (%p319_p5)   ;;  %v2045_v58 = vld [vmem:[%s2143_s6 + $0x8] ss:$0 sps:$4 sm:$0x11] (%p319_p5)  }
  0xf9   : >> { %v1812_v60 = vpop.f32.mrf.mxu1  ;;  %v1227_v59 = vshll.u32 (%p319_p5), %v2044_v55, 16  ;;  %1904 = vmatpush3.bf16.msra.mxu0 (%p319_p5), %v2037_v56 }
  0xfa   : > { %v2039_v60 = vld [vmem:[%s2461_s2 + $0x88] sm:$0xff] (%p319_p5)   ;;  %1924 = vmatpush3.bf16.msra.mxu1 (%p319_p5), %v2038_v57  ;;  %1905 = vmatprep.subr.bf16.mxu0 (%p319_p5), %v2080_v20 }
  0xfb   : > { %1925 = vmatprep.subr.bf16.mxu1 (%p319_p5), %v2080_v20 }
  0xfd   : > { %1906 = vmatpush3.bf16.msra.mxu0 (%p319_p5), %v2039_v60 }
  0xfe   : > { %1907 = vmatprep.subr.bf16.mxu0 (%p319_p5), %v2080_v20 }
 0x112   : >> { %v674_v62 = vpop.f32.mrf.mxu0 }
 0x113   : >> { %v681_v63 = vadd.f32 %v674_v62, %v558_v61  ;;  %v806_v1 = vpop.f32.mrf.mxu1  ;;  %v2040_v61 = vld [vmem:[%s2461_s2 + $0xc8] sm:$0xff] (%p319_p5)   ;;  %v1225_v62 = vshrl.u32 (%p319_p5), %v2044_v55, 16 }
 0x114   : >> { %v1831_v2 = vpop.f32.mrf.mxu0  ;;  %1926 = vmatpush3.bf16.msra.mxu1 (%p319_p5), %v2040_v61 }
 0x115   : >> { %v813_v4 = vadd.f32 %v806_v1, %v681_v63  ;;  %v1851_v5 = vpop.f32.mrf.mxu1  ;;  %v1229_v63 = vrot.slane (%p319_p5), %v1227_v59, 1  ;;  %v1232_v1 = vshll.u32 (%p319_p5), %v2045_v58, 16  ;;  %v2041_v2 = vld [vmem:[%s2461_s2 + $0x80] sm:$0xff] (%p319_p5)   ;;  %1927 = vmatprep.subr.bf16.mxu1 (%p319_p5), %v2080_v20 }
 0x116   : >> { %v677_v6 = vpop.f32.mrf.mxu0  ;;  %1908 = vmatpush3.bf16.msra.mxu0 (%p319_p5), %v2041_v2 }
 0x117   : >> { %v821_v7 = vadd.f32 %v2128_v0, %v813_v4  ;;  %v682_v8 = vadd.f32 %v677_v6, %v561_v3  ;;  %v809_v9 = vpop.f32.mrf.mxu1  ;;  %v2042_v3 = vld [vmem:[%s2461_s2 + $0xc0] sm:$0xff] (%p319_p5)   ;;  %v1230_v4 = vor.u32 (%p319_p5), %v1229_v63, %v1225_v62  ;;  %v1234_v5 = vrot.slane (%p319_p5), %v1232_v1, 1 }
 0x118   : >> { %v1832_v10 = vpop.f32.mrf.mxu0  ;;  %v2043_v6 = vld [vmem:[%s2143_s6] sm:$0xff] (%p319_p5)   ;;  %1928 = vmatpush3.bf16.msra.mxu1 (%p319_p5), %v2042_v3 }
 0x119   : >> { %v814_v11 = vadd.f32 %v809_v9, %v682_v8  ;;  %v1852_v12 = vpop.f32.mrf.mxu1  ;;  %v825_v13 = vmul.f32 0.2, %v821_v7  ;;  %vm823_vm2 = vcmp.ge.f32.partialorder %v821_v7, 0.0  ;;  %1910 = vmatmul.mubr.bf16.vlgmr.msra.gmra.mxu0 (%p319_p5), %v2043_v6 }
 0x11b   : >> { %v822_v14 = vadd.f32 %v2128_v0, %v814_v11  ;;  %v827_v16 = vsel %vm823_vm2, %v821_v7, %v825_v13  ;;  %v1235_v7 = vsel (%p319_p5), %vm371_vm1, %v1230_v4, %v1234_v5 }
 0x11c   : > { %1930 = vmatmul.mubr.bf16.vlgmr.msra.gmra.mxu1 (%p319_p5), %v1235_v7 }
 0x11d   : >> { %vm824_vm3 = vcmp.ge.f32.partialorder %v822_v14, 0.0  ;;  %v826_v15 = vmul.f32 0.2, %v822_v14 }
 0x11e   : > { %321 = sbr.rel (!%p319_p5) target bundleno = 17 (0x11), region = 87 }
 0x11f   : >> { %v828_v17 = vsel %vm824_vm3, %v822_v14, %v826_v15 }
 0x120   : >> { %v1692_v18 = vpack.c.bf16 %v828_v17, %v827_v16 }
 0x122   : >> { %1693 = vst [vmem:[%s839_s22] sm:$0xff] %v1692_v18  }
 0x132   : > { %v983_v8 = vpop.f32.mrf.mxu0 }
 0x133   : > { %v1073_v9 = vpop.f32.mrf.mxu1 }
 0x134   : > { %v1871_v10 = vpop.f32.mrf.mxu0  ;;  %v1074_v16 = vadd.f32 %v1073_v9, %v983_v8 }
 0x135   : > { %v1891_v11 = vpop.f32.mrf.mxu1 }
 0x136   : > { %v986_v12 = vpop.f32.mrf.mxu0 }
 0x137   : > { %v1076_v13 = vpop.f32.mrf.mxu1 }
 0x138   : > { %v1872_v14 = vpop.f32.mrf.mxu0  ;;  %v1077_v21 = vadd.f32 %v1076_v13, %v986_v12 }
 0x139   : > { %v1892_v15 = vpop.f32.mrf.mxu1 }
 0x1d9   : > { %v1187_v17 = vpop.f32.mrf.mxu0 }
 0x1da   : > { %v1194_v18 = vadd.f32 %v1187_v17, %v1074_v16 }
 0x1db   : > { %v1911_v20 = vpop.f32.mrf.mxu0 }
 0x1dc   : > { %v1319_v19 = vpop.f32.mrf.mxu1 }
 0x1dd   : > { %v1326_v22 = vadd.f32 %v1319_v19, %v1194_v18  ;;  %v1190_v24 = vpop.f32.mrf.mxu0 }
 0x1de   : > { %v1931_v23 = vpop.f32.mrf.mxu1  ;;  %v1195_v26 = vadd.f32 %v1190_v24, %v1077_v21 }
 0x1df   : > { %v1334_v25 = vadd.f32 %v2128_v0, %v1326_v22  ;;  %v1912_v28 = vpop.f32.mrf.mxu0 }
 0x1e0   : > { %v1322_v27 = vpop.f32.mrf.mxu1 }
 0x1e1   : > { %v1327_v29 = vadd.f32 %v1322_v27, %v1195_v26  ;;  %v1338_v31 = vmul.f32 0.2, %v1334_v25  ;;  %vm1336_vm5 = vcmp.ge.f32.partialorder %v1334_v25, 0.0 }
 0x1e2   : > { %v1932_v30 = vpop.f32.mrf.mxu1 }
 0x1e3   : > { %v1335_v32 = vadd.f32 %v2128_v0, %v1327_v29  ;;  %v1340_v34 = vsel %vm1336_vm5, %v1334_v25, %v1338_v31 }
 0x1e5   : > { %vm1337_vm6 = vcmp.ge.f32.partialorder %v1335_v32, 0.0  ;;  %v1339_v33 = vmul.f32 0.2, %v1335_v32 }
 0x1e7   : > { %v1341_v35 = vsel %vm1337_vm6, %v1335_v32, %v1339_v33 }
 0x1e8   : > { %v1697_v36 = vpack.c.bf16 %v1341_v35, %v1340_v34 }
 0x1ea   : > { %1699 = vst [vmem:[%s2133_s25 + $0x78] sm:$0xff] %v1697_v36  }
 0x1eb PF: > { %s14_s17 = sadd.s32 1, %s2072_s17   ;;  %s2464_s15 = smov %s2068_s16 }
 0x1ec   : > { %p11_p6 = scmp.ge.s32.totalorder %s14_s17, 4   ;;  %s2465_s16 = smov %s2467_s18 }
 0x1ee   :  { %13 = sbr.rel (!%p11_p6) target bundleno = 2 (0x2), region = 98 }

// kernel: fc_discriminator_forward.6
= control target key start
LH: loop header
LB: loop body
LE: loop exit
PB: predicated region body
PF: predicated region fallthrough
CT: control target
= control target key end

     0   :  { %s1973_s15 = smov 0   ;;  %s1975_s16 = smov 0   ;;  %s2317_s0 = inlined_call_operand.vmem [shape: bf16[2,9,9,128], index: 0, kind: input, shape index: {}, may-alias: {0,1}]   ;;  %s2318_s1 = inlined_call_operand.vmem [shape: bf16[2,9,9,128], index: 1, kind: input, shape index: {}, may-alias: {0,1}]   ;;  %s2319_s2 = inlined_call_operand.vmem [shape: bf16[4,128,128], index: 2, kind: input, shape index: {}]   ;;  %s2320_s3 = inlined_call_operand.vmem [shape: f32[1,128], index: 3, kind: input, shape index: {}]   ;;  %s2321_s4 = inlined_call_operand.vmem [shape: bf16[2,8,8,128], index: 4, kind: output, shape index: {}]  }
   0x1   :  { %s1977_s17 = smov 0  }
   0x2 LB: > { %s26_s18 = sadd.s32 1, %s1934_s16  ;;  %p1387_p0 = scmp.ge.s32.totalorder %s1938_s17, 1  ;;  %s1938_s17 = sphi %s1977_s17, %s14_s17   ;;  %s1934_s16 = sphi %s1975_s16, %s2323_s16   ;;  %s1930_s15 = sphi %s1973_s15, %s2322_s15  }
   0x3   : > { %p28_p1 = scmp.ge.s32.totalorder %s26_s18, 2  ;;  %p218_p2 = scmp.lt.s32.totalorder %s1938_s17, 3 }
   0x5   : > { %s2325_s18 = smov (%p28_p1, %s26_s18), 0  ;;  %p219_p3 = pnand %p1387_p0, %p218_p2 }
   0x6   : > { %p275_p4 = scmp.lt.s32.totalorder (!%p219_p3), %s1930_s15, 1  ;;  %s2011_s7 = smov (!%p219_p3), 0  }
   0x7   : > { %222 = sbr.rel (%p219_p3) target bundleno = 453 (0x1c5), region = 36 }
   0xc   : > { %v1994_v0 = vld [vmem:[%s2320_s3] ss:$0 sm:$0xff]  ;;  %s2327_s15 = smov (!%p275_p4, %s1930_s15), 1 }
   0xd   : > { %s1805_s21 = smul.u32 72, %s2327_s15  ;;  %s1570_s22 = sshll.u32 %s2327_s15, 5 }
   0xe   : > { %s1999_s25 = scalar_lea.vmem %s2321_s4, %s1570_s22 }
   0xf   : > { %s2004_s28 = scalar_lea.vmem %s2317_s0, %s1805_s21  ;;  %s1569_s29 = sadd.s32 64, %s1805_s21 }
  0x10   : > { %s2009_s6 = scalar_lea.vmem %s2318_s1, %s1569_s29 }
  0x11 LB: >> { %v1844_v1 = vld [vmem:[%s2319_s2 + $0x78] sm:$0xff]   ;;  %v1944_v2 = vmov 0.0   ;;  %v1846_v4 = vld [vmem:[%s2319_s2 + $0x70] sm:$0xff]   ;;  %vm1945_vm0 = vmmov 0   ;;  %v1848_v6 = vld [vmem:[%s2319_s2 + $0x68] sm:$0xff]   ;;  %s1571_s26 = sshll.u32 %s1942_s7, 3  ;;  %s1942_s7 = sphi %s2011_s7, %s320_s7  }
  0x12   : >> { %1645 = vmatprep.subr.bf16.mxu0 %v1944_v2  ;;  %1665 = vmatprep.subr.bf16.mxu1 %v1944_v2  ;;  %v1845_v3 = vld [vmem:[%s2319_s2 + $0x38] sm:$0xff]   ;;  %v1847_v5 = vld [vmem:[%s2319_s2 + $0x30] sm:$0xff]   ;;  %v1849_v7 = vld [vmem:[%s2319_s2 + $0x28] sm:$0xff]   ;;  %s2054_s30 = scalar_lea.vmem %s2004_s28, %s1571_s26 }
  0x13   : >> { %1646 = vmatpush3.bf16.msra.mxu0 %v1844_v1  ;;  %1661 = vmatprep.mubr.msk.bf16.mxu0 %vm1945_vm0, %v1944_v2  ;;  %v1850_v8 = vld [vmem:[%s2319_s2 + $0x60] sm:$0xff]   ;;  %v1852_v10 = vld [vmem:[%s2319_s2 + $0x58] sm:$0xff]   ;;  %v1854_v15 = vld [vmem:[%s2319_s2 + $0x50] sm:$0xff]  }
  0x14   : >> { %1666 = vmatpush3.bf16.msra.mxu1 %v1845_v3  ;;  %1647 = vmatprep.subr.bf16.mxu0 %v1944_v2  ;;  %v1851_v9 = vld [vmem:[%s2319_s2 + $0x20] sm:$0xff]   ;;  %v1853_v11 = vld [vmem:[%s2319_s2 + $0x18] sm:$0xff]   ;;  %v1855_v16 = vld [vmem:[%s2319_s2 + $0x10] sm:$0xff]  }
  0x15   : >> { %1667 = vmatprep.subr.bf16.mxu1 %v1944_v2  ;;  %1681 = vmatprep.mubr.msk.bf16.mxu1 %vm1945_vm0, %v1944_v2  ;;  %v325_v12 = vld [vmem:[%s2054_s30] sm:$0xf]  ;;  %v342_v13 = vld [vmem:[%s2054_s30 + $0x4] sm:$0x1]  ;;  %v1856_v18 = vld [vmem:[%s2319_s2 + $0x48] sm:$0xff]  }
  0x16   : >> { %v1410_v14 = vcombine.low %v325_v12, %v342_v13  ;;  %v1857_v19 = vld [vmem:[%s2319_s2 + $0x8] sm:$0xff]   ;;  %v1858_v22 = vld [vmem:[%s2319_s2 + $0x40] sm:$0xff]   ;;  %v1861_v25 = vld [vmem:[%s2319_s2 + $0xb8] sm:$0xff]  }
  0x17   : >> { %1648 = vmatpush3.bf16.msra.mxu0 %v1846_v4  ;;  %v1859_v23 = vld [vmem:[%s2319_s2] sm:$0xff]   ;;  %v1862_v26 = vld [vmem:[%s2319_s2 + $0xf8] sm:$0xff]   ;;  %v1863_v27 = vld [vmem:[%s2319_s2 + $0xb0] sm:$0xff]  }
  0x18   : >> { %1668 = vmatpush3.bf16.msra.mxu1 %v1847_v5  ;;  %1649 = vmatprep.subr.bf16.mxu0 %v1944_v2  ;;  %v368_v17 = vshll.u32 %v1410_v14, 16  ;;  %v366_v20 = vshrl.u32 %v1410_v14, 16  ;;  %v1864_v28 = vld [vmem:[%s2319_s2 + $0xf0] sm:$0xff]   ;;  %v1865_v29 = vld [vmem:[%s2319_s2 + $0xa8] sm:$0xff]   ;;  %v1867_v31 = vld [vmem:[%s2319_s2 + $0xa0] sm:$0xff]  }
  0x19   : >> { %1669 = vmatprep.subr.bf16.mxu1 %v1944_v2  ;;  %v1866_v30 = vld [vmem:[%s2319_s2 + $0xe8] sm:$0xff]   ;;  %v1868_v32 = vld [vmem:[%s2319_s2 + $0xe0] sm:$0xff]   ;;  %v1869_v33 = vld [vmem:[%s2319_s2 + $0x98] sm:$0xff]  }
  0x1a   : >> { %v370_v21 = vrot.slane %v368_v17, 1  ;;  %v1870_v34 = vld [vmem:[%s2319_s2 + $0xd8] sm:$0xff]   ;;  %v1871_v35 = vld [vmem:[%s2319_s2 + $0x90] sm:$0xff]   ;;  %v1877_v36 = vld [vmem:[%s2054_s30 + $0x8] sm:$0x1f]  }
  0x1b   : >> { %1650 = vmatpush3.bf16.msra.mxu0 %v1848_v6  ;;  %v1872_v37 = vld [vmem:[%s2319_s2 + $0xd0] sm:$0xff]   ;;  %v1873_v38 = vld [vmem:[%s2319_s2 + $0x88] sm:$0xff]   ;;  %v686_v39 = vshll.u32 %v1877_v36, 16  ;;  %v1875_v41 = vld [vmem:[%s2319_s2 + $0x80] sm:$0xff]   ;;  %v684_v42 = vshrl.u32 %v1877_v36, 16 }
  0x1c   : >> { %1670 = vmatpush3.bf16.msra.mxu1 %v1849_v7  ;;  %1651 = vmatprep.subr.bf16.mxu0 %v1944_v2  ;;  %v371_v24 = vor.u32 %v370_v21, %v366_v20  ;;  %v1874_v40 = vld [vmem:[%s2319_s2 + $0xc8] sm:$0xff]   ;;  %v1876_v44 = vld [vmem:[%s2319_s2 + $0xc0] sm:$0xff]  }
  0x1d   : >> { %1671 = vmatprep.subr.bf16.mxu1 %v1944_v2  ;;  %v688_v43 = vrot.slane %v686_v39, 1  ;;  %v1428_v45 = vld [vmem:[%s2054_s30 + $0x8] sm:$0xf]  ;;  %s1480_s30 = sshll.u32 %s1942_s7, 2  ;;  %s320_s7 = sadd.s32 1, %s1942_s7  }
  0x1e   : >> { %s792_s22 = scalar_lea.vmem %s1999_s25, %s1480_s30  ;;  %p317_p5 = scmp.ge.s32.totalorder %s320_s7, 7  }
  0x1f   : >> { %1652 = vmatpush3.bf16.msra.mxu0 %v1850_v8  ;;  %v689_v46 = vor.u32 %v688_v43, %v684_v42  ;;  %v1878_v7 = vld [vmem:[%s2319_s2 + $0x78] sm:$0xff] (%p317_p5)   ;;  %v1946_v8 = vmov (%p317_p5), 0.0   ;;  %vm1947_vm2 = vmmov (%p317_p5), 0   ;;  %v1883_v13 = vld [vmem:[%s2319_s2 + $0x28] sm:$0xff] (%p317_p5)   ;;  %v1884_v14 = vld [vmem:[%s2319_s2 + $0x60] sm:$0xff] (%p317_p5)  }
  0x20   : >> { %1672 = vmatpush3.bf16.msra.mxu1 %v1851_v9  ;;  %1653 = vmatprep.subr.bf16.mxu0 %v1944_v2  ;;  %v1879_v9 = vld [vmem:[%s2319_s2 + $0x38] sm:$0xff] (%p317_p5)   ;;  %v1888_v21 = vld [vmem:[%s2319_s2 + $0x50] sm:$0xff] (%p317_p5)   ;;  %v1900_v36 = vld [vmem:[%s2319_s2 + $0xe8] sm:$0xff] (%p317_p5)  }
  0x21   : >> { %1673 = vmatprep.subr.bf16.mxu1 %v1944_v2  ;;  %v1887_v17 = vld [vmem:[%s2319_s2 + $0x18] sm:$0xff] (%p317_p5)   ;;  %v1911_v42 = vld [vmem:[%s2009_s6] sm:$0x1f] (%p317_p5)   ;;  %v1906_v43 = vld [vmem:[%s2319_s2 + $0xd0] sm:$0xff] (%p317_p5)  }
  0x22   : > { %v1903_v39 = vld [vmem:[%s2319_s2 + $0x98] sm:$0xff] (%p317_p5)  }
  0x23   : >> { %1654 = vmatpush3.bf16.msra.mxu0 %v1852_v10  ;;  %v1880_v10 = vld [vmem:[%s2319_s2 + $0x70] sm:$0xff] (%p317_p5)  }
  0x24   : >> { %1674 = vmatpush3.bf16.msra.mxu1 %v1853_v11  ;;  %1655 = vmatprep.subr.bf16.mxu0 %v1944_v2  ;;  %v1881_v11 = vld [vmem:[%s2319_s2 + $0x30] sm:$0xff] (%p317_p5)  }
  0x25   : >> { %1675 = vmatprep.subr.bf16.mxu1 %v1944_v2 }
  0x27   : >> { %1656 = vmatpush3.bf16.msra.mxu0 %v1854_v15  ;;  %v1885_v15 = vld [vmem:[%s2319_s2 + $0x20] sm:$0xff] (%p317_p5)  }
  0x28   : >> { %1676 = vmatpush3.bf16.msra.mxu1 %v1855_v16  ;;  %1657 = vmatprep.subr.bf16.mxu0 %v1944_v2  ;;  %v1886_v16 = vld [vmem:[%s2319_s2 + $0x58] sm:$0xff] (%p317_p5)  }
  0x29   : >> { %1677 = vmatprep.subr.bf16.mxu1 %v1944_v2 }
  0x2b   : >> { %1658 = vmatpush3.bf16.msra.mxu0 %v1856_v18  ;;  %v1481_v18 = vld [vmem:[%s2004_s28 + $0x38] sm:$0xf] (%p317_p5) }
  0x2c   : >> { %1678 = vmatpush3.bf16.msra.mxu1 %v1857_v19  ;;  %1659 = vmatprep.subr.bf16.mxu0 %v1944_v2  ;;  %v1482_v19 = vld [vmem:[%s2004_s28 + $0x3c] sm:$0x1] (%p317_p5) }
  0x2d   : >> { %1679 = vmatprep.subr.bf16.mxu1 %v1944_v2  ;;  %v1499_v20 = vcombine.low (%p317_p5), %v1481_v18, %v1482_v19 }
  0x2f   : >> { %1660 = vmatpush3.bf16.msra.mxu0 %v1858_v22  ;;  %v1889_v22 = vld [vmem:[%s2319_s2 + $0x10] sm:$0xff] (%p317_p5)  }
  0x30   : >> { %1680 = vmatpush3.bf16.msra.mxu1 %v1859_v23  ;;  %1685 = vmatprep.subr.bf16.mxu0 %v1944_v2  ;;  %v838_v23 = vshll.u32 (%p317_p5), %v1499_v20, 16 }
  0x31   : >> { %1705 = vmatprep.subr.bf16.mxu1 %v1944_v2 }
  0x32   : >> { %1662 = vmatmul.mubr.bf16.vlgmr.msra.gmra.mxu0 %v371_v24  ;;  %v1890_v24 = vld [vmem:[%s2319_s2 + $0x48] sm:$0xff] (%p317_p5)  }
  0x33   : >> { %1682 = vmatmul.mubr.bf16.vlgmr.msra.gmra.mxu1 %v325_v12  ;;  %1686 = vmatpush3.bf16.msra.mxu0 %v1861_v25  ;;  %v1882_v12 = vld [vmem:[%s2319_s2 + $0x68] sm:$0xff] (%p317_p5)  }
  0x34   : >> { %1706 = vmatpush3.bf16.msra.mxu1 %v1862_v26  ;;  %1687 = vmatprep.subr.bf16.mxu0 %v1944_v2  ;;  %v1891_v25 = vld [vmem:[%s2319_s2 + $0x8] sm:$0xff] (%p317_p5)   ;;  %v836_v26 = vshrl.u32 (%p317_p5), %v1499_v20, 16 }
  0x35   : >> { %1707 = vmatprep.subr.bf16.mxu1 %v1944_v2  ;;  %1701 = vmatprep.mubr.msk.bf16.mxu0 %vm1945_vm0, %v1944_v2 }
  0x36   : >> { %1721 = vmatprep.mubr.msk.bf16.mxu1 %vm1945_vm0, %v1944_v2 }
  0x37   : >> { %1688 = vmatpush3.bf16.msra.mxu0 %v1863_v27  ;;  %v840_v27 = vrot.slane (%p317_p5), %v838_v23, 1 }
  0x38   : >> { %1708 = vmatpush3.bf16.msra.mxu1 %v1864_v28  ;;  %1689 = vmatprep.subr.bf16.mxu0 %v1944_v2  ;;  %v1892_v28 = vld [vmem:[%s2319_s2 + $0x40] sm:$0xff] (%p317_p5)  }
  0x39   : >> { %1709 = vmatprep.subr.bf16.mxu1 %v1944_v2 }
  0x3b   : >> { %1690 = vmatpush3.bf16.msra.mxu0 %v1865_v29  ;;  %v1893_v29 = vld [vmem:[%s2319_s2] sm:$0xff] (%p317_p5)  }
  0x3c   : >> { %1710 = vmatpush3.bf16.msra.mxu1 %v1866_v30  ;;  %1691 = vmatprep.subr.bf16.mxu0 %v1944_v2  ;;  %v841_v30 = vor.u32 (%p317_p5), %v840_v27, %v836_v26 }
  0x3d   : >> { %1711 = vmatprep.subr.bf16.mxu1 %v1944_v2 }
  0x3f   : >> { %1692 = vmatpush3.bf16.msra.mxu0 %v1867_v31  ;;  %v1895_v31 = vld [vmem:[%s2319_s2 + $0xb8] sm:$0xff] (%p317_p5)  }
  0x40   : >> { %1712 = vmatpush3.bf16.msra.mxu1 %v1868_v32  ;;  %1693 = vmatprep.subr.bf16.mxu0 %v1944_v2  ;;  %v1896_v32 = vld [vmem:[%s2319_s2 + $0xf8] sm:$0xff] (%p317_p5)  }
  0x41   : >> { %1713 = vmatprep.subr.bf16.mxu1 %v1944_v2 }
  0x43   : >> { %1694 = vmatpush3.bf16.msra.mxu0 %v1869_v33  ;;  %v1897_v33 = vld [vmem:[%s2319_s2 + $0xb0] sm:$0xff] (%p317_p5)  }
  0x44   : >> { %1714 = vmatpush3.bf16.msra.mxu1 %v1870_v34  ;;  %1695 = vmatprep.subr.bf16.mxu0 %v1944_v2  ;;  %v1898_v34 = vld [vmem:[%s2319_s2 + $0xf0] sm:$0xff] (%p317_p5)  }
  0x45   : >> { %1715 = vmatprep.subr.bf16.mxu1 %v1944_v2 }
  0x47   : >> { %1696 = vmatpush3.bf16.msra.mxu0 %v1871_v35  ;;  %v1899_v35 = vld [vmem:[%s2319_s2 + $0xa8] sm:$0xff] (%p317_p5)  }
  0x48   : >> { %1716 = vmatpush3.bf16.msra.mxu1 %v1872_v37  ;;  %1697 = vmatprep.subr.bf16.mxu0 %v1944_v2  ;;  %v1901_v37 = vld [vmem:[%s2319_s2 + $0xa0] sm:$0xff] (%p317_p5)  }
  0x49   : >> { %1717 = vmatprep.subr.bf16.mxu1 %v1944_v2 }
  0x4b   : >> { %1698 = vmatpush3.bf16.msra.mxu0 %v1873_v38  ;;  %v1902_v38 = vld [vmem:[%s2319_s2 + $0xe0] sm:$0xff] (%p317_p5)  }
  0x4c   : >> { %1718 = vmatpush3.bf16.msra.mxu1 %v1874_v40  ;;  %1699 = vmatprep.subr.bf16.mxu0 %v1944_v2  ;;  %v1904_v40 = vld [vmem:[%s2319_s2 + $0xd8] sm:$0xff] (%p317_p5)  }
  0x4d   : >> { %1719 = vmatprep.subr.bf16.mxu1 %v1944_v2 }
  0x4f   : >> { %1700 = vmatpush3.bf16.msra.mxu0 %v1875_v41  ;;  %v1905_v41 = vld [vmem:[%s2319_s2 + $0x90] sm:$0xff] (%p317_p5)  }
  0x50   : >> { %1720 = vmatpush3.bf16.msra.mxu1 %v1876_v44  ;;  %1725 = vmatprep.subr.bf16.mxu0 (%p317_p5), %v1946_v8  ;;  %v1907_v44 = vld [vmem:[%s2319_s2 + $0x88] sm:$0xff] (%p317_p5)  }
  0x51   : > { %1745 = vmatprep.subr.bf16.mxu1 (%p317_p5), %v1946_v8 }
  0x52   : >> { %1702 = vmatmul.mubr.bf16.vlgmr.msra.gmra.mxu0 %v1428_v45  ;;  %v1153_v45 = vshll.u32 (%p317_p5), %v1911_v42, 16 }
  0x53   : >> { %1722 = vmatmul.mubr.bf16.vlgmr.msra.gmra.mxu1 %v689_v46  ;;  %1726 = vmatpush3.bf16.msra.mxu0 (%p317_p5), %v1878_v7  ;;  %v1908_v46 = vld [vmem:[%s2319_s2 + $0xc8] sm:$0xff] (%p317_p5)  }
  0x54   : > { %1741 = vmatprep.mubr.msk.bf16.mxu0 (%p317_p5), %vm1947_vm2, %v1946_v8  ;;  %1746 = vmatpush3.bf16.msra.mxu1 (%p317_p5), %v1879_v9 }
  0x55   : > { %1727 = vmatprep.subr.bf16.mxu0 (%p317_p5), %v1946_v8  ;;  %1747 = vmatprep.subr.bf16.mxu1 (%p317_p5), %v1946_v8 }
  0x56   : > { %1761 = vmatprep.mubr.msk.bf16.mxu1 (%p317_p5), %vm1947_vm2, %v1946_v8 }
  0x57   : > { %1728 = vmatpush3.bf16.msra.mxu0 (%p317_p5), %v1880_v10 }
  0x58   : > { %1748 = vmatpush3.bf16.msra.mxu1 (%p317_p5), %v1881_v11  ;;  %1729 = vmatprep.subr.bf16.mxu0 (%p317_p5), %v1946_v8 }
  0x59   : > { %1749 = vmatprep.subr.bf16.mxu1 (%p317_p5), %v1946_v8 }
  0x5b   : > { %1730 = vmatpush3.bf16.msra.mxu0 (%p317_p5), %v1882_v12 }
  0x5c   : > { %1750 = vmatpush3.bf16.msra.mxu1 (%p317_p5), %v1883_v13  ;;  %1731 = vmatprep.subr.bf16.mxu0 (%p317_p5), %v1946_v8 }
  0x5d   : > { %1751 = vmatprep.subr.bf16.mxu1 (%p317_p5), %v1946_v8 }
  0x5f   : > { %1732 = vmatpush3.bf16.msra.mxu0 (%p317_p5), %v1884_v14 }
  0x60   : > { %1752 = vmatpush3.bf16.msra.mxu1 (%p317_p5), %v1885_v15  ;;  %1733 = vmatprep.subr.bf16.mxu0 (%p317_p5), %v1946_v8 }
  0x61   : > { %1753 = vmatprep.subr.bf16.mxu1 (%p317_p5), %v1946_v8 }
  0x63   : > { %1734 = vmatpush3.bf16.msra.mxu0 (%p317_p5), %v1886_v16 }
  0x64   : > { %1754 = vmatpush3.bf16.msra.mxu1 (%p317_p5), %v1887_v17  ;;  %1735 = vmatprep.subr.bf16.mxu0 (%p317_p5), %v1946_v8 }
  0x65   : > { %1755 = vmatprep.subr.bf16.mxu1 (%p317_p5), %v1946_v8 }
  0x67   : > { %1736 = vmatpush3.bf16.msra.mxu0 (%p317_p5), %v1888_v21 }
  0x68   : > { %1756 = vmatpush3.bf16.msra.mxu1 (%p317_p5), %v1889_v22  ;;  %1737 = vmatprep.subr.bf16.mxu0 (%p317_p5), %v1946_v8 }
  0x69   : > { %1757 = vmatprep.subr.bf16.mxu1 (%p317_p5), %v1946_v8 }
  0x6b   : > { %1738 = vmatpush3.bf16.msra.mxu0 (%p317_p5), %v1890_v24 }
  0x6c   : > { %1758 = vmatpush3.bf16.msra.mxu1 (%p317_p5), %v1891_v25  ;;  %1739 = vmatprep.subr.bf16.mxu0 (%p317_p5), %v1946_v8 }
  0x6d   : > { %1759 = vmatprep.subr.bf16.mxu1 (%p317_p5), %v1946_v8 }
  0x6f   : > { %1740 = vmatpush3.bf16.msra.mxu0 (%p317_p5), %v1892_v28 }
  0x70   : > { %1760 = vmatpush3.bf16.msra.mxu1 (%p317_p5), %v1893_v29  ;;  %1765 = vmatprep.subr.bf16.mxu0 (%p317_p5), %v1946_v8 }
  0x71   : > { %1785 = vmatprep.subr.bf16.mxu1 (%p317_p5), %v1946_v8 }
  0x72   : > { %1742 = vmatmul.mubr.bf16.vlgmr.msra.gmra.mxu0 (%p317_p5), %v841_v30 }
  0x73   : > { %1762 = vmatmul.mubr.bf16.vlgmr.msra.gmra.mxu1 (%p317_p5), %v1481_v18  ;;  %1766 = vmatpush3.bf16.msra.mxu0 (%p317_p5), %v1895_v31 }
  0x74   : > { %1786 = vmatpush3.bf16.msra.mxu1 (%p317_p5), %v1896_v32  ;;  %1767 = vmatprep.subr.bf16.mxu0 (%p317_p5), %v1946_v8 }
  0x75   : > { %1787 = vmatprep.subr.bf16.mxu1 (%p317_p5), %v1946_v8  ;;  %1781 = vmatprep.mubr.msk.bf16.mxu0 (%p317_p5), %vm1947_vm2, %v1946_v8 }
  0x76   : > { %1801 = vmatprep.mubr.msk.bf16.mxu1 (%p317_p5), %vm1947_vm2, %v1946_v8 }
  0x77   : > { %1768 = vmatpush3.bf16.msra.mxu0 (%p317_p5), %v1897_v33 }
  0x78   : > { %1788 = vmatpush3.bf16.msra.mxu1 (%p317_p5), %v1898_v34  ;;  %1769 = vmatprep.subr.bf16.mxu0 (%p317_p5), %v1946_v8 }
  0x79   : > { %1789 = vmatprep.subr.bf16.mxu1 (%p317_p5), %v1946_v8 }
  0x7b   : > { %1770 = vmatpush3.bf16.msra.mxu0 (%p317_p5), %v1899_v35 }
  0x7c   : > { %1790 = vmatpush3.bf16.msra.mxu1 (%p317_p5), %v1900_v36  ;;  %1771 = vmatprep.subr.bf16.mxu0 (%p317_p5), %v1946_v8 }
  0x7d   : > { %1791 = vmatprep.subr.bf16.mxu1 (%p317_p5), %v1946_v8 }
  0x7f   : > { %1772 = vmatpush3.bf16.msra.mxu0 (%p317_p5), %v1901_v37 }
  0x80   : > { %1792 = vmatpush3.bf16.msra.mxu1 (%p317_p5), %v1902_v38  ;;  %1773 = vmatprep.subr.bf16.mxu0 (%p317_p5), %v1946_v8 }
  0x81   : > { %1793 = vmatprep.subr.bf16.mxu1 (%p317_p5), %v1946_v8 }
  0x83   : > { %1774 = vmatpush3.bf16.msra.mxu0 (%p317_p5), %v1903_v39 }
  0x84   : > { %1794 = vmatpush3.bf16.msra.mxu1 (%p317_p5), %v1904_v40  ;;  %1775 = vmatprep.subr.bf16.mxu0 (%p317_p5), %v1946_v8 }
  0x85   : > { %1795 = vmatprep.subr.bf16.mxu1 (%p317_p5), %v1946_v8 }
  0x87   : > { %1776 = vmatpush3.bf16.msra.mxu0 (%p317_p5), %v1905_v41 }
  0x88   : > { %1796 = vmatpush3.bf16.msra.mxu1 (%p317_p5), %v1906_v43  ;;  %1777 = vmatprep.subr.bf16.mxu0 (%p317_p5), %v1946_v8 }
  0x89   : > { %1797 = vmatprep.subr.bf16.mxu1 (%p317_p5), %v1946_v8 }
  0x8b   : > { %1778 = vmatpush3.bf16.msra.mxu0 (%p317_p5), %v1907_v44 }
  0x8c   : > { %1798 = vmatpush3.bf16.msra.mxu1 (%p317_p5), %v1908_v46  ;;  %1779 = vmatprep.subr.bf16.mxu0 (%p317_p5), %v1946_v8 }
  0x8d   : > { %1799 = vmatprep.subr.bf16.mxu1 (%p317_p5), %v1946_v8 }
  0xf2   : >> { %v455_v47 = vpop.f32.mrf.mxu0 }
  0xf3   : >> { %v543_v48 = vpop.f32.mrf.mxu1 }
  0xf4   : >> { %v1663_v49 = vpop.f32.mrf.mxu0  ;;  %v544_v55 = vadd.f32 %v543_v48, %v455_v47  ;;  %v1909_v47 = vld [vmem:[%s2319_s2 + $0x80] sm:$0xff] (%p317_p5)   ;;  %v1151_v48 = vshrl.u32 (%p317_p5), %v1911_v42, 16 }
  0xf5   : >> { %v1683_v50 = vpop.f32.mrf.mxu1  ;;  %v1155_v49 = vrot.slane (%p317_p5), %v1153_v45, 1  ;;  %1780 = vmatpush3.bf16.msra.mxu0 (%p317_p5), %v1909_v47 }
  0xf6   : >> { %v458_v51 = vpop.f32.mrf.mxu0  ;;  %v1910_v50 = vld [vmem:[%s2319_s2 + $0xc0] sm:$0xff] (%p317_p5)  }
  0xf7   : >> { %v546_v52 = vpop.f32.mrf.mxu1  ;;  %v1019_v51 = vld [vmem:[%s2009_s6] sm:$0xf] (%p317_p5)  ;;  %1800 = vmatpush3.bf16.msra.mxu1 (%p317_p5), %v1910_v50 }
  0xf8   : >> { %v1664_v53 = vpop.f32.mrf.mxu0  ;;  %v1156_v52 = vor.u32 (%p317_p5), %v1155_v49, %v1151_v48  ;;  %1782 = vmatmul.mubr.bf16.vlgmr.msra.gmra.mxu0 (%p317_p5), %v1019_v51 }
  0xf9   : >> { %v1684_v54 = vpop.f32.mrf.mxu1 }
  0xfa   : > { %1802 = vmatmul.mubr.bf16.vlgmr.msra.gmra.mxu1 (%p317_p5), %v1156_v52 }
 0x112   : >> { %v652_v56 = vpop.f32.mrf.mxu0 }
 0x113   : >> { %v658_v57 = vadd.f32 %v652_v56, %v544_v55  ;;  %v773_v58 = vpop.f32.mrf.mxu1 }
 0x114   : >> { %v1703_v59 = vpop.f32.mrf.mxu0 }
 0x115   : >> { %v779_v60 = vadd.f32 %v773_v58, %v658_v57  ;;  %v1723_v61 = vpop.f32.mrf.mxu1 }
 0x116   : >> { %v655_v62 = vpop.f32.mrf.mxu0 }
 0x117   : >> { %v786_v63 = vadd.f32 %v1994_v0, %v779_v60  ;;  %v776_v1 = vpop.f32.mrf.mxu1 }
 0x118   : >> { %v1704_v2 = vpop.f32.mrf.mxu0 }
 0x119   : >> { %vm787_vm1 = vcmp.ge.f32.partialorder %v786_v63, 0.0  ;;  %v788_v3 = vmul.f32 0.2, %v786_v63  ;;  %v1724_v4 = vpop.f32.mrf.mxu1 }
 0x11a   : > { %319 = sbr.rel (!%p317_p5) target bundleno = 17 (0x11), region = 87 }
 0x11b   : >> { %v789_v5 = vsel %vm787_vm1, %v786_v63, %v788_v3 }
 0x11c   : >> { %v790_v6 = vpack.c.bf16 %v789_v5, %v789_v5 }
 0x11e   : >> { %793 = vst [vmem:[%s792_s22] sm:$0xf] %v790_v6 }
 0x132   : > { %v925_v53 = vpop.f32.mrf.mxu0 }
 0x133   : > { %v1013_v54 = vpop.f32.mrf.mxu1 }
 0x134   : > { %v1743_v55 = vpop.f32.mrf.mxu0  ;;  %v1014_v61 = vadd.f32 %v1013_v54, %v925_v53 }
 0x135   : > { %v1763_v56 = vpop.f32.mrf.mxu1 }
 0x136   : > { %v928_v57 = vpop.f32.mrf.mxu0 }
 0x137   : > { %v1016_v58 = vpop.f32.mrf.mxu1 }
 0x138   : > { %v1744_v59 = vpop.f32.mrf.mxu0 }
 0x139   : > { %v1764_v60 = vpop.f32.mrf.mxu1 }
 0x1b8   : > { %v1119_v62 = vpop.f32.mrf.mxu0 }
 0x1b9   : > { %v1125_v63 = vadd.f32 %v1119_v62, %v1014_v61 }
 0x1ba   : > { %v1240_v1 = vpop.f32.mrf.mxu1  ;;  %v1783_v2 = vpop.f32.mrf.mxu0 }
 0x1bb   : > { %v1246_v3 = vadd.f32 %v1240_v1, %v1125_v63 }
 0x1bc   : > { %v1803_v4 = vpop.f32.mrf.mxu1  ;;  %v1122_v5 = vpop.f32.mrf.mxu0 }
 0x1bd   : > { %v1253_v6 = vadd.f32 %v1994_v0, %v1246_v3 }
 0x1be   : > { %v1243_v7 = vpop.f32.mrf.mxu1  ;;  %v1784_v8 = vpop.f32.mrf.mxu0 }
 0x1bf   : > { %vm1254_vm3 = vcmp.ge.f32.partialorder %v1253_v6, 0.0  ;;  %v1255_v9 = vmul.f32 0.2, %v1253_v6 }
 0x1c0   : > { %v1804_v10 = vpop.f32.mrf.mxu1 }
 0x1c1   : > { %v1256_v11 = vsel %vm1254_vm3, %v1253_v6, %v1255_v9 }
 0x1c2   : > { %v1257_v12 = vpack.c.bf16 %v1256_v11, %v1256_v11 }
 0x1c4   : > { %1565 = vst [vmem:[%s1999_s25 + $0x1c] sm:$0xf] %v1257_v12 }
 0x1c5 PF: > { %s14_s17 = sadd.s32 1, %s1938_s17   ;;  %s2322_s15 = smov %s1934_s16 }
 0x1c6   : > { %p11_p6 = scmp.ge.s32.totalorder %s14_s17, 4   ;;  %s2323_s16 = smov %s2325_s18 }
 0x1c8   :  { %13 = sbr.rel (!%p11_p6) target bundleno = 2 (0x2), region = 98 }

// kernel: fc_discriminator_forward.7
= control target key start
LH: loop header
LB: loop body
LE: loop exit
PB: predicated region body
PF: predicated region fallthrough
CT: control target
= control target key end

     0   :  { %s1941_s15 = smov 0   ;;  %s1943_s16 = smov 0   ;;  %s2285_s0 = inlined_call_operand.vmem [shape: bf16[2,5,5,128], index: 0, kind: input, shape index: {}, may-alias: {0,1}]   ;;  %s2286_s1 = inlined_call_operand.vmem [shape: bf16[2,5,5,128], index: 1, kind: input, shape index: {}, may-alias: {0,1}]   ;;  %s2287_s2 = inlined_call_operand.vmem [shape: bf16[4,128,128], index: 2, kind: input, shape index: {}]   ;;  %s2288_s3 = inlined_call_operand.vmem [shape: f32[1,128], index: 3, kind: input, shape index: {}]   ;;  %s2289_s4 = inlined_call_operand.vmem [shape: bf16[2,4,4,128], index: 4, kind: output, shape index: {}]  }
   0x1   :  { %s1945_s17 = smov 0  }
   0x2 LB: > { %s26_s18 = sadd.s32 1, %s1902_s16  ;;  %p1358_p0 = scmp.ge.s32.totalorder %s1906_s17, 1  ;;  %s1906_s17 = sphi %s1945_s17, %s14_s17   ;;  %s1902_s16 = sphi %s1943_s16, %s2291_s16   ;;  %s1898_s15 = sphi %s1941_s15, %s2290_s15  }
   0x3   : > { %p28_p1 = scmp.ge.s32.totalorder %s26_s18, 2  ;;  %p214_p2 = scmp.lt.s32.totalorder %s1906_s17, 3 }
   0x5   : > { %s2293_s18 = smov (%p28_p1, %s26_s18), 0  ;;  %p215_p3 = pnand %p1358_p0, %p214_p2 }
   0x6   : > { %p267_p4 = scmp.lt.s32.totalorder (!%p215_p3), %s1898_s15, 1  ;;  %s1979_s7 = smov (!%p215_p3), 0  }
   0x7   : > { %218 = sbr.rel (%p215_p3) target bundleno = 452 (0x1c4), region = 36 }
   0xc   : > { %v1962_v0 = vld [vmem:[%s2288_s3] ss:$0 sm:$0xff]  ;;  %s2295_s15 = smov (!%p267_p4, %s1898_s15), 1 }
   0xd   : > { %s1773_s21 = smul.u32 20, %s2295_s15  ;;  %s1539_s22 = sshll.u32 %s2295_s15, 3 }
   0xe   : > { %s1967_s25 = scalar_lea.vmem %s2289_s4, %s1539_s22 }
   0xf   : > { %s1972_s28 = scalar_lea.vmem %s2285_s0, %s1773_s21  ;;  %s1538_s29 = sadd.s32 16, %s1773_s21 }
  0x10   : > { %s1977_s6 = scalar_lea.vmem %s2286_s1, %s1538_s29 }
  0x11 LB: >> { %v1812_v1 = vld [vmem:[%s2287_s2 + $0x78] sm:$0xff]   ;;  %v1912_v2 = vmov 0.0   ;;  %v1814_v4 = vld [vmem:[%s2287_s2 + $0x70] sm:$0xff]   ;;  %vm1913_vm0 = vmmov 0   ;;  %v1816_v6 = vld [vmem:[%s2287_s2 + $0x68] sm:$0xff]   ;;  %s1363_s26 = sshll.u32 %s1910_s7, 2  ;;  %s1910_s7 = sphi %s1979_s7, %s309_s7  }
  0x12   : >> { %1613 = vmatprep.subr.bf16.mxu0 %v1912_v2  ;;  %1633 = vmatprep.subr.bf16.mxu1 %v1912_v2  ;;  %v1813_v3 = vld [vmem:[%s2287_s2 + $0x38] sm:$0xff]   ;;  %v1815_v5 = vld [vmem:[%s2287_s2 + $0x30] sm:$0xff]   ;;  %v1817_v7 = vld [vmem:[%s2287_s2 + $0x28] sm:$0xff]   ;;  %s2022_s30 = scalar_lea.vmem %s1972_s28, %s1363_s26 }
  0x13   : >> { %1614 = vmatpush3.bf16.msra.mxu0 %v1812_v1  ;;  %1629 = vmatprep.mubr.msk.bf16.mxu0 %vm1913_vm0, %v1912_v2  ;;  %v1818_v8 = vld [vmem:[%s2287_s2 + $0x60] sm:$0xff]   ;;  %v1820_v10 = vld [vmem:[%s2287_s2 + $0x58] sm:$0xff]   ;;  %v1822_v13 = vld [vmem:[%s2287_s2 + $0x50] sm:$0xff]  }
  0x14   : >> { %1634 = vmatpush3.bf16.msra.mxu1 %v1813_v3  ;;  %1615 = vmatprep.subr.bf16.mxu0 %v1912_v2  ;;  %v1819_v9 = vld [vmem:[%s2287_s2 + $0x20] sm:$0xff]   ;;  %v1821_v11 = vld [vmem:[%s2287_s2 + $0x18] sm:$0xff]   ;;  %v1823_v14 = vld [vmem:[%s2287_s2 + $0x10] sm:$0xff]  }
  0x15   : >> { %1635 = vmatprep.subr.bf16.mxu1 %v1912_v2  ;;  %1649 = vmatprep.mubr.msk.bf16.mxu1 %vm1913_vm0, %v1912_v2  ;;  %v1828_v12 = vld [vmem:[%s2022_s30] ss:$0 sps:$4 sm:$0x77]   ;;  %v1824_v16 = vld [vmem:[%s2287_s2 + $0x48] sm:$0xff]   ;;  %v1829_v23 = vld [vmem:[%s2287_s2 + $0xb8] sm:$0xff]  }
  0x16   : >> { %v354_v15 = vshll.u32 %v1828_v12, 16  ;;  %v1825_v17 = vld [vmem:[%s2287_s2 + $0x8] sm:$0xff]   ;;  %v352_v18 = vshrl.u32 %v1828_v12, 16  ;;  %v1826_v20 = vld [vmem:[%s2287_s2 + $0x40] sm:$0xff]   ;;  %v1830_v25 = vld [vmem:[%s2287_s2 + $0xf8] sm:$0xff]  }
  0x17   : >> { %1616 = vmatpush3.bf16.msra.mxu0 %v1814_v4  ;;  %v1827_v21 = vld [vmem:[%s2287_s2] sm:$0xff]   ;;  %v1831_v26 = vld [vmem:[%s2287_s2 + $0xb0] sm:$0xff]   ;;  %v1833_v28 = vld [vmem:[%s2287_s2 + $0xa8] sm:$0xff]  }
  0x18   : >> { %1636 = vmatpush3.bf16.msra.mxu1 %v1815_v5  ;;  %1617 = vmatprep.subr.bf16.mxu0 %v1912_v2  ;;  %v356_v19 = vrot.slane %v354_v15, 1  ;;  %v313_v24 = vld [vmem:[%s2022_s30] sm:$0x3]  ;;  %v1832_v27 = vld [vmem:[%s2287_s2 + $0xf0] sm:$0xff]   ;;  %v1834_v29 = vld [vmem:[%s2287_s2 + $0xe8] sm:$0xff]  }
  0x19   : >> { %1637 = vmatprep.subr.bf16.mxu1 %v1912_v2  ;;  %v1835_v30 = vld [vmem:[%s2287_s2 + $0xa0] sm:$0xff]   ;;  %v1837_v32 = vld [vmem:[%s2287_s2 + $0x98] sm:$0xff]   ;;  %v1839_v34 = vld [vmem:[%s2287_s2 + $0x90] sm:$0xff]  }
  0x1a   : >> { %v357_v22 = vor.u32 %v356_v19, %v352_v18  ;;  %v1836_v31 = vld [vmem:[%s2287_s2 + $0xe0] sm:$0xff]   ;;  %v1838_v33 = vld [vmem:[%s2287_s2 + $0xd8] sm:$0xff]   ;;  %v1840_v36 = vld [vmem:[%s2287_s2 + $0xd0] sm:$0xff]  }
  0x1b   : >> { %1618 = vmatpush3.bf16.msra.mxu0 %v1816_v6  ;;  %v1845_v35 = vld [vmem:[%s2022_s30 + $0x4] ss:$0 sps:$4 sm:$0x77]   ;;  %v1841_v37 = vld [vmem:[%s2287_s2 + $0x88] sm:$0xff]  }
  0x1c   : >> { %1638 = vmatpush3.bf16.msra.mxu1 %v1817_v7  ;;  %1619 = vmatprep.subr.bf16.mxu0 %v1912_v2  ;;  %v668_v38 = vshll.u32 %v1845_v35, 16  ;;  %v1842_v39 = vld [vmem:[%s2287_s2 + $0xc8] sm:$0xff]   ;;  %v1843_v40 = vld [vmem:[%s2287_s2 + $0x80] sm:$0xff]   ;;  %v666_v41 = vshrl.u32 %v1845_v35, 16 }
  0x1d   : >> { %1639 = vmatprep.subr.bf16.mxu1 %v1912_v2  ;;  %v1844_v43 = vld [vmem:[%s2287_s2 + $0xc0] sm:$0xff]  }
  0x1e   : >> { %v670_v42 = vrot.slane %v668_v38, 1  ;;  %v1398_v44 = vld [vmem:[%s2022_s30 + $0x4] sm:$0x3]  ;;  %s1449_s30 = sshll.u32 %s1910_s7, 1  ;;  %s309_s7 = sadd.s32 1, %s1910_s7  }
  0x1f   : >> { %1620 = vmatpush3.bf16.msra.mxu0 %v1818_v8  ;;  %s774_s22 = scalar_lea.vmem %s1967_s25, %s1449_s30  ;;  %p306_p5 = scmp.ge.s32.totalorder %s309_s7, 3  }
  0x20   : >> { %1640 = vmatpush3.bf16.msra.mxu1 %v1819_v9  ;;  %1621 = vmatprep.subr.bf16.mxu0 %v1912_v2  ;;  %v671_v45 = vor.u32 %v670_v42, %v666_v41  ;;  %v1846_v6 = vld [vmem:[%s2287_s2 + $0x78] sm:$0xff] (%p306_p5)   ;;  %v1914_v7 = vmov (%p306_p5), 0.0   ;;  %v1848_v9 = vld [vmem:[%s2287_s2 + $0x70] sm:$0xff] (%p306_p5)   ;;  %vm1915_vm2 = vmmov (%p306_p5), 0   ;;  %v1851_v12 = vld [vmem:[%s2287_s2 + $0x28] sm:$0xff] (%p306_p5)  }
  0x21   : >> { %1641 = vmatprep.subr.bf16.mxu1 %v1912_v2  ;;  %v1847_v8 = vld [vmem:[%s2287_s2 + $0x38] sm:$0xff] (%p306_p5)   ;;  %v1856_v18 = vld [vmem:[%s2287_s2 + $0x50] sm:$0xff] (%p306_p5)   ;;  %v1869_v35 = vld [vmem:[%s2287_s2 + $0xa0] sm:$0xff] (%p306_p5)  }
  0x22   : > { %v1854_v15 = vld [vmem:[%s2287_s2 + $0x58] sm:$0xff] (%p306_p5)   ;;  %v1857_v19 = vld [vmem:[%s2287_s2 + $0x10] sm:$0xff] (%p306_p5)   ;;  %v1875_v42 = vld [vmem:[%s2287_s2 + $0x88] sm:$0xff] (%p306_p5)  }
  0x23   : >> { %1622 = vmatpush3.bf16.msra.mxu0 %v1820_v10  ;;  %v1849_v10 = vld [vmem:[%s2287_s2 + $0x30] sm:$0xff] (%p306_p5)   ;;  %v1872_v38 = vld [vmem:[%s2287_s2 + $0xd8] sm:$0xff] (%p306_p5)  }
  0x24   : >> { %1642 = vmatpush3.bf16.msra.mxu1 %v1821_v11  ;;  %1623 = vmatprep.subr.bf16.mxu0 %v1912_v2  ;;  %v1850_v11 = vld [vmem:[%s2287_s2 + $0x68] sm:$0xff] (%p306_p5)   ;;  %v1874_v41 = vld [vmem:[%s2287_s2 + $0xd0] sm:$0xff] (%p306_p5)  }
  0x25   : >> { %1643 = vmatprep.subr.bf16.mxu1 %v1912_v2 }
  0x27   : >> { %1624 = vmatpush3.bf16.msra.mxu0 %v1822_v13  ;;  %v1852_v13 = vld [vmem:[%s2287_s2 + $0x60] sm:$0xff] (%p306_p5)  }
  0x28   : >> { %1644 = vmatpush3.bf16.msra.mxu1 %v1823_v14  ;;  %1625 = vmatprep.subr.bf16.mxu0 %v1912_v2  ;;  %v1853_v14 = vld [vmem:[%s2287_s2 + $0x20] sm:$0xff] (%p306_p5)  }
  0x29   : >> { %1645 = vmatprep.subr.bf16.mxu1 %v1912_v2 }
  0x2b   : >> { %1626 = vmatpush3.bf16.msra.mxu0 %v1824_v16  ;;  %v1855_v16 = vld [vmem:[%s2287_s2 + $0x18] sm:$0xff] (%p306_p5)  }
  0x2c   : >> { %1646 = vmatpush3.bf16.msra.mxu1 %v1825_v17  ;;  %1627 = vmatprep.subr.bf16.mxu0 %v1912_v2  ;;  %v1862_v17 = vld [vmem:[%s1972_s28 + $0xc] ss:$0 sps:$4 sm:$0x77] (%p306_p5)  }
  0x2d   : >> { %1647 = vmatprep.subr.bf16.mxu1 %v1912_v2 }
  0x2f   : >> { %1628 = vmatpush3.bf16.msra.mxu0 %v1826_v20  ;;  %v818_v20 = vshll.u32 (%p306_p5), %v1862_v17, 16 }
  0x30   : >> { %1648 = vmatpush3.bf16.msra.mxu1 %v1827_v21  ;;  %1653 = vmatprep.subr.bf16.mxu0 %v1912_v2  ;;  %v1858_v21 = vld [vmem:[%s2287_s2 + $0x48] sm:$0xff] (%p306_p5)  }
  0x31   : >> { %1673 = vmatprep.subr.bf16.mxu1 %v1912_v2 }
  0x32   : >> { %1630 = vmatmul.mubr.bf16.vlgmr.msra.gmra.mxu0 %v357_v22  ;;  %v1859_v22 = vld [vmem:[%s2287_s2 + $0x8] sm:$0xff] (%p306_p5)  }
  0x33   : >> { %1650 = vmatmul.mubr.bf16.vlgmr.msra.gmra.mxu1 %v313_v24  ;;  %1654 = vmatpush3.bf16.msra.mxu0 %v1829_v23  ;;  %v816_v23 = vshrl.u32 (%p306_p5), %v1862_v17, 16  ;;  %v820_v24 = vrot.slane (%p306_p5), %v818_v20, 1 }
  0x34   : >> { %1674 = vmatpush3.bf16.msra.mxu1 %v1830_v25  ;;  %1655 = vmatprep.subr.bf16.mxu0 %v1912_v2  ;;  %v1860_v25 = vld [vmem:[%s2287_s2 + $0x40] sm:$0xff] (%p306_p5)  }
  0x35   : >> { %1675 = vmatprep.subr.bf16.mxu1 %v1912_v2  ;;  %1669 = vmatprep.mubr.msk.bf16.mxu0 %vm1913_vm0, %v1912_v2 }
  0x36   : >> { %1689 = vmatprep.mubr.msk.bf16.mxu1 %vm1913_vm0, %v1912_v2 }
  0x37   : >> { %1656 = vmatpush3.bf16.msra.mxu0 %v1831_v26  ;;  %v1861_v26 = vld [vmem:[%s2287_s2] sm:$0xff] (%p306_p5)  }
  0x38   : >> { %1676 = vmatpush3.bf16.msra.mxu1 %v1832_v27  ;;  %1657 = vmatprep.subr.bf16.mxu0 %v1912_v2  ;;  %v821_v27 = vor.u32 (%p306_p5), %v820_v24, %v816_v23 }
  0x39   : >> { %1677 = vmatprep.subr.bf16.mxu1 %v1912_v2 }
  0x3b   : >> { %1658 = vmatpush3.bf16.msra.mxu0 %v1833_v28  ;;  %v1863_v28 = vld [vmem:[%s2287_s2 + $0xb8] sm:$0xff] (%p306_p5)  }
  0x3c   : >> { %1678 = vmatpush3.bf16.msra.mxu1 %v1834_v29  ;;  %1659 = vmatprep.subr.bf16.mxu0 %v1912_v2  ;;  %v1450_v29 = vld [vmem:[%s1972_s28 + $0xc] sm:$0x3] (%p306_p5) }
  0x3d   : >> { %1679 = vmatprep.subr.bf16.mxu1 %v1912_v2 }
  0x3f   : >> { %1660 = vmatpush3.bf16.msra.mxu0 %v1835_v30  ;;  %v1864_v30 = vld [vmem:[%s2287_s2 + $0xf8] sm:$0xff] (%p306_p5)  }
  0x40   : >> { %1680 = vmatpush3.bf16.msra.mxu1 %v1836_v31  ;;  %1661 = vmatprep.subr.bf16.mxu0 %v1912_v2  ;;  %v1865_v31 = vld [vmem:[%s2287_s2 + $0xb0] sm:$0xff] (%p306_p5)  }
  0x41   : >> { %1681 = vmatprep.subr.bf16.mxu1 %v1912_v2 }
  0x43   : >> { %1662 = vmatpush3.bf16.msra.mxu0 %v1837_v32  ;;  %v1866_v32 = vld [vmem:[%s2287_s2 + $0xf0] sm:$0xff] (%p306_p5)  }
  0x44   : >> { %1682 = vmatpush3.bf16.msra.mxu1 %v1838_v33  ;;  %1663 = vmatprep.subr.bf16.mxu0 %v1912_v2  ;;  %v1867_v33 = vld [vmem:[%s2287_s2 + $0xa8] sm:$0xff] (%p306_p5)  }
  0x45   : >> { %1683 = vmatprep.subr.bf16.mxu1 %v1912_v2 }
  0x47   : >> { %1664 = vmatpush3.bf16.msra.mxu0 %v1839_v34  ;;  %v1868_v34 = vld [vmem:[%s2287_s2 + $0xe8] sm:$0xff] (%p306_p5)  }
  0x48   : >> { %1684 = vmatpush3.bf16.msra.mxu1 %v1840_v36  ;;  %1665 = vmatprep.subr.bf16.mxu0 %v1912_v2  ;;  %v1870_v36 = vld [vmem:[%s2287_s2 + $0xe0] sm:$0xff] (%p306_p5)  }
  0x49   : >> { %1685 = vmatprep.subr.bf16.mxu1 %v1912_v2 }
  0x4b   : >> { %1666 = vmatpush3.bf16.msra.mxu0 %v1841_v37  ;;  %v1871_v37 = vld [vmem:[%s2287_s2 + $0x98] sm:$0xff] (%p306_p5)  }
  0x4c   : >> { %1686 = vmatpush3.bf16.msra.mxu1 %v1842_v39  ;;  %1667 = vmatprep.subr.bf16.mxu0 %v1912_v2  ;;  %v1873_v39 = vld [vmem:[%s2287_s2 + $0x90] sm:$0xff] (%p306_p5)  }
  0x4d   : >> { %1687 = vmatprep.subr.bf16.mxu1 %v1912_v2 }
  0x4f   : >> { %1668 = vmatpush3.bf16.msra.mxu0 %v1843_v40  ;;  %v1879_v40 = vld [vmem:[%s1977_s6] ss:$0 sps:$4 sm:$0x77] (%p306_p5)  }
  0x50   : >> { %1688 = vmatpush3.bf16.msra.mxu1 %v1844_v43  ;;  %1693 = vmatprep.subr.bf16.mxu0 (%p306_p5), %v1914_v7  ;;  %v1130_v43 = vshll.u32 (%p306_p5), %v1879_v40, 16 }
  0x51   : > { %1713 = vmatprep.subr.bf16.mxu1 (%p306_p5), %v1914_v7 }
  0x52   : >> { %1670 = vmatmul.mubr.bf16.vlgmr.msra.gmra.mxu0 %v1398_v44  ;;  %v1876_v44 = vld [vmem:[%s2287_s2 + $0xc8] sm:$0xff] (%p306_p5)  }
  0x53   : >> { %1690 = vmatmul.mubr.bf16.vlgmr.msra.gmra.mxu1 %v671_v45  ;;  %1694 = vmatpush3.bf16.msra.mxu0 (%p306_p5), %v1846_v6  ;;  %v1877_v45 = vld [vmem:[%s2287_s2 + $0x80] sm:$0xff] (%p306_p5)  }
  0x54   : > { %1709 = vmatprep.mubr.msk.bf16.mxu0 (%p306_p5), %vm1915_vm2, %v1914_v7  ;;  %1714 = vmatpush3.bf16.msra.mxu1 (%p306_p5), %v1847_v8 }
  0x55   : > { %1695 = vmatprep.subr.bf16.mxu0 (%p306_p5), %v1914_v7  ;;  %1715 = vmatprep.subr.bf16.mxu1 (%p306_p5), %v1914_v7 }
  0x56   : > { %1729 = vmatprep.mubr.msk.bf16.mxu1 (%p306_p5), %vm1915_vm2, %v1914_v7 }
  0x57   : > { %1696 = vmatpush3.bf16.msra.mxu0 (%p306_p5), %v1848_v9 }
  0x58   : > { %1716 = vmatpush3.bf16.msra.mxu1 (%p306_p5), %v1849_v10  ;;  %1697 = vmatprep.subr.bf16.mxu0 (%p306_p5), %v1914_v7 }
  0x59   : > { %1717 = vmatprep.subr.bf16.mxu1 (%p306_p5), %v1914_v7 }
  0x5b   : > { %1698 = vmatpush3.bf16.msra.mxu0 (%p306_p5), %v1850_v11 }
  0x5c   : > { %1718 = vmatpush3.bf16.msra.mxu1 (%p306_p5), %v1851_v12  ;;  %1699 = vmatprep.subr.bf16.mxu0 (%p306_p5), %v1914_v7 }
  0x5d   : > { %1719 = vmatprep.subr.bf16.mxu1 (%p306_p5), %v1914_v7 }
  0x5f   : > { %1700 = vmatpush3.bf16.msra.mxu0 (%p306_p5), %v1852_v13 }
  0x60   : > { %1720 = vmatpush3.bf16.msra.mxu1 (%p306_p5), %v1853_v14  ;;  %1701 = vmatprep.subr.bf16.mxu0 (%p306_p5), %v1914_v7 }
  0x61   : > { %1721 = vmatprep.subr.bf16.mxu1 (%p306_p5), %v1914_v7 }
  0x63   : > { %1702 = vmatpush3.bf16.msra.mxu0 (%p306_p5), %v1854_v15 }
  0x64   : > { %1722 = vmatpush3.bf16.msra.mxu1 (%p306_p5), %v1855_v16  ;;  %1703 = vmatprep.subr.bf16.mxu0 (%p306_p5), %v1914_v7 }
  0x65   : > { %1723 = vmatprep.subr.bf16.mxu1 (%p306_p5), %v1914_v7 }
  0x67   : > { %1704 = vmatpush3.bf16.msra.mxu0 (%p306_p5), %v1856_v18 }
  0x68   : > { %1724 = vmatpush3.bf16.msra.mxu1 (%p306_p5), %v1857_v19  ;;  %1705 = vmatprep.subr.bf16.mxu0 (%p306_p5), %v1914_v7 }
  0x69   : > { %1725 = vmatprep.subr.bf16.mxu1 (%p306_p5), %v1914_v7 }
  0x6b   : > { %1706 = vmatpush3.bf16.msra.mxu0 (%p306_p5), %v1858_v21 }
  0x6c   : > { %1726 = vmatpush3.bf16.msra.mxu1 (%p306_p5), %v1859_v22  ;;  %1707 = vmatprep.subr.bf16.mxu0 (%p306_p5), %v1914_v7 }
  0x6d   : > { %1727 = vmatprep.subr.bf16.mxu1 (%p306_p5), %v1914_v7 }
  0x6f   : > { %1708 = vmatpush3.bf16.msra.mxu0 (%p306_p5), %v1860_v25 }
  0x70   : > { %1728 = vmatpush3.bf16.msra.mxu1 (%p306_p5), %v1861_v26  ;;  %1733 = vmatprep.subr.bf16.mxu0 (%p306_p5), %v1914_v7 }
  0x71   : > { %1753 = vmatprep.subr.bf16.mxu1 (%p306_p5), %v1914_v7 }
  0x72   : > { %1710 = vmatmul.mubr.bf16.vlgmr.msra.gmra.mxu0 (%p306_p5), %v821_v27 }
  0x73   : > { %1730 = vmatmul.mubr.bf16.vlgmr.msra.gmra.mxu1 (%p306_p5), %v1450_v29  ;;  %1734 = vmatpush3.bf16.msra.mxu0 (%p306_p5), %v1863_v28 }
  0x74   : > { %1754 = vmatpush3.bf16.msra.mxu1 (%p306_p5), %v1864_v30  ;;  %1735 = vmatprep.subr.bf16.mxu0 (%p306_p5), %v1914_v7 }
  0x75   : > { %1755 = vmatprep.subr.bf16.mxu1 (%p306_p5), %v1914_v7  ;;  %1749 = vmatprep.mubr.msk.bf16.mxu0 (%p306_p5), %vm1915_vm2, %v1914_v7 }
  0x76   : > { %1769 = vmatprep.mubr.msk.bf16.mxu1 (%p306_p5), %vm1915_vm2, %v1914_v7 }
  0x77   : > { %1736 = vmatpush3.bf16.msra.mxu0 (%p306_p5), %v1865_v31 }
  0x78   : > { %1756 = vmatpush3.bf16.msra.mxu1 (%p306_p5), %v1866_v32  ;;  %1737 = vmatprep.subr.bf16.mxu0 (%p306_p5), %v1914_v7 }
  0x79   : > { %1757 = vmatprep.subr.bf16.mxu1 (%p306_p5), %v1914_v7 }
  0x7b   : > { %1738 = vmatpush3.bf16.msra.mxu0 (%p306_p5), %v1867_v33 }
  0x7c   : > { %1758 = vmatpush3.bf16.msra.mxu1 (%p306_p5), %v1868_v34  ;;  %1739 = vmatprep.subr.bf16.mxu0 (%p306_p5), %v1914_v7 }
  0x7d   : > { %1759 = vmatprep.subr.bf16.mxu1 (%p306_p5), %v1914_v7 }
  0x7f   : > { %1740 = vmatpush3.bf16.msra.mxu0 (%p306_p5), %v1869_v35 }
  0x80   : > { %1760 = vmatpush3.bf16.msra.mxu1 (%p306_p5), %v1870_v36  ;;  %1741 = vmatprep.subr.bf16.mxu0 (%p306_p5), %v1914_v7 }
  0x81   : > { %1761 = vmatprep.subr.bf16.mxu1 (%p306_p5), %v1914_v7 }
  0x83   : > { %1742 = vmatpush3.bf16.msra.mxu0 (%p306_p5), %v1871_v37 }
  0x84   : > { %1762 = vmatpush3.bf16.msra.mxu1 (%p306_p5), %v1872_v38  ;;  %1743 = vmatprep.subr.bf16.mxu0 (%p306_p5), %v1914_v7 }
  0x85   : > { %1763 = vmatprep.subr.bf16.mxu1 (%p306_p5), %v1914_v7 }
  0x87   : > { %1744 = vmatpush3.bf16.msra.mxu0 (%p306_p5), %v1873_v39 }
  0x88   : > { %1764 = vmatpush3.bf16.msra.mxu1 (%p306_p5), %v1874_v41  ;;  %1745 = vmatprep.subr.bf16.mxu0 (%p306_p5), %v1914_v7 }
  0x89   : > { %1765 = vmatprep.subr.bf16.mxu1 (%p306_p5), %v1914_v7 }
  0x8b   : > { %1746 = vmatpush3.bf16.msra.mxu0 (%p306_p5), %v1875_v42 }
  0x8c   : > { %1766 = vmatpush3.bf16.msra.mxu1 (%p306_p5), %v1876_v44  ;;  %1747 = vmatprep.subr.bf16.mxu0 (%p306_p5), %v1914_v7 }
  0x8d   : > { %1767 = vmatprep.subr.bf16.mxu1 (%p306_p5), %v1914_v7 }
  0x8f   : > { %1748 = vmatpush3.bf16.msra.mxu0 (%p306_p5), %v1877_v45 }
  0xf2   : >> { %v441_v46 = vpop.f32.mrf.mxu0 }
  0xf3   : >> { %v529_v47 = vpop.f32.mrf.mxu1 }
  0xf4   : >> { %v1631_v48 = vpop.f32.mrf.mxu0  ;;  %v530_v54 = vadd.f32 %v529_v47, %v441_v46  ;;  %v1128_v46 = vshrl.u32 (%p306_p5), %v1879_v40, 16  ;;  %v1132_v47 = vrot.slane (%p306_p5), %v1130_v43, 1 }
  0xf5   : >> { %v1651_v49 = vpop.f32.mrf.mxu1  ;;  %v1878_v48 = vld [vmem:[%s2287_s2 + $0xc0] sm:$0xff] (%p306_p5)  }
  0xf6   : >> { %v444_v50 = vpop.f32.mrf.mxu0  ;;  %v999_v49 = vld [vmem:[%s1977_s6] sm:$0x3] (%p306_p5)  ;;  %1768 = vmatpush3.bf16.msra.mxu1 (%p306_p5), %v1878_v48 }
  0xf7   : >> { %v532_v51 = vpop.f32.mrf.mxu1  ;;  %v1133_v50 = vor.u32 (%p306_p5), %v1132_v47, %v1128_v46  ;;  %1750 = vmatmul.mubr.bf16.vlgmr.msra.gmra.mxu0 (%p306_p5), %v999_v49 }
  0xf8   : >> { %v1632_v52 = vpop.f32.mrf.mxu0 }
  0xf9   : >> { %v1652_v53 = vpop.f32.mrf.mxu1  ;;  %1770 = vmatmul.mubr.bf16.vlgmr.msra.gmra.mxu1 (%p306_p5), %v1133_v50 }
 0x112   : >> { %v637_v55 = vpop.f32.mrf.mxu0 }
 0x113   : >> { %v643_v56 = vadd.f32 %v637_v55, %v530_v54  ;;  %v755_v57 = vpop.f32.mrf.mxu1 }
 0x114   : >> { %v1671_v58 = vpop.f32.mrf.mxu0 }
 0x115   : >> { %v761_v59 = vadd.f32 %v755_v57, %v643_v56  ;;  %v1691_v60 = vpop.f32.mrf.mxu1 }
 0x116   : >> { %v640_v61 = vpop.f32.mrf.mxu0 }
 0x117   : >> { %v768_v62 = vadd.f32 %v1962_v0, %v761_v59  ;;  %v758_v63 = vpop.f32.mrf.mxu1 }
 0x118   : >> { %v1672_v1 = vpop.f32.mrf.mxu0 }
 0x119   : >> { %vm769_vm1 = vcmp.ge.f32.partialorder %v768_v62, 0.0  ;;  %v770_v2 = vmul.f32 0.2, %v768_v62  ;;  %v1692_v3 = vpop.f32.mrf.mxu1 }
 0x11a   : > { %308 = sbr.rel (!%p306_p5) target bundleno = 17 (0x11), region = 87 }
 0x11b   : >> { %v771_v4 = vsel %vm769_vm1, %v768_v62, %v770_v2 }
 0x11c   : >> { %v772_v5 = vpack.c.bf16 %v771_v4, %v771_v4 }
 0x11e   : >> { %775 = vst [vmem:[%s774_s22] sm:$0x3] %v772_v5 }
 0x132   : > { %v905_v51 = vpop.f32.mrf.mxu0 }
 0x133   : > { %v993_v52 = vpop.f32.mrf.mxu1 }
 0x134   : > { %v1711_v53 = vpop.f32.mrf.mxu0  ;;  %v994_v59 = vadd.f32 %v993_v52, %v905_v51 }
 0x135   : > { %v1731_v54 = vpop.f32.mrf.mxu1 }
 0x136   : > { %v908_v55 = vpop.f32.mrf.mxu0 }
 0x137   : > { %v996_v56 = vpop.f32.mrf.mxu1 }
 0x138   : > { %v1712_v57 = vpop.f32.mrf.mxu0 }
 0x139   : > { %v1732_v58 = vpop.f32.mrf.mxu1 }
 0x1b7   : > { %v1099_v60 = vpop.f32.mrf.mxu0 }
 0x1b8   : > { %v1105_v61 = vadd.f32 %v1099_v60, %v994_v59 }
 0x1b9   : > { %v1217_v62 = vpop.f32.mrf.mxu1  ;;  %v1751_v63 = vpop.f32.mrf.mxu0 }
 0x1ba   : > { %v1223_v1 = vadd.f32 %v1217_v62, %v1105_v61 }
 0x1bb   : > { %v1771_v2 = vpop.f32.mrf.mxu1  ;;  %v1102_v3 = vpop.f32.mrf.mxu0 }
 0x1bc   : > { %v1230_v4 = vadd.f32 %v1962_v0, %v1223_v1 }
 0x1bd   : > { %v1220_v5 = vpop.f32.mrf.mxu1  ;;  %v1752_v6 = vpop.f32.mrf.mxu0 }
 0x1be   : > { %vm1231_vm3 = vcmp.ge.f32.partialorder %v1230_v4, 0.0  ;;  %v1232_v7 = vmul.f32 0.2, %v1230_v4 }
 0x1bf   : > { %v1772_v8 = vpop.f32.mrf.mxu1 }
 0x1c0   : > { %v1233_v9 = vsel %vm1231_vm3, %v1230_v4, %v1232_v7 }
 0x1c1   : > { %v1234_v10 = vpack.c.bf16 %v1233_v9, %v1233_v9 }
 0x1c3   : > { %1534 = vst [vmem:[%s1967_s25 + $0x6] sm:$0x3] %v1234_v10 }
 0x1c4 PF: > { %s14_s17 = sadd.s32 1, %s1906_s17   ;;  %s2290_s15 = smov %s1902_s16 }
 0x1c5   : > { %p11_p6 = scmp.ge.s32.totalorder %s14_s17, 4   ;;  %s2291_s16 = smov %s2293_s18 }
 0x1c7   :  { %13 = sbr.rel (!%p11_p6) target bundleno = 2 (0x2), region = 98 }

// kernel: fc_discriminator_forward.8
= control target key start
LH: loop header
LB: loop body
LE: loop exit
PB: predicated region body
PF: predicated region fallthrough
CT: control target
= control target key end

     0   :  { %s2667_s15 = smov 0   ;;  %s2669_s16 = smov 0   ;;  %s3118_s0 = inlined_call_operand.vmem [shape: bf16[2,3,3,256], index: 0, kind: input, shape index: {}, may-alias: {0,1}]   ;;  %s3119_s1 = inlined_call_operand.vmem [shape: bf16[2,3,3,256], index: 1, kind: input, shape index: {}, may-alias: {0,1}]   ;;  %s3120_s2 = inlined_call_operand.vmem [shape: bf16[4,256,128], index: 2, kind: input, shape index: {}]   ;;  %s3121_s3 = inlined_call_operand.vmem [shape: f32[1,128], index: 3, kind: input, shape index: {}]   ;;  %s3122_s4 = inlined_call_operand.vmem [shape: bf16[2,2,2,128], index: 4, kind: output, shape index: {}]  }
   0x1   :  { %s2671_s17 = smov 0  }
   0x2 LB: > { %s26_s18 = sadd.s32 1, %s2636_s16  ;;  %p1945_p0 = scmp.ge.s32.totalorder %s2640_s17, 1  ;;  %s2640_s17 = sphi %s2671_s17, %s14_s17   ;;  %s2636_s16 = sphi %s2669_s16, %s3124_s16   ;;  %s2632_s15 = sphi %s2667_s15, %s3123_s15  }
   0x3   : > { %p28_p1 = scmp.ge.s32.totalorder %s26_s18, 2  ;;  %p218_p2 = scmp.lt.s32.totalorder %s2640_s17, 3 }
   0x5   : > { %s3126_s18 = smov (%p28_p1, %s26_s18), 0  ;;  %p219_p3 = pnand %p1945_p0, %p218_p2 }
   0x6   : > { %p274_p4 = scmp.lt.s32.totalorder (!%p219_p3), %s2632_s15, 1 }
   0x7   : > { %222 = sbr.rel (%p219_p3) target bundleno = 351 (0x15f), region = 36 }
   0xc   : > { %v2490_v0 = vld [vmem:[%s3120_s2 + $0xf8] sm:$0xff]   ;;  %s3128_s15 = smov (!%p274_p4, %s2632_s15), 1  ;;  %v2494_v4 = vld [vmem:[%s3120_s2 + $0xf0] sm:$0xff]   ;;  %v2498_v8 = vld [vmem:[%s3120_s2 + $0xe8] sm:$0xff]  }
   0xd   : > { %v2491_v1 = vld [vmem:[%s3120_s2 + $0x78] sm:$0xff]   ;;  %2287 = vmatprep.subr.bf16.mxu0 %v2490_v0  ;;  %v2495_v5 = vld [vmem:[%s3120_s2 + $0x70] sm:$0xff]   ;;  %v2499_v9 = vld [vmem:[%s3120_s2 + $0x68] sm:$0xff]   ;;  %s2463_s27 = smul.u32 12, %s3128_s15  ;;  %s1948_s6 = sshll.u32 %s3128_s15, 1 }
   0xe   : > { %v2492_v2 = vld [vmem:[%s3120_s2 + $0xb8] sm:$0xff]   ;;  %2309 = vmatprep.subr.bf16.mxu1 %v2491_v1  ;;  %v2496_v6 = vld [vmem:[%s3120_s2 + $0xb0] sm:$0xff]   ;;  %v2500_v10 = vld [vmem:[%s3120_s2 + $0xa8] sm:$0xff]   ;;  %s3105_s9 = scalar_lea.vmem %s3122_s4, %s1948_s6 }
   0xf   : > { %v2493_v3 = vld [vmem:[%s3120_s2 + $0x38] sm:$0xff]   ;;  %2288 = vmatpush3.bf16.msra.mxu0 %v2492_v2  ;;  %v2497_v7 = vld [vmem:[%s3120_s2 + $0x30] sm:$0xff]   ;;  %v2501_v11 = vld [vmem:[%s3120_s2 + $0x28] sm:$0xff]   ;;  %s2783_s12 = scalar_lea.vmem %s3118_s0, %s2463_s27  ;;  %s2286_s13 = sadd.s32 8, %s2463_s27 }
  0x10   : > { %2310 = vmatpush3.bf16.msra.mxu1 %v2493_v3  ;;  %2289 = vmatprep.subr.bf16.mxu0 %v2494_v4  ;;  %v2502_v12 = vld [vmem:[%s3120_s2 + $0xe0] sm:$0xff]   ;;  %v2506_v16 = vld [vmem:[%s3120_s2 + $0xd8] sm:$0xff]   ;;  %v2510_v20 = vld [vmem:[%s3120_s2 + $0xd0] sm:$0xff]   ;;  %s299_s24 = scalar_lea.vmem %s3119_s1, %s2286_s13 }
  0x11   : > { %2311 = vmatprep.subr.bf16.mxu1 %v2495_v5  ;;  %v2503_v13 = vld [vmem:[%s3120_s2 + $0x60] sm:$0xff]   ;;  %v2507_v17 = vld [vmem:[%s3120_s2 + $0x58] sm:$0xff]   ;;  %v2511_v21 = vld [vmem:[%s3120_s2 + $0x50] sm:$0xff]  }
  0x12   : > { %v2504_v14 = vld [vmem:[%s3120_s2 + $0xa0] sm:$0xff]   ;;  %v2508_v18 = vld [vmem:[%s3120_s2 + $0x98] sm:$0xff]   ;;  %v2512_v22 = vld [vmem:[%s3120_s2 + $0x90] sm:$0xff]  }
  0x13   : > { %2290 = vmatpush3.bf16.msra.mxu0 %v2496_v6  ;;  %v2505_v15 = vld [vmem:[%s3120_s2 + $0x20] sm:$0xff]   ;;  %v2509_v19 = vld [vmem:[%s3120_s2 + $0x18] sm:$0xff]   ;;  %v2513_v23 = vld [vmem:[%s3120_s2 + $0x10] sm:$0xff]  }
  0x14   : > { %2312 = vmatpush3.bf16.msra.mxu1 %v2497_v7  ;;  %2291 = vmatprep.subr.bf16.mxu0 %v2498_v8  ;;  %v2514_v24 = vld [vmem:[%s3120_s2 + $0xc8] sm:$0xff]   ;;  %v2518_v28 = vld [vmem:[%s3120_s2 + $0xc0] sm:$0xff]   ;;  %v2522_v38 = vld [vmem:[%s3120_s2 + $0x178] sm:$0xff]  }
  0x15   : > { %2313 = vmatprep.subr.bf16.mxu1 %v2499_v9  ;;  %v2515_v25 = vld [vmem:[%s3120_s2 + $0x48] sm:$0xff]   ;;  %v2519_v29 = vld [vmem:[%s3120_s2 + $0x40] sm:$0xff]   ;;  %v2523_v42 = vld [vmem:[%s3120_s2 + $0x1f8] sm:$0xff]  }
  0x16   : > { %v2516_v26 = vld [vmem:[%s3120_s2 + $0x88] sm:$0xff]   ;;  %v2520_v30 = vld [vmem:[%s3120_s2 + $0x80] sm:$0xff]   ;;  %v2525_v44 = vld [vmem:[%s3120_s2 + $0x1b8] sm:$0xff]  }
  0x17   : > { %2292 = vmatpush3.bf16.msra.mxu0 %v2500_v10  ;;  %v2517_v27 = vld [vmem:[%s3120_s2 + $0x8] sm:$0xff]   ;;  %v2521_v31 = vld [vmem:[%s3120_s2] sm:$0xff]   ;;  %v2524_v46 = vld [vmem:[%s3120_s2 + $0x138] sm:$0xff]  }
  0x18   : > { %2314 = vmatpush3.bf16.msra.mxu1 %v2501_v11  ;;  %2293 = vmatprep.subr.bf16.mxu0 %v2502_v12  ;;  %v1981_v32 = vld.sshfl [vmem:[%s2783_s12] sm:$0x33 pattern:$0x76325410]  ;;  %v2527_v48 = vld [vmem:[%s3120_s2 + $0x1f0] sm:$0xff]   ;;  %v2531_v52 = vld [vmem:[%s3120_s2 + $0x1e8] sm:$0xff]  }
  0x19   : > { %2315 = vmatprep.subr.bf16.mxu1 %v2503_v13  ;;  %v388_v33 = vcombine.high %v1981_v32, %v1981_v32  ;;  %v1998_v34 = vld.sshfl [vmem:[%s2783_s12] sm:$0x11 pattern:$0x76325410]  ;;  %v392_v35 = vshll.u32 %v1981_v32, 16  ;;  %v390_v37 = vshrl.u32 %v1981_v32, 16 }
  0x1a   : > { %v549_v36 = vcombine.high %v1998_v34, %v1998_v34  ;;  %v2526_v49 = vld [vmem:[%s3120_s2 + $0x170] sm:$0xff]   ;;  %v2530_v53 = vld [vmem:[%s3120_s2 + $0x168] sm:$0xff]   ;;  %v2535_v56 = vld [vmem:[%s3120_s2 + $0x1e0] sm:$0xff]  }
  0x1b   : > { %2294 = vmatpush3.bf16.msra.mxu0 %v2504_v14  ;;  %v397_v39 = vshrl.u32 %v388_v33, 16  ;;  %v399_v40 = vshll.u32 %v388_v33, 16  ;;  %v394_v41 = vrot.slane %v392_v35, 1  ;;  %v2529_v50 = vld [vmem:[%s3120_s2 + $0x1b0] sm:$0xff]   ;;  %v2533_v54 = vld [vmem:[%s3120_s2 + $0x1a8] sm:$0xff]   ;;  %v2534_v57 = vld [vmem:[%s3120_s2 + $0x160] sm:$0xff]  }
  0x1c   : > { %2316 = vmatpush3.bf16.msra.mxu1 %v2505_v15  ;;  %2295 = vmatprep.subr.bf16.mxu0 %v2506_v16  ;;  %v2528_v51 = vld [vmem:[%s3120_s2 + $0x130] sm:$0xff]   ;;  %v2532_v55 = vld [vmem:[%s3120_s2 + $0x128] sm:$0xff]   ;;  %v2537_v58 = vld [vmem:[%s3120_s2 + $0x1a0] sm:$0xff]  }
  0x1d   : > { %2317 = vmatprep.subr.bf16.mxu1 %v2507_v17  ;;  %680 = vmatprep.mubr.bf16.mxu1 %v549_v36  ;;  %v401_v43 = vrot.slane %v399_v40, 1  ;;  %v395_v45 = vor.u32 %v394_v41, %v390_v37  ;;  %v2536_v59 = vld [vmem:[%s3120_s2 + $0x120] sm:$0xff]   ;;  %v2539_v60 = vld [vmem:[%s3120_s2 + $0x1d8] sm:$0xff]   ;;  %v2543_v0 = vld [vmem:[%s3120_s2 + $0x1d0] sm:$0xff]  }
  0x1e   : > { %v2538_v61 = vld [vmem:[%s3120_s2 + $0x158] sm:$0xff]   ;;  %v2542_v1 = vld [vmem:[%s3120_s2 + $0x150] sm:$0xff]   ;;  %v2547_v4 = vld [vmem:[%s3120_s2 + $0x1c8] sm:$0xff]  }
  0x1f   : > { %2296 = vmatpush3.bf16.msra.mxu0 %v2508_v18  ;;  %v402_v47 = vor.u32 %v401_v43, %v397_v39  ;;  %v2541_v62 = vld [vmem:[%s3120_s2 + $0x198] sm:$0xff]   ;;  %v2545_v2 = vld [vmem:[%s3120_s2 + $0x190] sm:$0xff]   ;;  %v2546_v5 = vld [vmem:[%s3120_s2 + $0x148] sm:$0xff]  }
  0x20   : > { %2318 = vmatpush3.bf16.msra.mxu1 %v2509_v19  ;;  %2297 = vmatprep.subr.bf16.mxu0 %v2510_v20  ;;  %v2540_v63 = vld [vmem:[%s3120_s2 + $0x118] sm:$0xff]   ;;  %v2544_v3 = vld [vmem:[%s3120_s2 + $0x110] sm:$0xff]   ;;  %v2549_v6 = vld [vmem:[%s3120_s2 + $0x188] sm:$0xff]  }
  0x21   : > { %2319 = vmatprep.subr.bf16.mxu1 %v2511_v21  ;;  %533 = vmatprep.mubr.bf16.mxu0 %v402_v47  ;;  %v2548_v7 = vld [vmem:[%s3120_s2 + $0x108] sm:$0xff]   ;;  %v2551_v8 = vld [vmem:[%s3120_s2 + $0x1c0] sm:$0xff]   ;;  %v2554_v18 = vld [vmem:[%s3120_s2 + $0xf8] sm:$0xff]  }
  0x22   : > { %v2550_v9 = vld [vmem:[%s3120_s2 + $0x140] sm:$0xff]   ;;  %v2555_v19 = vld [vmem:[%s3120_s2 + $0x78] sm:$0xff]   ;;  %v2561_v32 = vld [vmem:[%s3120_s2 + $0x30] sm:$0xff]  }
  0x23   : > { %2298 = vmatpush3.bf16.msra.mxu0 %v2512_v22  ;;  %v2552_v10 = vld [vmem:[%s3120_s2 + $0x100] sm:$0xff]   ;;  %v2563_v33 = vld [vmem:[%s3120_s2 + $0x68] sm:$0xff]   ;;  %v2570_v39 = vld [vmem:[%s3120_s2 + $0xd8] sm:$0xff]  }
  0x24   : > { %2320 = vmatpush3.bf16.msra.mxu1 %v2513_v23  ;;  %2299 = vmatprep.subr.bf16.mxu0 %v2514_v24  ;;  %v2553_v11 = vld [vmem:[%s3120_s2 + $0x180] sm:$0xff]   ;;  %v2556_v23 = vld [vmem:[%s3120_s2 + $0xb8] sm:$0xff]   ;;  %v2565_v36 = vld [vmem:[%s3120_s2 + $0x28] sm:$0xff]  }
  0x25   : > { %2321 = vmatprep.subr.bf16.mxu1 %v2515_v25  ;;  %v2890_v12 = vld.sshfl [vmem:[%s2783_s12 + $0x4] sm:$0x11 pattern:$0x76325410]  ;;  %v2558_v25 = vld [vmem:[%s3120_s2 + $0xf0] sm:$0xff]   ;;  %v2571_v41 = vld [vmem:[%s3120_s2 + $0x58] sm:$0xff]  }
  0x26   : > { %v731_v13 = vcombine.high %v2890_v12, %v2890_v12  ;;  %v2098_v14 = vld.sshfl [vmem:[%s2783_s12 + $0x4] sm:$0x33 pattern:$0x76325410]  ;;  %v2574_v43 = vld [vmem:[%s3120_s2 + $0xd0] sm:$0xff]   ;;  %v2578_v47 = vld [vmem:[%s3120_s2 + $0xc8] sm:$0xff]  }
  0x27   : > { %2300 = vmatpush3.bf16.msra.mxu0 %v2516_v26  ;;  %v913_v15 = vcombine.high %v2098_v14, %v2098_v14  ;;  %v915_v16 = vshrl.u32 %v2098_v14, 16  ;;  %v917_v17 = vshll.u32 %v2098_v14, 16  ;;  %v2566_v35 = vld [vmem:[%s3120_s2 + $0xe0] sm:$0xff]   ;;  %v2608_v14 = vld [vmem:[%s3120_s2 + $0x110] sm:$0xff]  }
  0x28   : > { %2322 = vmatpush3.bf16.msra.mxu1 %v2517_v27  ;;  %2301 = vmatprep.subr.bf16.mxu0 %v2518_v28  ;;  %v2557_v27 = vld [vmem:[%s3120_s2 + $0x38] sm:$0xff]   ;;  %v2567_v37 = vld [vmem:[%s3120_s2 + $0x60] sm:$0xff]  }
  0x29   : > { %2323 = vmatprep.subr.bf16.mxu1 %v2519_v29  ;;  %v922_v20 = vshrl.u32 %v913_v15, 16  ;;  %v924_v21 = vshll.u32 %v913_v15, 16  ;;  %v919_v22 = vrot.slane %v917_v17, 1  ;;  %v2559_v29 = vld [vmem:[%s3120_s2 + $0x70] sm:$0xff]   ;;  %v2569_v40 = vld [vmem:[%s3120_s2 + $0x20] sm:$0xff]   ;;  %v2610_v15 = vld [vmem:[%s3120_s2 + $0x148] sm:$0xff]  }
  0x2a   : > { %v2611_v17 = vld [vmem:[%s3120_s2 + $0x1c8] sm:$0xff]  }
  0x2b   : > { %2302 = vmatpush3.bf16.msra.mxu0 %v2520_v30  ;;  %v926_v24 = vrot.slane %v924_v21, 1  ;;  %v2907_v26 = vor.u32 %v919_v22, %v915_v16  ;;  %v2560_v30 = vld [vmem:[%s3120_s2 + $0xb0] sm:$0xff]   ;;  %v2615_v21 = vld [vmem:[%s3120_s2 + $0x1c0] sm:$0xff]  }
  0x2c   : > { %2324 = vmatpush3.bf16.msra.mxu1 %v2521_v31  ;;  %2331 = vmatprep.subr.bf16.mxu0 %v2522_v38  ;;  %v2562_v31 = vld [vmem:[%s3120_s2 + $0xe8] sm:$0xff]   ;;  %v2568_v38 = vld [vmem:[%s3120_s2 + $0xa0] sm:$0xff]   ;;  %v2609_v16 = vld [vmem:[%s3120_s2 + $0x190] sm:$0xff]  }
  0x2d   : > { %2353 = vmatprep.subr.bf16.mxu1 %v2523_v42  ;;  %v927_v28 = vor.u32 %v926_v24, %v922_v20  ;;  %v2572_v42 = vld [vmem:[%s3120_s2 + $0x98] sm:$0xff]   ;;  %v2613_v20 = vld [vmem:[%s3120_s2 + $0x188] sm:$0xff]   ;;  %v2616_v22 = vld [vmem:[%s3120_s2 + $0x100] sm:$0xff]  }
  0x2e   : > { %534 = vmatmul.mubr.bf16.vlgmr.msra.gmra.mxu0 %v395_v45  ;;  %v2575_v45 = vld [vmem:[%s3120_s2 + $0x50] sm:$0xff]  }
  0x2f   : > { %681 = vmatmul.mubr.bf16.vlgmr.msra.gmra.mxu1 %v1998_v34  ;;  %2332 = vmatpush3.bf16.msra.mxu0 %v2524_v46  ;;  %v2564_v34 = vld [vmem:[%s3120_s2 + $0xa8] sm:$0xff]   ;;  %v2576_v46 = vld [vmem:[%s3120_s2 + $0x90] sm:$0xff]  }
  0x30   : > { %2354 = vmatpush3.bf16.msra.mxu1 %v2525_v44  ;;  %2333 = vmatprep.subr.bf16.mxu0 %v2526_v49  ;;  %v2573_v44 = vld [vmem:[%s3120_s2 + $0x18] sm:$0xff]   ;;  %v2579_v49 = vld [vmem:[%s3120_s2 + $0x48] sm:$0xff]  }
  0x31   : > { %2355 = vmatprep.subr.bf16.mxu1 %v2527_v48  ;;  %862 = vmatprep.mubr.bf16.mxu0 %v731_v13  ;;  %v2577_v48 = vld [vmem:[%s3120_s2 + $0x10] sm:$0xff]  }
  0x32   : > { %1058 = vmatprep.mubr.bf16.mxu1 %v927_v28 }
  0x33   : > { %2334 = vmatpush3.bf16.msra.mxu0 %v2528_v51  ;;  %v2582_v51 = vld [vmem:[%s3120_s2 + $0xc0] sm:$0xff]  }
  0x34   : > { %2356 = vmatpush3.bf16.msra.mxu1 %v2529_v50  ;;  %2335 = vmatprep.subr.bf16.mxu0 %v2530_v53  ;;  %v2580_v50 = vld [vmem:[%s3120_s2 + $0x88] sm:$0xff]   ;;  %v2583_v53 = vld [vmem:[%s3120_s2 + $0x40] sm:$0xff]  }
  0x35   : > { %2357 = vmatprep.subr.bf16.mxu1 %v2531_v52  ;;  %v2581_v52 = vld [vmem:[%s3120_s2 + $0x8] sm:$0xff]  }
  0x37   : > { %2336 = vmatpush3.bf16.msra.mxu0 %v2532_v55  ;;  %v2586_v55 = vld [vmem:[%s3120_s2 + $0x178] sm:$0xff]  }
  0x38   : > { %2358 = vmatpush3.bf16.msra.mxu1 %v2533_v54  ;;  %2337 = vmatprep.subr.bf16.mxu0 %v2534_v57  ;;  %v2584_v54 = vld [vmem:[%s3120_s2 + $0x80] sm:$0xff]   ;;  %v2587_v57 = vld [vmem:[%s3120_s2 + $0x1f8] sm:$0xff]  }
  0x39   : > { %2359 = vmatprep.subr.bf16.mxu1 %v2535_v56  ;;  %v2585_v56 = vld [vmem:[%s3120_s2] sm:$0xff]  }
  0x3b   : > { %2338 = vmatpush3.bf16.msra.mxu0 %v2536_v59  ;;  %v2590_v59 = vld [vmem:[%s3120_s2 + $0x170] sm:$0xff]  }
  0x3c   : > { %2360 = vmatpush3.bf16.msra.mxu1 %v2537_v58  ;;  %2339 = vmatprep.subr.bf16.mxu0 %v2538_v61  ;;  %v2588_v58 = vld [vmem:[%s3120_s2 + $0x138] sm:$0xff]   ;;  %v2591_v61 = vld [vmem:[%s3120_s2 + $0x1f0] sm:$0xff]  }
  0x3d   : > { %2361 = vmatprep.subr.bf16.mxu1 %v2539_v60  ;;  %v2589_v60 = vld [vmem:[%s3120_s2 + $0x1b8] sm:$0xff]  }
  0x3f   : > { %2340 = vmatpush3.bf16.msra.mxu0 %v2540_v63  ;;  %v2594_v63 = vld [vmem:[%s3120_s2 + $0x168] sm:$0xff]  }
  0x40   : > { %2362 = vmatpush3.bf16.msra.mxu1 %v2541_v62  ;;  %2341 = vmatprep.subr.bf16.mxu0 %v2542_v1  ;;  %v2592_v62 = vld [vmem:[%s3120_s2 + $0x130] sm:$0xff]   ;;  %v2595_v1 = vld [vmem:[%s3120_s2 + $0x1e8] sm:$0xff]  }
  0x41   : > { %2363 = vmatprep.subr.bf16.mxu1 %v2543_v0  ;;  %v2593_v0 = vld [vmem:[%s3120_s2 + $0x1b0] sm:$0xff]  }
  0x43   : > { %2342 = vmatpush3.bf16.msra.mxu0 %v2544_v3  ;;  %v2598_v3 = vld [vmem:[%s3120_s2 + $0x160] sm:$0xff]  }
  0x44   : > { %2364 = vmatpush3.bf16.msra.mxu1 %v2545_v2  ;;  %2343 = vmatprep.subr.bf16.mxu0 %v2546_v5  ;;  %v2596_v2 = vld [vmem:[%s3120_s2 + $0x128] sm:$0xff]   ;;  %v2599_v5 = vld [vmem:[%s3120_s2 + $0x1e0] sm:$0xff]  }
  0x45   : > { %2365 = vmatprep.subr.bf16.mxu1 %v2547_v4  ;;  %v2597_v4 = vld [vmem:[%s3120_s2 + $0x1a8] sm:$0xff]  }
  0x47   : > { %2344 = vmatpush3.bf16.msra.mxu0 %v2548_v7  ;;  %v2602_v7 = vld [vmem:[%s3120_s2 + $0x158] sm:$0xff]  }
  0x48   : > { %2366 = vmatpush3.bf16.msra.mxu1 %v2549_v6  ;;  %2345 = vmatprep.subr.bf16.mxu0 %v2550_v9  ;;  %v2600_v6 = vld [vmem:[%s3120_s2 + $0x120] sm:$0xff]   ;;  %v2603_v9 = vld [vmem:[%s3120_s2 + $0x1d8] sm:$0xff]  }
  0x49   : > { %2367 = vmatprep.subr.bf16.mxu1 %v2551_v8  ;;  %v2601_v8 = vld [vmem:[%s3120_s2 + $0x1a0] sm:$0xff]  }
  0x4b   : > { %2346 = vmatpush3.bf16.msra.mxu0 %v2552_v10  ;;  %v2604_v10 = vld [vmem:[%s3120_s2 + $0x118] sm:$0xff]  }
  0x4c   : > { %2368 = vmatpush3.bf16.msra.mxu1 %v2553_v11  ;;  %2375 = vmatprep.subr.bf16.mxu0 %v2554_v18  ;;  %v2606_v11 = vld [vmem:[%s3120_s2 + $0x150] sm:$0xff]   ;;  %v2612_v18 = vld [vmem:[%s3120_s2 + $0x108] sm:$0xff]  }
  0x4d   : > { %2397 = vmatprep.subr.bf16.mxu1 %v2555_v19  ;;  %v2614_v19 = vld [vmem:[%s3120_s2 + $0x140] sm:$0xff]  }
  0x4e   : > { %863 = vmatmul.mubr.bf16.vlgmr.msra.gmra.mxu0 %v2890_v12 }
  0x4f   : > { %2376 = vmatpush3.bf16.msra.mxu0 %v2556_v23  ;;  %1059 = vmatmul.mubr.bf16.vlgmr.msra.gmra.mxu1 %v2907_v26  ;;  %v2216_v23 = vld.sshfl [vmem:[%s299_s24] sm:$0x11 pattern:$0x76325410] }
  0x50   : > { %2377 = vmatprep.subr.bf16.mxu0 %v2558_v25  ;;  %1298 = vmatprep.mubr.bf16.mxu0 %v927_v28  ;;  %v1494_v24 = vcombine.high %v2216_v23, %v2216_v23  ;;  %v2265_v25 = vld.sshfl [vmem:[%s299_s24] sm:$0x33 pattern:$0x76325410] }
  0x51   : > { %2398 = vmatpush3.bf16.msra.mxu1 %v2557_v27  ;;  %1445 = vmatprep.mubr.bf16.mxu1 %v731_v13  ;;  %v2607_v13 = vld [vmem:[%s3120_s2 + $0x1d0] sm:$0xff]   ;;  %v1679_v27 = vshll.u32 %v2265_v25, 16  ;;  %v1675_v28 = vcombine.high %v2265_v25, %v2265_v25 }
  0x52   : > { %2399 = vmatprep.subr.bf16.mxu1 %v2559_v29  ;;  %v1677_v29 = vshrl.u32 %v2265_v25, 16 }
  0x53   : > { %2378 = vmatpush3.bf16.msra.mxu0 %v2560_v30  ;;  %v1684_v30 = vshrl.u32 %v1675_v28, 16 }
  0x54   : > { %2379 = vmatprep.subr.bf16.mxu0 %v2562_v31  ;;  %v1686_v31 = vshll.u32 %v1675_v28, 16 }
  0x55   : > { %2400 = vmatpush3.bf16.msra.mxu1 %v2561_v32  ;;  %v1681_v32 = vrot.slane %v1679_v27, 1 }
  0x56   : > { %2401 = vmatprep.subr.bf16.mxu1 %v2563_v33  ;;  %v1688_v33 = vrot.slane %v1686_v31, 1 }
  0x57   : > { %2380 = vmatpush3.bf16.msra.mxu0 %v2564_v34  ;;  %v1682_v34 = vor.u32 %v1681_v32, %v1677_v29 }
  0x58   : > { %2381 = vmatprep.subr.bf16.mxu0 %v2566_v35  ;;  %v1689_v35 = vor.u32 %v1688_v33, %v1684_v30 }
  0x59   : > { %2402 = vmatpush3.bf16.msra.mxu1 %v2565_v36 }
  0x5a   : > { %2403 = vmatprep.subr.bf16.mxu1 %v2567_v37 }
  0x5b   : > { %2382 = vmatpush3.bf16.msra.mxu0 %v2568_v38 }
  0x5c   : > { %2383 = vmatprep.subr.bf16.mxu0 %v2570_v39 }
  0x5d   : > { %2404 = vmatpush3.bf16.msra.mxu1 %v2569_v40 }
  0x5e   : > { %2405 = vmatprep.subr.bf16.mxu1 %v2571_v41 }
  0x5f   : > { %2384 = vmatpush3.bf16.msra.mxu0 %v2572_v42 }
  0x60   : > { %2385 = vmatprep.subr.bf16.mxu0 %v2574_v43 }
  0x61   : > { %2406 = vmatpush3.bf16.msra.mxu1 %v2573_v44 }
  0x62   : > { %2407 = vmatprep.subr.bf16.mxu1 %v2575_v45 }
  0x63   : > { %2386 = vmatpush3.bf16.msra.mxu0 %v2576_v46 }
  0x64   : > { %2387 = vmatprep.subr.bf16.mxu0 %v2578_v47 }
  0x65   : > { %2408 = vmatpush3.bf16.msra.mxu1 %v2577_v48 }
  0x66   : > { %2409 = vmatprep.subr.bf16.mxu1 %v2579_v49 }
  0x67   : > { %2388 = vmatpush3.bf16.msra.mxu0 %v2580_v50 }
  0x68   : > { %2389 = vmatprep.subr.bf16.mxu0 %v2582_v51 }
  0x69   : > { %2410 = vmatpush3.bf16.msra.mxu1 %v2581_v52 }
  0x6a   : > { %2411 = vmatprep.subr.bf16.mxu1 %v2583_v53 }
  0x6b   : > { %2390 = vmatpush3.bf16.msra.mxu0 %v2584_v54 }
  0x6c   : > { %2419 = vmatprep.subr.bf16.mxu0 %v2586_v55 }
  0x6d   : > { %2412 = vmatpush3.bf16.msra.mxu1 %v2585_v56  ;;  %v2115_v56 = vld [vmem:[%s3121_s3] ss:$0 sm:$0xff] }
  0x6e   : > { %1299 = vmatmul.mubr.bf16.vlgmr.msra.gmra.mxu0 %v2907_v26  ;;  %2441 = vmatprep.subr.bf16.mxu1 %v2587_v57  ;;  %v2617_v26 = vld [vmem:[%s3120_s2 + $0x180] sm:$0xff]  }
  0x6f   : > { %2420 = vmatpush3.bf16.msra.mxu0 %v2588_v58  ;;  %1625 = vmatprep.mubr.bf16.mxu0 %v1494_v24 }
  0x70   : > { %2421 = vmatprep.subr.bf16.mxu0 %v2590_v59  ;;  %1446 = vmatmul.mubr.bf16.vlgmr.msra.gmra.mxu1 %v2890_v12  ;;  %v2605_v12 = vld [vmem:[%s3120_s2 + $0x198] sm:$0xff]  }
  0x71   : > { %2442 = vmatpush3.bf16.msra.mxu1 %v2589_v60  ;;  %1820 = vmatprep.mubr.bf16.mxu1 %v1689_v35 }
  0x72   : > { %2443 = vmatprep.subr.bf16.mxu1 %v2591_v61 }
  0x73   : > { %2422 = vmatpush3.bf16.msra.mxu0 %v2592_v62 }
  0x74   : > { %2423 = vmatprep.subr.bf16.mxu0 %v2594_v63 }
  0x75   : > { %2444 = vmatpush3.bf16.msra.mxu1 %v2593_v0 }
  0x76   : > { %2445 = vmatprep.subr.bf16.mxu1 %v2595_v1 }
  0x77   : > { %2424 = vmatpush3.bf16.msra.mxu0 %v2596_v2 }
  0x78   : > { %2425 = vmatprep.subr.bf16.mxu0 %v2598_v3 }
  0x79   : > { %2446 = vmatpush3.bf16.msra.mxu1 %v2597_v4 }
  0x7a   : > { %2447 = vmatprep.subr.bf16.mxu1 %v2599_v5 }
  0x7b   : > { %2426 = vmatpush3.bf16.msra.mxu0 %v2600_v6 }
  0x7c   : > { %2427 = vmatprep.subr.bf16.mxu0 %v2602_v7 }
  0x7d   : > { %2448 = vmatpush3.bf16.msra.mxu1 %v2601_v8 }
  0x7e   : > { %2449 = vmatprep.subr.bf16.mxu1 %v2603_v9 }
  0x7f   : > { %2428 = vmatpush3.bf16.msra.mxu0 %v2604_v10 }
  0x80   : > { %2429 = vmatprep.subr.bf16.mxu0 %v2606_v11 }
  0x81   : > { %2450 = vmatpush3.bf16.msra.mxu1 %v2605_v12 }
  0x82   : > { %2451 = vmatprep.subr.bf16.mxu1 %v2607_v13 }
  0x83   : > { %2430 = vmatpush3.bf16.msra.mxu0 %v2608_v14 }
  0x84   : > { %2431 = vmatprep.subr.bf16.mxu0 %v2610_v15 }
  0x85   : > { %2452 = vmatpush3.bf16.msra.mxu1 %v2609_v16 }
  0x86   : > { %2453 = vmatprep.subr.bf16.mxu1 %v2611_v17 }
  0x87   : > { %2432 = vmatpush3.bf16.msra.mxu0 %v2612_v18 }
  0x88   : > { %2433 = vmatprep.subr.bf16.mxu0 %v2614_v19 }
  0x89   : > { %2454 = vmatpush3.bf16.msra.mxu1 %v2613_v20 }
  0x8a   : > { %2455 = vmatprep.subr.bf16.mxu1 %v2615_v21 }
  0x8b   : > { %2434 = vmatpush3.bf16.msra.mxu0 %v2616_v22 }
  0x8d   : > { %2456 = vmatpush3.bf16.msra.mxu1 %v2617_v26 }
  0x8e   : > { %1626 = vmatmul.mubr.bf16.vlgmr.msra.gmra.mxu0 %v2216_v23 }
  0x90   : > { %1821 = vmatmul.mubr.bf16.vlgmr.msra.gmra.mxu1 %v1682_v34 }
  0xee   : > { %v2303_v39 = vpop.f32.mrf.mxu0 }
  0xef   : > { %v2325_v36 = vpop.f32.mrf.mxu1 }
  0xf0   : > { %v2304_v41 = vpop.f32.mrf.mxu0 }
  0xf1   : > { %v2326_v37 = vpop.f32.mrf.mxu1  ;;  %v2305_v44 = vadd.f32 %v2304_v41, %v2303_v39 }
  0xf2   : > { %v2306_v42 = vpop.f32.mrf.mxu0  ;;  %v2327_v45 = vadd.f32 %v2326_v37, %v2325_v36 }
  0xf3   : > { %v2328_v38 = vpop.f32.mrf.mxu1 }
  0xf4   : > { %v2307_v43 = vpop.f32.mrf.mxu0  ;;  %v683_v48 = vadd.f32 %v2327_v45, %v2305_v44 }
  0xf5   : > { %v2329_v40 = vpop.f32.mrf.mxu1 }
 0x10e   : > { %v2347_v46 = vpop.f32.mrf.mxu0 }
 0x10f   : > { %v2369_v49 = vpop.f32.mrf.mxu1 }
 0x110   : > { %v2348_v47 = vpop.f32.mrf.mxu0 }
 0x111   : > { %v2349_v50 = vadd.f32 %v2348_v47, %v2347_v46  ;;  %v2370_v53 = vpop.f32.mrf.mxu1 }
 0x112   : > { %v2350_v51 = vpop.f32.mrf.mxu0  ;;  %v2371_v54 = vadd.f32 %v2370_v53, %v2369_v49 }
 0x113   : > { %v870_v52 = vadd.f32 %v2349_v50, %v683_v48  ;;  %v2372_v57 = vpop.f32.mrf.mxu1 }
 0x114   : > { %v2351_v55 = vpop.f32.mrf.mxu0 }
 0x115   : > { %v1066_v58 = vadd.f32 %v2371_v54, %v870_v52  ;;  %v2373_v59 = vpop.f32.mrf.mxu1 }
 0x117   : > { %v1073_v60 = vadd.f32 %v2115_v56, %v1066_v58 }
 0x119   : > { %vm1074_vm0 = vcmp.ge.f32.partialorder %v1073_v60, 0.0  ;;  %v1075_v61 = vmul.f32 0.2, %v1073_v60 }
 0x11b   : > { %v1076_v62 = vsel %vm1074_vm0, %v1073_v60, %v1075_v61 }
 0x11c   : > { %v1077_v63 = vpack.c.bf16 %v1076_v62, %v1076_v62 }
 0x11e   : > { %1078 = vst [vmem:[%s3105_s9] sm:$0x1] %v1077_v63 }
 0x12e   : > { %v2391_v0 = vpop.f32.mrf.mxu0 }
 0x130   : > { %v2392_v1 = vpop.f32.mrf.mxu0  ;;  %v2413_v2 = vpop.f32.mrf.mxu1 }
 0x131   : > { %v2393_v8 = vadd.f32 %v2392_v1, %v2391_v0 }
 0x132   : > { %v2394_v3 = vpop.f32.mrf.mxu0  ;;  %v2414_v4 = vpop.f32.mrf.mxu1 }
 0x133   : > { %v2415_v9 = vadd.f32 %v2414_v4, %v2413_v2 }
 0x134   : > { %v2395_v5 = vpop.f32.mrf.mxu0  ;;  %v2416_v6 = vpop.f32.mrf.mxu1 }
 0x135   : > { %v1448_v13 = vadd.f32 %v2415_v9, %v2393_v8 }
 0x136   : > { %v2417_v7 = vpop.f32.mrf.mxu1 }
 0x14e   : > { %v2435_v10 = vpop.f32.mrf.mxu0 }
 0x150   : > { %v2436_v11 = vpop.f32.mrf.mxu0  ;;  %v2457_v15 = vpop.f32.mrf.mxu1 }
 0x151   : > { %v2437_v12 = vadd.f32 %v2436_v11, %v2435_v10 }
 0x152   : > { %v2438_v14 = vpop.f32.mrf.mxu0  ;;  %v2458_v18 = vpop.f32.mrf.mxu1 }
 0x153   : > { %v1633_v16 = vadd.f32 %v2437_v12, %v1448_v13  ;;  %v2459_v19 = vadd.f32 %v2458_v18, %v2457_v15 }
 0x154   : > { %v2439_v17 = vpop.f32.mrf.mxu0  ;;  %v2460_v20 = vpop.f32.mrf.mxu1 }
 0x155   : > { %v1828_v21 = vadd.f32 %v2459_v19, %v1633_v16 }
 0x156   : > { %v2461_v22 = vpop.f32.mrf.mxu1 }
 0x157   : > { %v1829_v23 = vadd.f32 %v2115_v56, %v1828_v21 }
 0x159   : > { %vm1830_vm1 = vcmp.ge.f32.partialorder %v1829_v23, 0.0  ;;  %v1831_v24 = vmul.f32 0.2, %v1829_v23 }
 0x15b   : > { %v1832_v25 = vsel %vm1830_vm1, %v1829_v23, %v1831_v24 }
 0x15c   : > { %v1833_v26 = vpack.c.bf16 %v1832_v25, %v1832_v25 }
 0x15e   : > { %2282 = vst [vmem:[%s3105_s9 + $0x1] sm:$0x1] %v1833_v26 }
 0x15f PF: > { %s14_s17 = sadd.s32 1, %s2640_s17   ;;  %s3123_s15 = smov %s2636_s16 }
 0x160   : > { %p11_p5 = scmp.ge.s32.totalorder %s14_s17, 4   ;;  %s3124_s16 = smov %s3126_s18 }
 0x162   :  { %13 = sbr.rel (!%p11_p5) target bundleno = 2 (0x2), region = 74 }

// kernel: fc_discriminator_forward.9
= control target key start
LH: loop header
LB: loop body
LE: loop exit
PB: predicated region body
PF: predicated region fallthrough
CT: control target
= control target key end

     0   :  { %s2534_s15 = smov 0   ;;  %s2536_s16 = smov 0   ;;  %s2995_s0 = inlined_call_operand.vmem [shape: bf16[2,2,2,512], index: 0, kind: input, shape index: {}, may-alias: {0,1}]   ;;  %s2996_s1 = inlined_call_operand.vmem [shape: bf16[2,2,2,512], index: 1, kind: input, shape index: {}, may-alias: {0,1}]   ;;  %s2997_s2 = inlined_call_operand.vmem [shape: bf16[4,512,128], index: 2, kind: input, shape index: {}]   ;;  %s2998_s3 = inlined_call_operand.vmem [shape: f32[1,128], index: 3, kind: input, shape index: {}]   ;;  %s2999_s4 = inlined_call_operand.vmem [shape: f32[2,1,1,128], index: 4, kind: output, shape index: {}]  }
   0x1   :  { %s2538_s17 = smov 0  }
   0x2 LB: > { %s26_s18 = sadd.s32 1, %s2502_s16  ;;  %p1827_p0 = scmp.ge.s32.totalorder %s2506_s17, 1  ;;  %s2506_s17 = sphi %s2538_s17, %s14_s17   ;;  %s2502_s16 = sphi %s2536_s16, %s3001_s16   ;;  %s2498_s15 = sphi %s2534_s15, %s3000_s15  }
   0x3   : > { %p28_p1 = scmp.ge.s32.totalorder %s26_s18, 2  ;;  %p200_p2 = scmp.lt.s32.totalorder %s2506_s17, 3 }
   0x5   : > { %s3003_s18 = smov (%p28_p1, %s26_s18), 0  ;;  %p201_p3 = pnand %p1827_p0, %p200_p2 }
   0x6   : > { %p239_p4 = scmp.lt.s32.totalorder (!%p201_p3), %s2498_s15, 1 }
   0x7   : > { %204 = sbr.rel (%p201_p3) target bundleno = 348 (0x15c), region = 36 }
   0xc   : > { %v2356_v0 = vld [vmem:[%s2997_s2 + $0x178] sm:$0xff]   ;;  %v2360_v4 = vld [vmem:[%s2997_s2 + $0x170] sm:$0xff]   ;;  %v2364_v8 = vld [vmem:[%s2997_s2 + $0x168] sm:$0xff]   ;;  %s3005_s15 = smov (!%p239_p4, %s2498_s15), 1  ;;  %v407_v30 = vlaneseq  ;;  %v2508_v34 = vmov 1966171168  }
   0xd   : > { %v2357_v1 = vld [vmem:[%s2997_s2 + $0x1f8] sm:$0xff]   ;;  %2155 = vmatprep.subr.bf16.mxu0 %v2356_v0  ;;  %v2361_v5 = vld [vmem:[%s2997_s2 + $0x1f0] sm:$0xff]   ;;  %v2365_v9 = vld [vmem:[%s2997_s2 + $0x1e8] sm:$0xff]   ;;  %s1828_s29 = sshll.u32 %s3005_s15, 3  ;;  %v405_v35 = vunpack.c.l.s4 %v2508_v34  ;;  %s262_s28 = scalar_lea.vmem %s2999_s4, %s3005_s15 }
   0xe   : > { %v2358_v2 = vld [vmem:[%s2997_s2 + $0x138] sm:$0xff]   ;;  %2177 = vmatprep.subr.bf16.mxu1 %v2357_v1  ;;  %v2362_v6 = vld [vmem:[%s2997_s2 + $0x130] sm:$0xff]   ;;  %v2366_v10 = vld [vmem:[%s2997_s2 + $0x128] sm:$0xff]   ;;  %s246_s12 = scalar_lea.vmem %s2995_s0, %s1828_s29  ;;  %v408_v36 = vshrl.u32 %v407_v30, 7  ;;  %s254_s22 = sadd.s32 4, %s1828_s29 }
   0xf   : > { %v2359_v3 = vld [vmem:[%s2997_s2 + $0x1b8] sm:$0xff]   ;;  %2156 = vmatpush3.bf16.msra.mxu0 %v2358_v2  ;;  %v2363_v7 = vld [vmem:[%s2997_s2 + $0x1b0] sm:$0xff]   ;;  %v2367_v11 = vld [vmem:[%s2997_s2 + $0x1a8] sm:$0xff]   ;;  %v406_v40 = vunpack.c.0.s8 %v405_v35  ;;  %s255_s6 = scalar_lea.vmem %s2996_s1, %s254_s22 }
  0x10   : > { %2178 = vmatpush3.bf16.msra.mxu1 %v2359_v3  ;;  %2157 = vmatprep.subr.bf16.mxu0 %v2360_v4  ;;  %v2368_v12 = vld [vmem:[%s2997_s2 + $0x160] sm:$0xff]   ;;  %v2372_v16 = vld [vmem:[%s2997_s2 + $0x158] sm:$0xff]   ;;  %v2376_v20 = vld [vmem:[%s2997_s2 + $0x150] sm:$0xff]  }
  0x11   : > { %2179 = vmatprep.subr.bf16.mxu1 %v2361_v5  ;;  %v2369_v13 = vld [vmem:[%s2997_s2 + $0x1e0] sm:$0xff]   ;;  %v2373_v17 = vld [vmem:[%s2997_s2 + $0x1d8] sm:$0xff]   ;;  %v2377_v21 = vld [vmem:[%s2997_s2 + $0x1d0] sm:$0xff]   ;;  %v2666_v41 = vsub.s32 %v406_v40, %v408_v36 }
  0x12   : > { %v2370_v14 = vld [vmem:[%s2997_s2 + $0x120] sm:$0xff]   ;;  %v2374_v18 = vld [vmem:[%s2997_s2 + $0x118] sm:$0xff]   ;;  %v2378_v22 = vld [vmem:[%s2997_s2 + $0x110] sm:$0xff]  }
  0x13   : > { %2158 = vmatpush3.bf16.msra.mxu0 %v2362_v6  ;;  %v2371_v15 = vld [vmem:[%s2997_s2 + $0x1a0] sm:$0xff]   ;;  %v2375_v19 = vld [vmem:[%s2997_s2 + $0x198] sm:$0xff]   ;;  %v2379_v23 = vld [vmem:[%s2997_s2 + $0x190] sm:$0xff]  }
  0x14   : > { %2180 = vmatpush3.bf16.msra.mxu1 %v2363_v7  ;;  %2159 = vmatprep.subr.bf16.mxu0 %v2364_v8  ;;  %v2380_v24 = vld [vmem:[%s2997_s2 + $0x148] sm:$0xff]   ;;  %v2384_v28 = vld [vmem:[%s2997_s2 + $0x140] sm:$0xff]   ;;  %v2388_v37 = vld [vmem:[%s2997_s2 + $0x78] sm:$0xff]  }
  0x15   : > { %2181 = vmatprep.subr.bf16.mxu1 %v2365_v9  ;;  %v2381_v25 = vld [vmem:[%s2997_s2 + $0x1c8] sm:$0xff]   ;;  %v2385_v29 = vld [vmem:[%s2997_s2 + $0x1c0] sm:$0xff]   ;;  %v2389_v38 = vld [vmem:[%s2997_s2 + $0xf8] sm:$0xff]  }
  0x16   : > { %v2382_v26 = vld [vmem:[%s2997_s2 + $0x108] sm:$0xff]   ;;  %v2386_v31 = vld [vmem:[%s2997_s2 + $0x100] sm:$0xff]   ;;  %v2390_v44 = vld [vmem:[%s2997_s2 + $0x38] sm:$0xff]  }
  0x17   : > { %2160 = vmatpush3.bf16.msra.mxu0 %v2366_v10  ;;  %v2383_v27 = vld [vmem:[%s2997_s2 + $0x188] sm:$0xff]   ;;  %v2387_v32 = vld [vmem:[%s2997_s2 + $0x180] sm:$0xff]   ;;  %v2392_v49 = vld [vmem:[%s2997_s2 + $0x70] sm:$0xff]  }
  0x18   : > { %2182 = vmatpush3.bf16.msra.mxu1 %v2367_v11  ;;  %2161 = vmatprep.subr.bf16.mxu0 %v2368_v12  ;;  %v1894_v33 = vld.sshfl [vmem:[%s246_s12] sm:$0x33 pattern:$0x75316420]  ;;  %v2391_v52 = vld [vmem:[%s2997_s2 + $0xb8] sm:$0xff]   ;;  %v2393_v53 = vld [vmem:[%s2997_s2 + $0xf0] sm:$0xff]  }
  0x19   : > { %2183 = vmatprep.subr.bf16.mxu1 %v2369_v13  ;;  %v403_v39 = vcombine.high %v1894_v33, %v1894_v33  ;;  %v2670_v43 = vrot.slane %v1894_v33, %v2666_v41  ;;  %v2394_v54 = vld [vmem:[%s2997_s2 + $0x30] sm:$0xff]   ;;  %v2396_v55 = vld [vmem:[%s2997_s2 + $0x68] sm:$0xff]   ;;  %v2400_v59 = vld [vmem:[%s2997_s2 + $0x60] sm:$0xff]  }
  0x1a   : > { %v2395_v56 = vld [vmem:[%s2997_s2 + $0xb0] sm:$0xff]   ;;  %v2397_v57 = vld [vmem:[%s2997_s2 + $0xe8] sm:$0xff]   ;;  %v2401_v61 = vld [vmem:[%s2997_s2 + $0xe0] sm:$0xff]  }
  0x1b   : > { %2162 = vmatpush3.bf16.msra.mxu0 %v2370_v14  ;;  %v417_v42 = vrot.slane %v403_v39, %v2666_v41  ;;  %v421_v47 = vshrl.u32 %v2670_v43, 16  ;;  %v2678_v48 = vcombine.high %v2670_v43, %v2670_v43  ;;  %v2398_v58 = vld [vmem:[%s2997_s2 + $0x28] sm:$0xff]   ;;  %v2402_v62 = vld [vmem:[%s2997_s2 + $0x20] sm:$0xff]   ;;  %v2404_v63 = vld [vmem:[%s2997_s2 + $0x58] sm:$0xff]  }
  0x1c   : > { %2184 = vmatpush3.bf16.msra.mxu1 %v2371_v15  ;;  %2163 = vmatprep.subr.bf16.mxu0 %v2372_v16  ;;  %v2399_v60 = vld [vmem:[%s2997_s2 + $0xa8] sm:$0xff]   ;;  %v2403_v0 = vld [vmem:[%s2997_s2 + $0xa0] sm:$0xff]   ;;  %v2405_v1 = vld [vmem:[%s2997_s2 + $0xd8] sm:$0xff]  }
  0x1d   : > { %2185 = vmatprep.subr.bf16.mxu1 %v2373_v17  ;;  %v424_v45 = vshrl.u32 %v417_v42, 16  ;;  %v419_v46 = vcombine.high %v417_v42, %v417_v42  ;;  %v427_v51 = vshrl.u32 %v2678_v48, 16  ;;  %v2406_v2 = vld [vmem:[%s2997_s2 + $0x18] sm:$0xff]   ;;  %v2408_v3 = vld [vmem:[%s2997_s2 + $0x50] sm:$0xff]   ;;  %v2412_v7 = vld [vmem:[%s2997_s2 + $0x48] sm:$0xff]  }
  0x1e   : > { %v2407_v4 = vld [vmem:[%s2997_s2 + $0x98] sm:$0xff]   ;;  %v2409_v5 = vld [vmem:[%s2997_s2 + $0xd0] sm:$0xff]   ;;  %v2413_v9 = vld [vmem:[%s2997_s2 + $0xc8] sm:$0xff]  }
  0x1f   : > { %2164 = vmatpush3.bf16.msra.mxu0 %v2374_v18  ;;  %660 = vmatprep.mubr.bf16.mxu0 %v424_v45  ;;  %v430_v50 = vshrl.u32 %v419_v46, 16  ;;  %v2410_v6 = vld [vmem:[%s2997_s2 + $0x10] sm:$0xff]   ;;  %v2414_v10 = vld [vmem:[%s2997_s2 + $0x8] sm:$0xff]   ;;  %v2416_v11 = vld [vmem:[%s2997_s2 + $0x40] sm:$0xff]  }
  0x20   : > { %2186 = vmatpush3.bf16.msra.mxu1 %v2375_v19  ;;  %2165 = vmatprep.subr.bf16.mxu0 %v2376_v20  ;;  %v2411_v8 = vld [vmem:[%s2997_s2 + $0x90] sm:$0xff]   ;;  %v2415_v12 = vld [vmem:[%s2997_s2 + $0x88] sm:$0xff]   ;;  %v2417_v13 = vld [vmem:[%s2997_s2 + $0xc0] sm:$0xff]  }
  0x21   : > { %2187 = vmatprep.subr.bf16.mxu1 %v2377_v21  ;;  %700 = vmatprep.mubr.bf16.mxu1 %v430_v50  ;;  %v2418_v14 = vld [vmem:[%s2997_s2] sm:$0xff]   ;;  %v2420_v15 = vld [vmem:[%s2997_s2 + $0x278] sm:$0xff]   ;;  %v2424_v19 = vld [vmem:[%s2997_s2 + $0x270] sm:$0xff]  }
  0x22   : > { %v2419_v16 = vld [vmem:[%s2997_s2 + $0x80] sm:$0xff]   ;;  %v2421_v17 = vld [vmem:[%s2997_s2 + $0x2f8] sm:$0xff]   ;;  %v2425_v21 = vld [vmem:[%s2997_s2 + $0x2f0] sm:$0xff]  }
  0x23   : > { %2166 = vmatpush3.bf16.msra.mxu0 %v2378_v22  ;;  %v2422_v18 = vld [vmem:[%s2997_s2 + $0x238] sm:$0xff]   ;;  %v2426_v22 = vld [vmem:[%s2997_s2 + $0x230] sm:$0xff]   ;;  %v2434_v30 = vld [vmem:[%s2997_s2 + $0x220] sm:$0xff]  }
  0x24   : > { %2188 = vmatpush3.bf16.msra.mxu1 %v2379_v23  ;;  %2167 = vmatprep.subr.bf16.mxu0 %v2380_v24  ;;  %v2423_v20 = vld [vmem:[%s2997_s2 + $0x2b8] sm:$0xff]   ;;  %v2428_v23 = vld [vmem:[%s2997_s2 + $0x268] sm:$0xff]   ;;  %v2427_v24 = vld [vmem:[%s2997_s2 + $0x2b0] sm:$0xff]  }
  0x25   : > { %2189 = vmatprep.subr.bf16.mxu1 %v2381_v25  ;;  %v2429_v25 = vld [vmem:[%s2997_s2 + $0x2e8] sm:$0xff]   ;;  %v2437_v33 = vld [vmem:[%s2997_s2 + $0x2d8] sm:$0xff]   ;;  %v2440_v35 = vld [vmem:[%s2997_s2 + $0x250] sm:$0xff]  }
  0x26   : > { %v2438_v34 = vld [vmem:[%s2997_s2 + $0x218] sm:$0xff]   ;;  %v2444_v39 = vld [vmem:[%s2997_s2 + $0x248] sm:$0xff]   ;;  %v2443_v40 = vld [vmem:[%s2997_s2 + $0x290] sm:$0xff]  }
  0x27   : > { %2168 = vmatpush3.bf16.msra.mxu0 %v2382_v26  ;;  %v2430_v26 = vld [vmem:[%s2997_s2 + $0x228] sm:$0xff]   ;;  %v2439_v36 = vld [vmem:[%s2997_s2 + $0x298] sm:$0xff]   ;;  %v2023_v45 = vld.sshfl [vmem:[%s255_s6] sm:$0x33 pattern:$0x75316420] }
  0x28   : > { %2190 = vmatpush3.bf16.msra.mxu1 %v2383_v27  ;;  %2169 = vmatprep.subr.bf16.mxu0 %v2384_v28  ;;  %v2432_v27 = vld [vmem:[%s2997_s2 + $0x260] sm:$0xff]   ;;  %v2431_v28 = vld [vmem:[%s2997_s2 + $0x2a8] sm:$0xff]  }
  0x29   : > { %2191 = vmatprep.subr.bf16.mxu1 %v2385_v29  ;;  %v2433_v29 = vld [vmem:[%s2997_s2 + $0x2e0] sm:$0xff]  }
  0x2a   : > { %v2450_v50 = vld [vmem:[%s2997_s2 + $0x200] sm:$0xff]  }
  0x2b   : > { %2170 = vmatpush3.bf16.msra.mxu0 %v2386_v31  ;;  %v2436_v31 = vld [vmem:[%s2997_s2 + $0x258] sm:$0xff]  }
  0x2c   : > { %2192 = vmatpush3.bf16.msra.mxu1 %v2387_v32  ;;  %2199 = vmatprep.subr.bf16.mxu0 %v2388_v37  ;;  %v2435_v32 = vld [vmem:[%s2997_s2 + $0x2a0] sm:$0xff]   ;;  %v2441_v37 = vld [vmem:[%s2997_s2 + $0x2d0] sm:$0xff]  }
  0x2d   : > { %2221 = vmatprep.subr.bf16.mxu1 %v2389_v38  ;;  %v2442_v38 = vld [vmem:[%s2997_s2 + $0x210] sm:$0xff]  }
  0x2e   : > { %661 = vmatmul.mubr.bf16.vlgmr.msra.gmra.mxu0 %v421_v47  ;;  %v2447_v47 = vld [vmem:[%s2997_s2 + $0x288] sm:$0xff]  }
  0x2f   : > { %2200 = vmatpush3.bf16.msra.mxu0 %v2390_v44  ;;  %701 = vmatmul.mubr.bf16.vlgmr.msra.gmra.mxu1 %v427_v51  ;;  %v2448_v44 = vld [vmem:[%s2997_s2 + $0x240] sm:$0xff]  }
  0x30   : > { %2201 = vmatprep.subr.bf16.mxu0 %v2392_v49  ;;  %2222 = vmatpush3.bf16.msra.mxu1 %v2391_v52  ;;  %v2870_v52 = vrot.slane %v2023_v45, %v2666_v41 }
  0x31   : > { %936 = vmatprep.mubr.bf16.mxu0 %v417_v42  ;;  %2223 = vmatprep.subr.bf16.mxu1 %v2393_v53  ;;  %v2445_v42 = vld [vmem:[%s2997_s2 + $0x2c8] sm:$0xff]   ;;  %v2452_v53 = vld [vmem:[%s2997_s2 + $0x378] sm:$0xff]  }
  0x32   : > { %976 = vmatprep.mubr.bf16.mxu1 %v419_v46  ;;  %v1058_v46 = vcombine.high %v2023_v45, %v2023_v45 }
  0x33   : > { %2202 = vmatpush3.bf16.msra.mxu0 %v2394_v54  ;;  %v2451_v54 = vld [vmem:[%s2997_s2 + $0x280] sm:$0xff]  }
  0x34   : > { %2203 = vmatprep.subr.bf16.mxu0 %v2396_v55  ;;  %2224 = vmatpush3.bf16.msra.mxu1 %v2395_v56  ;;  %v1072_v49 = vrot.slane %v1058_v46, %v2666_v41  ;;  %v2453_v55 = vld [vmem:[%s2997_s2 + $0x3f8] sm:$0xff]  }
  0x35   : > { %2225 = vmatprep.subr.bf16.mxu1 %v2397_v57  ;;  %v2454_v41 = vld [vmem:[%s2997_s2 + $0x338] sm:$0xff]   ;;  %v2886_v57 = vcombine.high %v2870_v52, %v2870_v52 }
  0x36   : > { %v1074_v51 = vcombine.high %v1072_v49, %v1072_v49  ;;  %v1447_v56 = vshrl.u32 %v1072_v49, 16 }
  0x37   : > { %2204 = vmatpush3.bf16.msra.mxu0 %v2398_v58  ;;  %v2456_v58 = vld [vmem:[%s2997_s2 + $0x370] sm:$0xff]  }
  0x38   : > { %2205 = vmatprep.subr.bf16.mxu0 %v2400_v59  ;;  %2226 = vmatpush3.bf16.msra.mxu1 %v2399_v60  ;;  %v2455_v59 = vld [vmem:[%s2997_s2 + $0x3b8] sm:$0xff]   ;;  %v1453_v60 = vshrl.u32 %v1074_v51, 16 }
  0x39   : > { %2227 = vmatprep.subr.bf16.mxu1 %v2401_v61  ;;  %v2457_v61 = vld [vmem:[%s2997_s2 + $0x3f0] sm:$0xff]  }
  0x3b   : > { %2206 = vmatpush3.bf16.msra.mxu0 %v2402_v62  ;;  %v2458_v62 = vld [vmem:[%s2997_s2 + $0x330] sm:$0xff]  }
  0x3c   : > { %2207 = vmatprep.subr.bf16.mxu0 %v2404_v63  ;;  %2228 = vmatpush3.bf16.msra.mxu1 %v2403_v0  ;;  %v2460_v63 = vld [vmem:[%s2997_s2 + $0x368] sm:$0xff]   ;;  %v2459_v0 = vld [vmem:[%s2997_s2 + $0x3b0] sm:$0xff]  }
  0x3d   : > { %2229 = vmatprep.subr.bf16.mxu1 %v2405_v1  ;;  %v2461_v1 = vld [vmem:[%s2997_s2 + $0x3e8] sm:$0xff]  }
  0x3f   : > { %2208 = vmatpush3.bf16.msra.mxu0 %v2406_v2  ;;  %v2462_v2 = vld [vmem:[%s2997_s2 + $0x328] sm:$0xff]  }
  0x40   : > { %2209 = vmatprep.subr.bf16.mxu0 %v2408_v3  ;;  %2230 = vmatpush3.bf16.msra.mxu1 %v2407_v4  ;;  %v2464_v3 = vld [vmem:[%s2997_s2 + $0x360] sm:$0xff]   ;;  %v2463_v4 = vld [vmem:[%s2997_s2 + $0x3a8] sm:$0xff]  }
  0x41   : > { %2231 = vmatprep.subr.bf16.mxu1 %v2409_v5  ;;  %v2465_v5 = vld [vmem:[%s2997_s2 + $0x3e0] sm:$0xff]  }
  0x43   : > { %2210 = vmatpush3.bf16.msra.mxu0 %v2410_v6  ;;  %v2466_v6 = vld [vmem:[%s2997_s2 + $0x320] sm:$0xff]  }
  0x44   : > { %2211 = vmatprep.subr.bf16.mxu0 %v2412_v7  ;;  %2232 = vmatpush3.bf16.msra.mxu1 %v2411_v8  ;;  %v2468_v7 = vld [vmem:[%s2997_s2 + $0x358] sm:$0xff]   ;;  %v2467_v8 = vld [vmem:[%s2997_s2 + $0x3a0] sm:$0xff]  }
  0x45   : > { %2233 = vmatprep.subr.bf16.mxu1 %v2413_v9  ;;  %v2469_v9 = vld [vmem:[%s2997_s2 + $0x3d8] sm:$0xff]  }
  0x47   : > { %2212 = vmatpush3.bf16.msra.mxu0 %v2414_v10  ;;  %v2470_v10 = vld [vmem:[%s2997_s2 + $0x318] sm:$0xff]  }
  0x48   : > { %2213 = vmatprep.subr.bf16.mxu0 %v2416_v11  ;;  %2234 = vmatpush3.bf16.msra.mxu1 %v2415_v12  ;;  %v2472_v11 = vld [vmem:[%s2997_s2 + $0x350] sm:$0xff]   ;;  %v2471_v12 = vld [vmem:[%s2997_s2 + $0x398] sm:$0xff]  }
  0x49   : > { %2235 = vmatprep.subr.bf16.mxu1 %v2417_v13  ;;  %v2473_v13 = vld [vmem:[%s2997_s2 + $0x3d0] sm:$0xff]  }
  0x4b   : > { %2214 = vmatpush3.bf16.msra.mxu0 %v2418_v14  ;;  %v2474_v14 = vld [vmem:[%s2997_s2 + $0x310] sm:$0xff]  }
  0x4c   : > { %2243 = vmatprep.subr.bf16.mxu0 %v2420_v15  ;;  %2236 = vmatpush3.bf16.msra.mxu1 %v2419_v16  ;;  %v2476_v15 = vld [vmem:[%s2997_s2 + $0x348] sm:$0xff]   ;;  %v2475_v16 = vld [vmem:[%s2997_s2 + $0x390] sm:$0xff]  }
  0x4d   : > { %2265 = vmatprep.subr.bf16.mxu1 %v2421_v17  ;;  %v2477_v17 = vld [vmem:[%s2997_s2 + $0x3c8] sm:$0xff]  }
  0x4e   : > { %937 = vmatmul.mubr.bf16.vlgmr.msra.gmra.mxu0 %v2670_v43  ;;  %v2446_v43 = vld [vmem:[%s2997_s2 + $0x208] sm:$0xff]  }
  0x4f   : > { %2244 = vmatpush3.bf16.msra.mxu0 %v2422_v18  ;;  %977 = vmatmul.mubr.bf16.vlgmr.msra.gmra.mxu1 %v2678_v48  ;;  %v2449_v48 = vld [vmem:[%s2997_s2 + $0x2c0] sm:$0xff]   ;;  %v2478_v18 = vld [vmem:[%s2997_s2 + $0x308] sm:$0xff]  }
  0x50   : > { %2245 = vmatprep.subr.bf16.mxu0 %v2424_v19  ;;  %2266 = vmatpush3.bf16.msra.mxu1 %v2423_v20  ;;  %v2480_v19 = vld [vmem:[%s2997_s2 + $0x340] sm:$0xff]   ;;  %v2479_v20 = vld [vmem:[%s2997_s2 + $0x388] sm:$0xff]  }
  0x51   : > { %2267 = vmatprep.subr.bf16.mxu1 %v2425_v21  ;;  %1303 = vmatprep.mubr.bf16.mxu0 %v1072_v49  ;;  %v2481_v21 = vld [vmem:[%s2997_s2 + $0x3c0] sm:$0xff]  }
  0x52   : > { %1343 = vmatprep.mubr.bf16.mxu1 %v1074_v51 }
  0x53   : > { %2246 = vmatpush3.bf16.msra.mxu0 %v2426_v22  ;;  %v2482_v22 = vld [vmem:[%s2997_s2 + $0x300] sm:$0xff]  }
  0x54   : > { %2247 = vmatprep.subr.bf16.mxu0 %v2428_v23  ;;  %2268 = vmatpush3.bf16.msra.mxu1 %v2427_v24  ;;  %v2483_v23 = vld [vmem:[%s2997_s2 + $0x380] sm:$0xff]   ;;  %v1444_v24 = vshrl.u32 %v2870_v52, 16 }
  0x55   : > { %2269 = vmatprep.subr.bf16.mxu1 %v2429_v25  ;;  %v1450_v25 = vshrl.u32 %v2886_v57, 16 }
  0x57   : > { %2248 = vmatpush3.bf16.msra.mxu0 %v2430_v26 }
  0x58   : > { %2249 = vmatprep.subr.bf16.mxu0 %v2432_v27  ;;  %2270 = vmatpush3.bf16.msra.mxu1 %v2431_v28 }
  0x59   : > { %2271 = vmatprep.subr.bf16.mxu1 %v2433_v29 }
  0x5b   : > { %2250 = vmatpush3.bf16.msra.mxu0 %v2434_v30 }
  0x5c   : > { %2251 = vmatprep.subr.bf16.mxu0 %v2436_v31  ;;  %2272 = vmatpush3.bf16.msra.mxu1 %v2435_v32 }
  0x5d   : > { %2273 = vmatprep.subr.bf16.mxu1 %v2437_v33 }
  0x5f   : > { %2252 = vmatpush3.bf16.msra.mxu0 %v2438_v34 }
  0x60   : > { %2253 = vmatprep.subr.bf16.mxu0 %v2440_v35  ;;  %2274 = vmatpush3.bf16.msra.mxu1 %v2439_v36 }
  0x61   : > { %2275 = vmatprep.subr.bf16.mxu1 %v2441_v37 }
  0x63   : > { %2254 = vmatpush3.bf16.msra.mxu0 %v2442_v38 }
  0x64   : > { %2255 = vmatprep.subr.bf16.mxu0 %v2444_v39  ;;  %2276 = vmatpush3.bf16.msra.mxu1 %v2443_v40 }
  0x65   : > { %2277 = vmatprep.subr.bf16.mxu1 %v2445_v42 }
  0x67   : > { %2256 = vmatpush3.bf16.msra.mxu0 %v2446_v43 }
  0x68   : > { %2257 = vmatprep.subr.bf16.mxu0 %v2448_v44  ;;  %2278 = vmatpush3.bf16.msra.mxu1 %v2447_v47 }
  0x69   : > { %2279 = vmatprep.subr.bf16.mxu1 %v2449_v48 }
  0x6b   : > { %2258 = vmatpush3.bf16.msra.mxu0 %v2450_v50 }
  0x6c   : > { %2287 = vmatprep.subr.bf16.mxu0 %v2452_v53  ;;  %2280 = vmatpush3.bf16.msra.mxu1 %v2451_v54 }
  0x6d   : > { %2309 = vmatprep.subr.bf16.mxu1 %v2453_v55 }
  0x6e   : > { %1304 = vmatmul.mubr.bf16.vlgmr.msra.gmra.mxu0 %v2870_v52 }
  0x6f   : > { %2288 = vmatpush3.bf16.msra.mxu0 %v2454_v41  ;;  %1683 = vmatprep.mubr.bf16.mxu0 %v1447_v56 }
  0x70   : > { %1344 = vmatmul.mubr.bf16.vlgmr.msra.gmra.mxu1 %v2886_v57  ;;  %2289 = vmatprep.subr.bf16.mxu0 %v2456_v58 }
  0x71   : > { %2310 = vmatpush3.bf16.msra.mxu1 %v2455_v59  ;;  %1723 = vmatprep.mubr.bf16.mxu1 %v1453_v60 }
  0x72   : > { %2311 = vmatprep.subr.bf16.mxu1 %v2457_v61 }
  0x73   : > { %2290 = vmatpush3.bf16.msra.mxu0 %v2458_v62 }
  0x74   : > { %2291 = vmatprep.subr.bf16.mxu0 %v2460_v63 }
  0x75   : > { %2312 = vmatpush3.bf16.msra.mxu1 %v2459_v0 }
  0x76   : > { %2313 = vmatprep.subr.bf16.mxu1 %v2461_v1 }
  0x77   : > { %2292 = vmatpush3.bf16.msra.mxu0 %v2462_v2 }
  0x78   : > { %2293 = vmatprep.subr.bf16.mxu0 %v2464_v3 }
  0x79   : > { %2314 = vmatpush3.bf16.msra.mxu1 %v2463_v4 }
  0x7a   : > { %2315 = vmatprep.subr.bf16.mxu1 %v2465_v5 }
  0x7b   : > { %2294 = vmatpush3.bf16.msra.mxu0 %v2466_v6 }
  0x7c   : > { %2295 = vmatprep.subr.bf16.mxu0 %v2468_v7  ;;  %v264_v7 = vld [vmem:[%s2998_s3] sm:$0x1] }
  0x7d   : > { %2316 = vmatpush3.bf16.msra.mxu1 %v2467_v8 }
  0x7e   : > { %2317 = vmatprep.subr.bf16.mxu1 %v2469_v9 }
  0x7f   : > { %2296 = vmatpush3.bf16.msra.mxu0 %v2470_v10 }
  0x80   : > { %2297 = vmatprep.subr.bf16.mxu0 %v2472_v11 }
  0x81   : > { %2318 = vmatpush3.bf16.msra.mxu1 %v2471_v12 }
  0x82   : > { %2319 = vmatprep.subr.bf16.mxu1 %v2473_v13 }
  0x83   : > { %2298 = vmatpush3.bf16.msra.mxu0 %v2474_v14 }
  0x84   : > { %2299 = vmatprep.subr.bf16.mxu0 %v2476_v15 }
  0x85   : > { %2320 = vmatpush3.bf16.msra.mxu1 %v2475_v16 }
  0x86   : > { %2321 = vmatprep.subr.bf16.mxu1 %v2477_v17 }
  0x87   : > { %2300 = vmatpush3.bf16.msra.mxu0 %v2478_v18 }
  0x88   : > { %2301 = vmatprep.subr.bf16.mxu0 %v2480_v19 }
  0x89   : > { %2322 = vmatpush3.bf16.msra.mxu1 %v2479_v20 }
  0x8a   : > { %2323 = vmatprep.subr.bf16.mxu1 %v2481_v21 }
  0x8b   : > { %2302 = vmatpush3.bf16.msra.mxu0 %v2482_v22 }
  0x8d   : > { %2324 = vmatpush3.bf16.msra.mxu1 %v2483_v23 }
  0x8e   : > { %1684 = vmatmul.mubr.bf16.vlgmr.msra.gmra.mxu0 %v1444_v24 }
  0x90   : > { %1724 = vmatmul.mubr.bf16.vlgmr.msra.gmra.mxu1 %v1450_v25 }
  0xee   : > { %v2171_v26 = vpop.f32.mrf.mxu0 }
  0xef   : > { %v2193_v27 = vpop.f32.mrf.mxu1 }
  0xf0   : > { %v2172_v28 = vpop.f32.mrf.mxu0 }
  0xf1   : > { %v2173_v29 = vadd.f32 %v2172_v28, %v2171_v26  ;;  %v2194_v30 = vpop.f32.mrf.mxu1 }
  0xf2   : > { %v2174_v31 = vpop.f32.mrf.mxu0  ;;  %v2195_v32 = vadd.f32 %v2194_v30, %v2193_v27 }
  0xf3   : > { %v2196_v33 = vpop.f32.mrf.mxu1 }
  0xf4   : > { %v2175_v34 = vpop.f32.mrf.mxu0  ;;  %v703_v35 = vadd.f32 %v2195_v32, %v2173_v29 }
  0xf5   : > { %v2197_v36 = vpop.f32.mrf.mxu1 }
 0x10e   : > { %v2215_v37 = vpop.f32.mrf.mxu0 }
 0x10f   : > { %v2237_v38 = vpop.f32.mrf.mxu1 }
 0x110   : > { %v2216_v39 = vpop.f32.mrf.mxu0 }
 0x111   : > { %v2217_v40 = vadd.f32 %v2216_v39, %v2215_v37  ;;  %v2238_v42 = vpop.f32.mrf.mxu1 }
 0x112   : > { %v2218_v43 = vpop.f32.mrf.mxu0  ;;  %v2239_v45 = vadd.f32 %v2238_v42, %v2237_v38 }
 0x113   : > { %v939_v44 = vadd.f32 %v2217_v40, %v703_v35  ;;  %v2240_v46 = vpop.f32.mrf.mxu1 }
 0x114   : > { %v2219_v47 = vpop.f32.mrf.mxu0 }
 0x115   : > { %v979_v48 = vadd.f32 %v2239_v45, %v939_v44  ;;  %v2241_v49 = vpop.f32.mrf.mxu1 }
 0x12e   : > { %v2259_v50 = vpop.f32.mrf.mxu0 }
 0x130   : > { %v2281_v51 = vpop.f32.mrf.mxu1  ;;  %v2260_v52 = vpop.f32.mrf.mxu0 }
 0x131   : > { %v2261_v57 = vadd.f32 %v2260_v52, %v2259_v50 }
 0x132   : > { %v2282_v53 = vpop.f32.mrf.mxu1  ;;  %v2262_v54 = vpop.f32.mrf.mxu0 }
 0x133   : > { %v2283_v58 = vadd.f32 %v2282_v53, %v2281_v51 }
 0x134   : > { %v2284_v55 = vpop.f32.mrf.mxu1  ;;  %v2263_v41 = vpop.f32.mrf.mxu0 }
 0x135   : > { %v1346_v62 = vadd.f32 %v2283_v58, %v2261_v57 }
 0x136   : > { %v2285_v56 = vpop.f32.mrf.mxu1 }
 0x137   : > { %v1351_v5 = vadd.f32 %v1346_v62, %v979_v48 }
 0x14e   : > { %v2303_v59 = vpop.f32.mrf.mxu0 }
 0x150   : > { %v2325_v60 = vpop.f32.mrf.mxu1  ;;  %v2304_v61 = vpop.f32.mrf.mxu0 }
 0x151   : > { %v2305_v63 = vadd.f32 %v2304_v61, %v2303_v59 }
 0x152   : > { %v2326_v0 = vpop.f32.mrf.mxu1  ;;  %v2306_v1 = vpop.f32.mrf.mxu0 }
 0x153   : > { %v2327_v2 = vadd.f32 %v2326_v0, %v2325_v60 }
 0x154   : > { %v2328_v3 = vpop.f32.mrf.mxu1  ;;  %v2307_v4 = vpop.f32.mrf.mxu0 }
 0x155   : > { %v1726_v6 = vadd.f32 %v2327_v2, %v2305_v63 }
 0x156   : > { %v2329_v8 = vpop.f32.mrf.mxu1 }
 0x157   : > { %v1731_v9 = vadd.f32 %v1726_v6, %v1351_v5 }
 0x159   : > { %v1732_v10 = vadd.f32 %v1731_v9, %v264_v7 }
 0x15b   : > { %1733 = vst [vmem:[%s262_s28] sm:$0x1] %v1732_v10 }
 0x15c PF: > { %s14_s17 = sadd.s32 1, %s2506_s17   ;;  %s3000_s15 = smov %s2502_s16 }
 0x15d   : > { %p11_p5 = scmp.ge.s32.totalorder %s14_s17, 4   ;;  %s3001_s16 = smov %s3003_s18 }
 0x15f   :  { %13 = sbr.rel (!%p11_p5) target bundleno = 2 (0x2), region = 72 }

</bundles_post_ra>
